<compile_context>
chip_gen: v5e
topology: v5e:2x2
jax: 0.10.0
libtpu: 0.0.40
codegen_flags: <defaults>
</compile_context>

<pallas_src>
import numpy as np
import jax
import jax.numpy as jnp
from jax.experimental import pallas as pl
from jax.experimental.pallas import tpu as pltpu


# --------------------------- static layer configuration ----------------------
_CONV_DEFS = [  # (C_in, C_out, K, stride, pad)  -- encoder Conv1d layers
    (32, 32, 8, 2, 2),
    (32, 32, 8, 3, 2),
    (32, 16, 6, 2, 1),
    (16, 8, 4, 2, 1),
]
_DECONV_DEFS = [  # (C_in, C_out, K, stride, pad) -- decoder ConvTranspose1d layers
    (8, 16, 4, 2, 1),
    (16, 32, 6, 2, 3),
    (32, 32, 8, 3, 3),
    (32, 32, 8, 2, 4),
]
_CONV_NAMES = ("c1", "c2", "c3", "c4")
_DECONV_NAMES = ("d1", "d2", "d3", "d4")


def _conv_len(L, K, s, p):
    return (L + 2 * p - K) // s + 1


def _deconv_len(L, K, s, p):
    return (L - 1) * s - 2 * p + K


# --------------------------- host-side constant builders ---------------------
def _conv_selectors(L_in, K, stride, pad, L_out):
    """S[k, t, j] = 1 iff t == stride*j + k - pad (implicit zero padding)."""
    k = np.arange(K)[:, None, None]
    t = np.arange(L_in)[None, :, None]
    j = np.arange(L_out)[None, None, :]
    return (t == stride * j + k - pad).astype(np.float32)


def _deconv_selectors(L_in, K, stride, pad, L_out):
    """S[k, j, t] = 1 iff t == stride*j + k - pad (dilation+crop folded in)."""
    k = np.arange(K)[:, None, None]
    j = np.arange(L_in)[None, :, None]
    t = np.arange(L_out)[None, None, :]
    return (t == stride * j + k - pad).astype(np.float32)


def _pool_selectors(L_in):
    """P[k, t, j] = 1 iff t == j + k - 2 (MaxPool1d(4, stride=1, padding=2))."""
    L_out = L_in + 1
    k = np.arange(4)[:, None, None]
    t = np.arange(L_in)[None, :, None]
    j = np.arange(L_out)[None, None, :]
    return (t == j + k - 2).astype(np.float32)


# --------------------------- in-kernel building blocks -----------------------
def _stacked_conv(h, s_ref, w_ref, b_ref):
    """One Conv1d / ConvTranspose1d layer as a single stacked matmul.

    h:     (C_in, L_in) channel-major activation (value).
    s_ref: (K, L_in, L_out) precomputed 0/1 selection (pad/shift/stride folded).
    w_ref: (C_out, K*C_in) host-side pre-concatenated taps.
    b_ref: (C_out, 1) bias.
    """
    K = s_ref.shape[0]
    # K independent selection matmuls (MXU, no serial dependence), then one
    # deep-contraction matmul over the sublane-stacked operand.
    xs = jnp.concatenate(
        [jnp.dot(h, s_ref[k], preferred_element_type=jnp.float32)
         for k in range(K)],
        axis=0)                                               # (K*C_in, L_out)
    return jnp.dot(w_ref[...], xs, preferred_element_type=jnp.float32) + b_ref[...]


def _maxpool4(r, p_ref):
    """MaxPool1d(kernel=4, stride=1, padding=2) on post-ReLU (C, L) values.

    Zero padding from the selection matmuls == PyTorch's -inf padding because
    r >= 0 (post-ReLU) and every window contains at least one real element.
    """
    y01 = jnp.maximum(jnp.dot(r, p_ref[0], preferred_element_type=jnp.float32),
                      jnp.dot(r, p_ref[1], preferred_element_type=jnp.float32))
    y23 = jnp.maximum(jnp.dot(r, p_ref[2], preferred_element_type=jnp.float32),
                      jnp.dot(r, p_ref[3], preferred_element_type=jnp.float32))
    return jnp.maximum(y01, y23)


# --------------------------- fused whole-model kernel ------------------------
def _eeg_fused_kernel(
    x_ref,
    enc_w, enc_b,
    s1, w1, b1, p1, s2, w2, b2, p2, s3, w3, b3, p3, s4, w4, b4, p4,
    t1, u1, c1, t2, u2, c2, t3, u3, c3, t4, u4, c4,
    dec_w, dec_b,
    reduced_ref, encoded_ref, decoded_ref,
):
    enc_stages = ((s1, w1, b1, p1), (s2, w2, b2, p2),
                  (s3, w3, b3, p3), (s4, w4, b4, p4))
    dec_stages = ((t1, u1, c1), (t2, u2, c2), (t3, u3, c3), (t4, u4, c4))

    nb = x_ref.shape[0]
    # Unrolled independent per-sample chains (review item: amortize per-step
    # overhead, give the LLO scheduler parallel MXU/VPU/EUP work).
    for i in range(nb):
        x = x_ref[i]                                                    # (32, T)

        # component_map_encode (channel mixing), kept channel-major / lane-dense.
        red = (jnp.dot(enc_w[...], x, preferred_element_type=jnp.float32)
               + enc_b[...])
        reduced_ref[i] = red

        # Encoder: Tanh once, then 4x fused (stacked-conv + ReLU + maxpool).
        h = jnp.tanh(red)
        for s, w, b, p in enc_stages:
            h = _maxpool4(jnp.maximum(_stacked_conv(h, s, w, b), 0.0), p)
        encoded_ref[i] = h                                              # (8, 6)

        # Decoder: 4x stacked transposed conv; final Tanh fused into stage 4.
        d = h
        for idx, (s, w, b) in enumerate(dec_stages):
            z = _stacked_conv(d, s, w, b)
            d = jnp.tanh(z) if idx == 3 else jnp.maximum(z, 0.0)

        # component_map_decode; already the module's final (B, 32, T) layout.
        decoded_ref[i] = (jnp.dot(dec_w[...], d, preferred_element_type=jnp.float32)
                          + dec_b[...])


# --------------------------- parameters & wrapper -----------------------------
def init_params(key):
    """Weights in PyTorch layouts: Linear (out,in); Conv1d (C_out,C_in,K);
    ConvTranspose1d (C_in,C_out,K)."""
    def uni(k, shape, fan_in):
        bound = 1.0 / float(fan_in) ** 0.5
        return jax.random.uniform(k, shape, jnp.float32, -bound, bound)

    keys = jax.random.split(key, 24)
    p = {}
    p["enc_w"] = uni(keys[0], (32, 32), 32)
    p["enc_b"] = uni(keys[1], (32,), 32)
    p["dec_w"] = uni(keys[2], (32, 32), 32)
    p["dec_b"] = uni(keys[3], (32,), 32)

    i = 4
    for (cin, cout, k_sz, _, _), name in zip(_CONV_DEFS, _CONV_NAMES):
        p[name + "_w"] = uni(keys[i], (cout, cin, k_sz), cin * k_sz); i += 1
        p[name + "_b"] = uni(keys[i], (cout,), cin * k_sz); i += 1
    for (cin, cout, k_sz, _, _), name in zip(_DECONV_DEFS, _DECONV_NAMES):
        p[name + "_w"] = uni(keys[i], (cin, cout, k_sz), cout * k_sz); i += 1
        p[name + "_b"] = uni(keys[i], (cout,), cout * k_sz); i += 1
    return p


def _const_spec(shape):
    zeros = (0,) * len(shape)
    return pl.BlockSpec(tuple(shape), lambda g, _z=zeros: _z)


def _pick_nb(batch, max_nb=8):
    # Several samples per step amortize the ~0.35us/step overhead, but keep the
    # grid >= 2 steps so both v7x TensorCores get work.
    for nb in (max_nb, 4, 2):
        if batch % nb == 0 and batch // nb >= 2:
            return nb
    return 1


def forward(params, x):
    """x: (B, 32, T) float32 (PyTorch NCT). Returns (reduced, encoded, decoded)."""
    B, C, T = x.shape
    NB = _pick_nb(B)
    grid = (B // NB,)

    col = lambda b: b.reshape(-1, 1)

    # Host-side precomputed constants (selection matrices + stacked taps).
    L = T
    enc_consts = []
    for (cin, cout, K, s, p), name in zip(_CONV_DEFS, _CONV_NAMES):
        Lc = _conv_len(L, K, s, p)
        S = _conv_selectors(L, K, s, p, Lc)                  # (K, L, Lc)
        P = _pool_selectors(Lc)                              # (4, Lc, Lc+1)
        w = params[name + "_w"]                              # (cout, cin, K)
        Wst = jnp.transpose(w, (0, 2, 1)).reshape(cout, K * cin)
        enc_consts.append((S, Wst, col(params[name + "_b"]), P))
        L = Lc + 1
    L_enc = L

    dec_consts = []
    for (cin, cout, K, s, p), name in zip(_DECONV_DEFS, _DECONV_NAMES):
        Lo = _deconv_len(L, K, s, p)
        S = _deconv_selectors(L, K, s, p, Lo)                # (K, L, Lo)
        w = params[name + "_w"]                              # (cin, cout, K)
        Wst = jnp.transpose(w, (1, 2, 0)).reshape(cout, K * cin)
        dec_consts.append((S, Wst, col(params[name + "_b"])))
        L = Lo
    L_dec = L

    inputs = [x, params["enc_w"], col(params["enc_b"])]
    for S, Wst, bcol, P in enc_consts:
        inputs += [S, Wst, bcol, P]
    for S, Wst, bcol in dec_consts:
        inputs += [S, Wst, bcol]
    inputs += [params["dec_w"], col(params["dec_b"])]

    in_specs = [pl.BlockSpec((NB, C, T), lambda g: (g, 0, 0))]
    in_specs += [_const_spec(np.shape(a)) for a in inputs[1:]]

    n_hidden = params["enc_w"].shape[0]   # 32
    c_enc = _CONV_DEFS[-1][1]             # 8
    n_obs = params["dec_w"].shape[0]      # 32

    out_shape = (
        jax.ShapeDtypeStruct((B, n_hidden, T), jnp.float32),   # reduced (channel-major)
        jax.ShapeDtypeStruct((B, c_enc, L_enc), jnp.float32),  # encoded
        jax.ShapeDtypeStruct((B, n_obs, L_dec), jnp.float32),  # decoded (final layout)
    )
    out_specs = (
        pl.BlockSpec((NB, n_hidden, T), lambda g: (g, 0, 0)),
        pl.BlockSpec((NB, c_enc, L_enc), lambda g: (g, 0, 0)),
        pl.BlockSpec((NB, n_obs, L_dec), lambda g: (g, 0, 0)),
    )

    reduced_cm, encoded, decoded = pl.pallas_call(
        _eeg_fused_kernel,
        grid=grid,
        out_shape=out_shape,
        in_specs=in_specs,
        out_specs=out_specs,
        # Footprint (constants + weights + activations) is a few MiB -> default
        # VMEM budget is ample on v5e/v6e/v7x; no vmem_limit override needed.
        compiler_params=pltpu.CompilerParams(
            dimension_semantics=("parallel",),
        ),
    )(*inputs)

    # Restore the module's (B, T, 32) API layout for `reduced` (single XLA
    # transpose; the kernel store itself stays lane-dense).
    reduced = jnp.transpose(reduced_cm, (0, 2, 1))
    return reduced, encoded, decoded


# --------------------------- pure-JAX reference (for checking) ---------------
def _reference_forward(params, x):
    hi = jax.lax.Precision.HIGHEST
    red = (jnp.einsum("oc,bct->bot", params["enc_w"], x, precision=hi)
           + params["enc_b"][None, :, None])
    h = jnp.tanh(red)
    for (cin, cout, K, s, p), name in zip(_CONV_DEFS, _CONV_NAMES):
        h = jax.lax.conv_general_dilated(
            h, params[name + "_w"], window_strides=(s,), padding=[(p, p)],
            dimension_numbers=("NCH", "OIH", "NCH"), precision=hi)
        h = jnp.maximum(h + params[name + "_b"][None, :, None], 0.0)
        h = jax.lax.reduce_window(h, -jnp.inf, jax.lax.max,
                                  (1, 1, 4), (1, 1, 1),
                                  ((0, 0), (0, 0), (2, 2)))
    encoded = h
    d = h
    for idx, ((cin, cout, K, s, p), name) in enumerate(zip(_DECONV_DEFS, _DECONV_NAMES)):
        w = params[name + "_w"]                               # (cin, cout, K)
        w_conv = jnp.flip(jnp.transpose(w, (1, 0, 2)), axis=2)
        d = jax.lax.conv_general_dilated(
            d, w_conv, window_strides=(1,), padding=[(K - 1 - p, K - 1 - p)],
            lhs_dilation=(s,), dimension_numbers=("NCH", "OIH", "NCH"),
            precision=hi)
        d = d + params[name + "_b"][None, :, None]
        d = jnp.tanh(d) if idx == 3 else jnp.maximum(d, 0.0)
    dec = (jnp.einsum("oc,bct->bot", params["dec_w"], d, precision=hi)
           + params["dec_b"][None, :, None])
    return jnp.transpose(red, (0, 2, 1)), encoded, dec


if __name__ == "__main__":
    key = jax.random.PRNGKey(0)
    pkey, xkey = jax.random.split(key)
    params = init_params(pkey)

    # B=2, 32 observed channels, T=128 samples (consistent with the module).
    x = jax.random.normal(xkey, (2, 32, 128), jnp.float32)

    reduced, encoded, decoded = jax.jit(forward)(params, x)
    jax.block_until_ready((reduced, encoded, decoded))

    # Shapes implied by the PyTorch module for T=128.
    assert reduced.shape == (2, 128, 32), reduced.shape
    assert encoded.shape == (2, 8, 6), encoded.shape
    assert decoded.shape == (2, 32, 128), decoded.shape
    assert bool(jnp.all(jnp.isfinite(decoded))), "non-finite output"

    # Numerical check against a plain-JAX reference of the PyTorch module.
    r_ref, e_ref, d_ref = jax.jit(_reference_forward)(params, x)
    jax.block_until_ready((r_ref, e_ref, d_ref))
    for got, ref, name in ((reduced, r_ref, "reduced"),
                           (encoded, e_ref, "encoded"),
                           (decoded, d_ref, "decoded")):
        err = float(jnp.max(jnp.abs(got - ref)))
        assert err < 2e-3, (name, err)

    print("KERNEL_OK")
</pallas_src>

<mosaic_0001>
module attributes {stable_mosaic.version = 11 : i64} {
  func.func @_eeg_fused_kernel(%arg0: i32, %arg1: memref<1x32x128xf32, #tpu.memory_space<vmem>>, %arg2: memref<32x32xf32, #tpu.memory_space<vmem>>, %arg3: memref<32x1xf32, #tpu.memory_space<vmem>>, %arg4: memref<8x128x63xf32, #tpu.memory_space<vmem>>, %arg5: memref<32x256xf32, #tpu.memory_space<vmem>>, %arg6: memref<32x1xf32, #tpu.memory_space<vmem>>, %arg7: memref<4x63x64xf32, #tpu.memory_space<vmem>>, %arg8: memref<8x64x21xf32, #tpu.memory_space<vmem>>, %arg9: memref<32x256xf32, #tpu.memory_space<vmem>>, %arg10: memref<32x1xf32, #tpu.memory_space<vmem>>, %arg11: memref<4x21x22xf32, #tpu.memory_space<vmem>>, %arg12: memref<6x22x10xf32, #tpu.memory_space<vmem>>, %arg13: memref<16x192xf32, #tpu.memory_space<vmem>>, %arg14: memref<16x1xf32, #tpu.memory_space<vmem>>, %arg15: memref<4x10x11xf32, #tpu.memory_space<vmem>>, %arg16: memref<4x11x5xf32, #tpu.memory_space<vmem>>, %arg17: memref<8x64xf32, #tpu.memory_space<vmem>>, %arg18: memref<8x1xf32, #tpu.memory_space<vmem>>, %arg19: memref<4x5x6xf32, #tpu.memory_space<vmem>>, %arg20: memref<4x6x12xf32, #tpu.memory_space<vmem>>, %arg21: memref<16x32xf32, #tpu.memory_space<vmem>>, %arg22: memref<16x1xf32, #tpu.memory_space<vmem>>, %arg23: memref<6x12x22xf32, #tpu.memory_space<vmem>>, %arg24: memref<32x96xf32, #tpu.memory_space<vmem>>, %arg25: memref<32x1xf32, #tpu.memory_space<vmem>>, %arg26: memref<8x22x65xf32, #tpu.memory_space<vmem>>, %arg27: memref<32x256xf32, #tpu.memory_space<vmem>>, %arg28: memref<32x1xf32, #tpu.memory_space<vmem>>, %arg29: memref<8x65x128xf32, #tpu.memory_space<vmem>>, %arg30: memref<32x256xf32, #tpu.memory_space<vmem>>, %arg31: memref<32x1xf32, #tpu.memory_space<vmem>>, %arg32: memref<32x32xf32, #tpu.memory_space<vmem>>, %arg33: memref<32x1xf32, #tpu.memory_space<vmem>>, %arg34: memref<1x32x128xf32, #tpu.memory_space<vmem>>, %arg35: memref<1x8x6xf32, #tpu.memory_space<vmem>>, %arg36: memref<1x32x128xf32, #tpu.memory_space<vmem>>) attributes {dimension_semantics = [#tpu.dimension_semantics<parallel>], iteration_bounds = array<i64: 2>, scalar_prefetch = 0 : i64, scratch_operands = 0 : i64, tpu.core_type = #tpu.core_type<tc>, window_params = [{transform_indices = @transform_0, window_bounds = array<i64: 1, 32, 128>}, {pipeline_mode = #tpu.pipeline_mode<synchronous>, transform_indices = @transform_1, window_bounds = array<i64: 32, 32>}, {pipeline_mode = #tpu.pipeline_mode<synchronous>, transform_indices = @transform_2, window_bounds = array<i64: 32, 1>}, {pipeline_mode = #tpu.pipeline_mode<synchronous>, transform_indices = @transform_3, window_bounds = array<i64: 8, 128, 63>}, {pipeline_mode = #tpu.pipeline_mode<synchronous>, transform_indices = @transform_4, window_bounds = array<i64: 32, 256>}, {pipeline_mode = #tpu.pipeline_mode<synchronous>, transform_indices = @transform_5, window_bounds = array<i64: 32, 1>}, {pipeline_mode = #tpu.pipeline_mode<synchronous>, transform_indices = @transform_6, window_bounds = array<i64: 4, 63, 64>}, {pipeline_mode = #tpu.pipeline_mode<synchronous>, transform_indices = @transform_7, window_bounds = array<i64: 8, 64, 21>}, {pipeline_mode = #tpu.pipeline_mode<synchronous>, transform_indices = @transform_8, window_bounds = array<i64: 32, 256>}, {pipeline_mode = #tpu.pipeline_mode<synchronous>, transform_indices = @transform_9, window_bounds = array<i64: 32, 1>}, {pipeline_mode = #tpu.pipeline_mode<synchronous>, transform_indices = @transform_10, window_bounds = array<i64: 4, 21, 22>}, {pipeline_mode = #tpu.pipeline_mode<synchronous>, transform_indices = @transform_11, window_bounds = array<i64: 6, 22, 10>}, {pipeline_mode = #tpu.pipeline_mode<synchronous>, transform_indices = @transform_12, window_bounds = array<i64: 16, 192>}, {pipeline_mode = #tpu.pipeline_mode<synchronous>, transform_indices = @transform_13, window_bounds = array<i64: 16, 1>}, {pipeline_mode = #tpu.pipeline_mode<synchronous>, transform_indices = @transform_14, window_bounds = array<i64: 4, 10, 11>}, {pipeline_mode = #tpu.pipeline_mode<synchronous>, transform_indices = @transform_15, window_bounds = array<i64: 4, 11, 5>}, {pipeline_mode = #tpu.pipeline_mode<synchronous>, transform_indices = @transform_16, window_bounds = array<i64: 8, 64>}, {pipeline_mode = #tpu.pipeline_mode<synchronous>, transform_indices = @transform_17, window_bounds = array<i64: 8, 1>}, {pipeline_mode = #tpu.pipeline_mode<synchronous>, transform_indices = @transform_18, window_bounds = array<i64: 4, 5, 6>}, {pipeline_mode = #tpu.pipeline_mode<synchronous>, transform_indices = @transform_19, window_bounds = array<i64: 4, 6, 12>}, {pipeline_mode = #tpu.pipeline_mode<synchronous>, transform_indices = @transform_20, window_bounds = array<i64: 16, 32>}, {pipeline_mode = #tpu.pipeline_mode<synchronous>, transform_indices = @transform_21, window_bounds = array<i64: 16, 1>}, {pipeline_mode = #tpu.pipeline_mode<synchronous>, transform_indices = @transform_22, window_bounds = array<i64: 6, 12, 22>}, {pipeline_mode = #tpu.pipeline_mode<synchronous>, transform_indices = @transform_23, window_bounds = array<i64: 32, 96>}, {pipeline_mode = #tpu.pipeline_mode<synchronous>, transform_indices = @transform_24, window_bounds = array<i64: 32, 1>}, {pipeline_mode = #tpu.pipeline_mode<synchronous>, transform_indices = @transform_25, window_bounds = array<i64: 8, 22, 65>}, {pipeline_mode = #tpu.pipeline_mode<synchronous>, transform_indices = @transform_26, window_bounds = array<i64: 32, 256>}, {pipeline_mode = #tpu.pipeline_mode<synchronous>, transform_indices = @transform_27, window_bounds = array<i64: 32, 1>}, {pipeline_mode = #tpu.pipeline_mode<synchronous>, transform_indices = @transform_28, window_bounds = array<i64: 8, 65, 128>}, {pipeline_mode = #tpu.pipeline_mode<synchronous>, transform_indices = @transform_29, window_bounds = array<i64: 32, 256>}, {pipeline_mode = #tpu.pipeline_mode<synchronous>, transform_indices = @transform_30, window_bounds = array<i64: 32, 1>}, {pipeline_mode = #tpu.pipeline_mode<synchronous>, transform_indices = @transform_31, window_bounds = array<i64: 32, 32>}, {pipeline_mode = #tpu.pipeline_mode<synchronous>, transform_indices = @transform_32, window_bounds = array<i64: 32, 1>}, {transform_indices = @transform_33, window_bounds = array<i64: 1, 32, 128>}, {transform_indices = @transform_34, window_bounds = array<i64: 1, 8, 6>}, {transform_indices = @transform_35, window_bounds = array<i64: 1, 32, 128>}]} {
    %c0 = arith.constant 0 : index
    %c0_0 = arith.constant 0 : index
    %c0_1 = arith.constant 0 : index
    %0 = vector.load %arg1[%c0, %c0_0, %c0_1] : memref<1x32x128xf32, #tpu.memory_space<vmem>>, vector<1x32x128xf32>
    %1 = vector.shape_cast %0 : vector<1x32x128xf32> to vector<32x128xf32>
    %c0_2 = arith.constant 0 : index
    %c0_3 = arith.constant 0 : index
    %2 = vector.load %arg2[%c0_2, %c0_3] : memref<32x32xf32, #tpu.memory_space<vmem>>, vector<32x32xf32>
    %cst = arith.constant dense<0.000000e+00> : vector<32x128xf32>
    %3 = tpu.matmul %2, %1, %cst {dimension_numbers = #tpu.dot_dimension_numbers<[1], [0], [0], [1], [0, 0, 1, 1], [], []>} : vector<32x32xf32>, vector<32x128xf32>, vector<32x128xf32> -> vector<32x128xf32>
    %c0_4 = arith.constant 0 : index
    %c0_5 = arith.constant 0 : index
    %4 = vector.load %arg3[%c0_4, %c0_5] : memref<32x1xf32, #tpu.memory_space<vmem>>, vector<32x1xf32>
    %5 = vector.broadcast %4 : vector<32x1xf32> to vector<32x128xf32>
    %6 = arith.addf %3, %5 : vector<32x128xf32>
    %c0_6 = arith.constant 0 : index
    %c0_7 = arith.constant 0 : index
    %c0_8 = arith.constant 0 : index
    %7 = vector.load %arg34[%c0_6, %c0_7, %c0_8] : memref<1x32x128xf32, #tpu.memory_space<vmem>>, vector<1x32x128xf32>
    %8 = vector.shape_cast %7 : vector<1x32x128xf32> to vector<32x128xf32>
    %9 = vector.shape_cast %6 : vector<32x128xf32> to vector<1x32x128xf32>
    tpu.vector_store %arg34[%c0_6, %c0_7, %c0_8], %9 {strides = array<i32>} : memref<1x32x128xf32, #tpu.memory_space<vmem>>, vector<1x32x128xf32>,
    %10 = math.tanh %6 : vector<32x128xf32>
    %c0_9 = arith.constant 0 : index
    %c0_10 = arith.constant 0 : index
    %c0_11 = arith.constant 0 : index
    %11 = vector.load %arg4[%c0_9, %c0_10, %c0_11] : memref<8x128x63xf32, #tpu.memory_space<vmem>>, vector<1x128x63xf32>
    %12 = vector.shape_cast %11 : vector<1x128x63xf32> to vector<128x63xf32>
    %cst_12 = arith.constant dense<0.000000e+00> : vector<32x63xf32>
    %13 = tpu.matmul %10, %12, %cst_12 {dimension_numbers = #tpu.dot_dimension_numbers<[1], [0], [0], [1], [0, 0, 1, 1], [], []>} : vector<32x128xf32>, vector<128x63xf32>, vector<32x63xf32> -> vector<32x63xf32>
    %c1 = arith.constant 1 : index
    %c0_13 = arith.constant 0 : index
    %c0_14 = arith.constant 0 : index
    %14 = vector.load %arg4[%c1, %c0_13, %c0_14] : memref<8x128x63xf32, #tpu.memory_space<vmem>>, vector<1x128x63xf32>
    %15 = vector.shape_cast %14 : vector<1x128x63xf32> to vector<128x63xf32>
    %cst_15 = arith.constant dense<0.000000e+00> : vector<32x63xf32>
    %16 = tpu.matmul %10, %15, %cst_15 {dimension_numbers = #tpu.dot_dimension_numbers<[1], [0], [0], [1], [0, 0, 1, 1], [], []>} : vector<32x128xf32>, vector<128x63xf32>, vector<32x63xf32> -> vector<32x63xf32>
    %c2 = arith.constant 2 : index
    %c0_16 = arith.constant 0 : index
    %c0_17 = arith.constant 0 : index
    %17 = vector.load %arg4[%c2, %c0_16, %c0_17] : memref<8x128x63xf32, #tpu.memory_space<vmem>>, vector<1x128x63xf32>
    %18 = vector.shape_cast %17 : vector<1x128x63xf32> to vector<128x63xf32>
    %cst_18 = arith.constant dense<0.000000e+00> : vector<32x63xf32>
    %19 = tpu.matmul %10, %18, %cst_18 {dimension_numbers = #tpu.dot_dimension_numbers<[1], [0], [0], [1], [0, 0, 1, 1], [], []>} : vector<32x128xf32>, vector<128x63xf32>, vector<32x63xf32> -> vector<32x63xf32>
    %c3 = arith.constant 3 : index
    %c0_19 = arith.constant 0 : index
    %c0_20 = arith.constant 0 : index
    %20 = vector.load %arg4[%c3, %c0_19, %c0_20] : memref<8x128x63xf32, #tpu.memory_space<vmem>>, vector<1x128x63xf32>
    %21 = vector.shape_cast %20 : vector<1x128x63xf32> to vector<128x63xf32>
    %cst_21 = arith.constant dense<0.000000e+00> : vector<32x63xf32>
    %22 = tpu.matmul %10, %21, %cst_21 {dimension_numbers = #tpu.dot_dimension_numbers<[1], [0], [0], [1], [0, 0, 1, 1], [], []>} : vector<32x128xf32>, vector<128x63xf32>, vector<32x63xf32> -> vector<32x63xf32>
    %c4 = arith.constant 4 : index
    %c0_22 = arith.constant 0 : index
    %c0_23 = arith.constant 0 : index
    %23 = vector.load %arg4[%c4, %c0_22, %c0_23] : memref<8x128x63xf32, #tpu.memory_space<vmem>>, vector<1x128x63xf32>
    %24 = vector.shape_cast %23 : vector<1x128x63xf32> to vector<128x63xf32>
    %cst_24 = arith.constant dense<0.000000e+00> : vector<32x63xf32>
    %25 = tpu.matmul %10, %24, %cst_24 {dimension_numbers = #tpu.dot_dimension_numbers<[1], [0], [0], [1], [0, 0, 1, 1], [], []>} : vector<32x128xf32>, vector<128x63xf32>, vector<32x63xf32> -> vector<32x63xf32>
    %c5 = arith.constant 5 : index
    %c0_25 = arith.constant 0 : index
    %c0_26 = arith.constant 0 : index
    %26 = vector.load %arg4[%c5, %c0_25, %c0_26] : memref<8x128x63xf32, #tpu.memory_space<vmem>>, vector<1x128x63xf32>
    %27 = vector.shape_cast %26 : vector<1x128x63xf32> to vector<128x63xf32>
    %cst_27 = arith.constant dense<0.000000e+00> : vector<32x63xf32>
    %28 = tpu.matmul %10, %27, %cst_27 {dimension_numbers = #tpu.dot_dimension_numbers<[1], [0], [0], [1], [0, 0, 1, 1], [], []>} : vector<32x128xf32>, vector<128x63xf32>, vector<32x63xf32> -> vector<32x63xf32>
    %c6 = arith.constant 6 : index
    %c0_28 = arith.constant 0 : index
    %c0_29 = arith.constant 0 : index
    %29 = vector.load %arg4[%c6, %c0_28, %c0_29] : memref<8x128x63xf32, #tpu.memory_space<vmem>>, vector<1x128x63xf32>
    %30 = vector.shape_cast %29 : vector<1x128x63xf32> to vector<128x63xf32>
    %cst_30 = arith.constant dense<0.000000e+00> : vector<32x63xf32>
    %31 = tpu.matmul %10, %30, %cst_30 {dimension_numbers = #tpu.dot_dimension_numbers<[1], [0], [0], [1], [0, 0, 1, 1], [], []>} : vector<32x128xf32>, vector<128x63xf32>, vector<32x63xf32> -> vector<32x63xf32>
    %c7 = arith.constant 7 : index
    %c0_31 = arith.constant 0 : index
    %c0_32 = arith.constant 0 : index
    %32 = vector.load %arg4[%c7, %c0_31, %c0_32] : memref<8x128x63xf32, #tpu.memory_space<vmem>>, vector<1x128x63xf32>
    %33 = vector.shape_cast %32 : vector<1x128x63xf32> to vector<128x63xf32>
    %cst_33 = arith.constant dense<0.000000e+00> : vector<32x63xf32>
    %34 = tpu.matmul %10, %33, %cst_33 {dimension_numbers = #tpu.dot_dimension_numbers<[1], [0], [0], [1], [0, 0, 1, 1], [], []>} : vector<32x128xf32>, vector<128x63xf32>, vector<32x63xf32> -> vector<32x63xf32>
    %35 = tpu.concatenate %13, %16, %19, %22, %25, %28, %31, %34 in 0 : vector<32x63xf32>, vector<32x63xf32>, vector<32x63xf32>, vector<32x63xf32>, vector<32x63xf32>, vector<32x63xf32>, vector<32x63xf32>, vector<32x63xf32> -> vector<256x63xf32>
    %c0_34 = arith.constant 0 : index
    %c0_35 = arith.constant 0 : index
    %36 = vector.load %arg5[%c0_34, %c0_35] : memref<32x256xf32, #tpu.memory_space<vmem>>, vector<32x256xf32>
    %cst_36 = arith.constant dense<0.000000e+00> : vector<32x63xf32>
    %37 = tpu.matmul %36, %35, %cst_36 {dimension_numbers = #tpu.dot_dimension_numbers<[1], [0], [0], [1], [0, 0, 1, 1], [], []>} : vector<32x256xf32>, vector<256x63xf32>, vector<32x63xf32> -> vector<32x63xf32>
    %c0_37 = arith.constant 0 : index
    %c0_38 = arith.constant 0 : index
    %38 = vector.load %arg6[%c0_37, %c0_38] : memref<32x1xf32, #tpu.memory_space<vmem>>, vector<32x1xf32>
    %39 = vector.broadcast %38 : vector<32x1xf32> to vector<32x63xf32>
    %40 = arith.addf %37, %39 : vector<32x63xf32>
    %cst_39 = arith.constant 0.000000e+00 : f32
    %41 = vector.broadcast %cst_39 : f32 to vector<32x63xf32>
    %42 = arith.maximumf %40, %41 : vector<32x63xf32>
    %c0_40 = arith.constant 0 : index
    %c0_41 = arith.constant 0 : index
    %c0_42 = arith.constant 0 : index
    %43 = vector.load %arg7[%c0_40, %c0_41, %c0_42] : memref<4x63x64xf32, #tpu.memory_space<vmem>>, vector<1x63x64xf32>
    %44 = vector.shape_cast %43 : vector<1x63x64xf32> to vector<63x64xf32>
    %cst_43 = arith.constant dense<0.000000e+00> : vector<32x64xf32>
    %45 = tpu.matmul %42, %44, %cst_43 {dimension_numbers = #tpu.dot_dimension_numbers<[1], [0], [0], [1], [0, 0, 1, 1], [], []>} : vector<32x63xf32>, vector<63x64xf32>, vector<32x64xf32> -> vector<32x64xf32>
    %c1_44 = arith.constant 1 : index
    %c0_45 = arith.constant 0 : index
    %c0_46 = arith.constant 0 : index
    %46 = vector.load %arg7[%c1_44, %c0_45, %c0_46] : memref<4x63x64xf32, #tpu.memory_space<vmem>>, vector<1x63x64xf32>
    %47 = vector.shape_cast %46 : vector<1x63x64xf32> to vector<63x64xf32>
    %cst_47 = arith.constant dense<0.000000e+00> : vector<32x64xf32>
    %48 = tpu.matmul %42, %47, %cst_47 {dimension_numbers = #tpu.dot_dimension_numbers<[1], [0], [0], [1], [0, 0, 1, 1], [], []>} : vector<32x63xf32>, vector<63x64xf32>, vector<32x64xf32> -> vector<32x64xf32>
    %49 = arith.maximumf %45, %48 : vector<32x64xf32>
    %c2_48 = arith.constant 2 : index
    %c0_49 = arith.constant 0 : index
    %c0_50 = arith.constant 0 : index
    %50 = vector.load %arg7[%c2_48, %c0_49, %c0_50] : memref<4x63x64xf32, #tpu.memory_space<vmem>>, vector<1x63x64xf32>
    %51 = vector.shape_cast %50 : vector<1x63x64xf32> to vector<63x64xf32>
    %cst_51 = arith.constant dense<0.000000e+00> : vector<32x64xf32>
    %52 = tpu.matmul %42, %51, %cst_51 {dimension_numbers = #tpu.dot_dimension_numbers<[1], [0], [0], [1], [0, 0, 1, 1], [], []>} : vector<32x63xf32>, vector<63x64xf32>, vector<32x64xf32> -> vector<32x64xf32>
    %c3_52 = arith.constant 3 : index
    %c0_53 = arith.constant 0 : index
    %c0_54 = arith.constant 0 : index
    %53 = vector.load %arg7[%c3_52, %c0_53, %c0_54] : memref<4x63x64xf32, #tpu.memory_space<vmem>>, vector<1x63x64xf32>
    %54 = vector.shape_cast %53 : vector<1x63x64xf32> to vector<63x64xf32>
    %cst_55 = arith.constant dense<0.000000e+00> : vector<32x64xf32>
    %55 = tpu.matmul %42, %54, %cst_55 {dimension_numbers = #tpu.dot_dimension_numbers<[1], [0], [0], [1], [0, 0, 1, 1], [], []>} : vector<32x63xf32>, vector<63x64xf32>, vector<32x64xf32> -> vector<32x64xf32>
    %56 = arith.maximumf %52, %55 : vector<32x64xf32>
    %57 = arith.maximumf %49, %56 : vector<32x64xf32>
    %c0_56 = arith.constant 0 : index
    %c0_57 = arith.constant 0 : index
    %c0_58 = arith.constant 0 : index
    %58 = vector.load %arg8[%c0_56, %c0_57, %c0_58] : memref<8x64x21xf32, #tpu.memory_space<vmem>>, vector<1x64x21xf32>
    %59 = vector.shape_cast %58 : vector<1x64x21xf32> to vector<64x21xf32>
    %cst_59 = arith.constant dense<0.000000e+00> : vector<32x21xf32>
    %60 = tpu.matmul %57, %59, %cst_59 {dimension_numbers = #tpu.dot_dimension_numbers<[1], [0], [0], [1], [0, 0, 1, 1], [], []>} : vector<32x64xf32>, vector<64x21xf32>, vector<32x21xf32> -> vector<32x21xf32>
    %c1_60 = arith.constant 1 : index
    %c0_61 = arith.constant 0 : index
    %c0_62 = arith.constant 0 : index
    %61 = vector.load %arg8[%c1_60, %c0_61, %c0_62] : memref<8x64x21xf32, #tpu.memory_space<vmem>>, vector<1x64x21xf32>
    %62 = vector.shape_cast %61 : vector<1x64x21xf32> to vector<64x21xf32>
    %cst_63 = arith.constant dense<0.000000e+00> : vector<32x21xf32>
    %63 = tpu.matmul %57, %62, %cst_63 {dimension_numbers = #tpu.dot_dimension_numbers<[1], [0], [0], [1], [0, 0, 1, 1], [], []>} : vector<32x64xf32>, vector<64x21xf32>, vector<32x21xf32> -> vector<32x21xf32>
    %c2_64 = arith.constant 2 : index
    %c0_65 = arith.constant 0 : index
    %c0_66 = arith.constant 0 : index
    %64 = vector.load %arg8[%c2_64, %c0_65, %c0_66] : memref<8x64x21xf32, #tpu.memory_space<vmem>>, vector<1x64x21xf32>
    %65 = vector.shape_cast %64 : vector<1x64x21xf32> to vector<64x21xf32>
    %cst_67 = arith.constant dense<0.000000e+00> : vector<32x21xf32>
    %66 = tpu.matmul %57, %65, %cst_67 {dimension_numbers = #tpu.dot_dimension_numbers<[1], [0], [0], [1], [0, 0, 1, 1], [], []>} : vector<32x64xf32>, vector<64x21xf32>, vector<32x21xf32> -> vector<32x21xf32>
    %c3_68 = arith.constant 3 : index
    %c0_69 = arith.constant 0 : index
    %c0_70 = arith.constant 0 : index
    %67 = vector.load %arg8[%c3_68, %c0_69, %c0_70] : memref<8x64x21xf32, #tpu.memory_space<vmem>>, vector<1x64x21xf32>
    %68 = vector.shape_cast %67 : vector<1x64x21xf32> to vector<64x21xf32>
    %cst_71 = arith.constant dense<0.000000e+00> : vector<32x21xf32>
    %69 = tpu.matmul %57, %68, %cst_71 {dimension_numbers = #tpu.dot_dimension_numbers<[1], [0], [0], [1], [0, 0, 1, 1], [], []>} : vector<32x64xf32>, vector<64x21xf32>, vector<32x21xf32> -> vector<32x21xf32>
    %c4_72 = arith.constant 4 : index
    %c0_73 = arith.constant 0 : index
    %c0_74 = arith.constant 0 : index
    %70 = vector.load %arg8[%c4_72, %c0_73, %c0_74] : memref<8x64x21xf32, #tpu.memory_space<vmem>>, vector<1x64x21xf32>
    %71 = vector.shape_cast %70 : vector<1x64x21xf32> to vector<64x21xf32>
    %cst_75 = arith.constant dense<0.000000e+00> : vector<32x21xf32>
    %72 = tpu.matmul %57, %71, %cst_75 {dimension_numbers = #tpu.dot_dimension_numbers<[1], [0], [0], [1], [0, 0, 1, 1], [], []>} : vector<32x64xf32>, vector<64x21xf32>, vector<32x21xf32> -> vector<32x21xf32>
    %c5_76 = arith.constant 5 : index
    %c0_77 = arith.constant 0 : index
    %c0_78 = arith.constant 0 : index
    %73 = vector.load %arg8[%c5_76, %c0_77, %c0_78] : memref<8x64x21xf32, #tpu.memory_space<vmem>>, vector<1x64x21xf32>
    %74 = vector.shape_cast %73 : vector<1x64x21xf32> to vector<64x21xf32>
    %cst_79 = arith.constant dense<0.000000e+00> : vector<32x21xf32>
    %75 = tpu.matmul %57, %74, %cst_79 {dimension_numbers = #tpu.dot_dimension_numbers<[1], [0], [0], [1], [0, 0, 1, 1], [], []>} : vector<32x64xf32>, vector<64x21xf32>, vector<32x21xf32> -> vector<32x21xf32>
    %c6_80 = arith.constant 6 : index
    %c0_81 = arith.constant 0 : index
    %c0_82 = arith.constant 0 : index
    %76 = vector.load %arg8[%c6_80, %c0_81, %c0_82] : memref<8x64x21xf32, #tpu.memory_space<vmem>>, vector<1x64x21xf32>
    %77 = vector.shape_cast %76 : vector<1x64x21xf32> to vector<64x21xf32>
    %cst_83 = arith.constant dense<0.000000e+00> : vector<32x21xf32>
    %78 = tpu.matmul %57, %77, %cst_83 {dimension_numbers = #tpu.dot_dimension_numbers<[1], [0], [0], [1], [0, 0, 1, 1], [], []>} : vector<32x64xf32>, vector<64x21xf32>, vector<32x21xf32> -> vector<32x21xf32>
    %c7_84 = arith.constant 7 : index
    %c0_85 = arith.constant 0 : index
    %c0_86 = arith.constant 0 : index
    %79 = vector.load %arg8[%c7_84, %c0_85, %c0_86] : memref<8x64x21xf32, #tpu.memory_space<vmem>>, vector<1x64x21xf32>
    %80 = vector.shape_cast %79 : vector<1x64x21xf32> to vector<64x21xf32>
    %cst_87 = arith.constant dense<0.000000e+00> : vector<32x21xf32>
    %81 = tpu.matmul %57, %80, %cst_87 {dimension_numbers = #tpu.dot_dimension_numbers<[1], [0], [0], [1], [0, 0, 1, 1], [], []>} : vector<32x64xf32>, vector<64x21xf32>, vector<32x21xf32> -> vector<32x21xf32>
    %82 = tpu.concatenate %60, %63, %66, %69, %72, %75, %78, %81 in 0 : vector<32x21xf32>, vector<32x21xf32>, vector<32x21xf32>, vector<32x21xf32>, vector<32x21xf32>, vector<32x21xf32>, vector<32x21xf32>, vector<32x21xf32> -> vector<256x21xf32>
    %c0_88 = arith.constant 0 : index
    %c0_89 = arith.constant 0 : index
    %83 = vector.load %arg9[%c0_88, %c0_89] : memref<32x256xf32, #tpu.memory_space<vmem>>, vector<32x256xf32>
    %cst_90 = arith.constant dense<0.000000e+00> : vector<32x21xf32>
    %84 = tpu.matmul %83, %82, %cst_90 {dimension_numbers = #tpu.dot_dimension_numbers<[1], [0], [0], [1], [0, 0, 1, 1], [], []>} : vector<32x256xf32>, vector<256x21xf32>, vector<32x21xf32> -> vector<32x21xf32>
    %c0_91 = arith.constant 0 : index
    %c0_92 = arith.constant 0 : index
    %85 = vector.load %arg10[%c0_91, %c0_92] : memref<32x1xf32, #tpu.memory_space<vmem>>, vector<32x1xf32>
    %86 = vector.broadcast %85 : vector<32x1xf32> to vector<32x21xf32>
    %87 = arith.addf %84, %86 : vector<32x21xf32>
    %cst_93 = arith.constant 0.000000e+00 : f32
    %88 = vector.broadcast %cst_93 : f32 to vector<32x21xf32>
    %89 = arith.maximumf %87, %88 : vector<32x21xf32>
    %c0_94 = arith.constant 0 : index
    %c0_95 = arith.constant 0 : index
    %c0_96 = arith.constant 0 : index
    %90 = vector.load %arg11[%c0_94, %c0_95, %c0_96] : memref<4x21x22xf32, #tpu.memory_space<vmem>>, vector<1x21x22xf32>
    %91 = vector.shape_cast %90 : vector<1x21x22xf32> to vector<21x22xf32>
    %cst_97 = arith.constant dense<0.000000e+00> : vector<32x22xf32>
    %92 = tpu.matmul %89, %91, %cst_97 {dimension_numbers = #tpu.dot_dimension_numbers<[1], [0], [0], [1], [0, 0, 1, 1], [], []>} : vector<32x21xf32>, vector<21x22xf32>, vector<32x22xf32> -> vector<32x22xf32>
    %c1_98 = arith.constant 1 : index
    %c0_99 = arith.constant 0 : index
    %c0_100 = arith.constant 0 : index
    %93 = vector.load %arg11[%c1_98, %c0_99, %c0_100] : memref<4x21x22xf32, #tpu.memory_space<vmem>>, vector<1x21x22xf32>
    %94 = vector.shape_cast %93 : vector<1x21x22xf32> to vector<21x22xf32>
    %cst_101 = arith.constant dense<0.000000e+00> : vector<32x22xf32>
    %95 = tpu.matmul %89, %94, %cst_101 {dimension_numbers = #tpu.dot_dimension_numbers<[1], [0], [0], [1], [0, 0, 1, 1], [], []>} : vector<32x21xf32>, vector<21x22xf32>, vector<32x22xf32> -> vector<32x22xf32>
    %96 = arith.maximumf %92, %95 : vector<32x22xf32>
    %c2_102 = arith.constant 2 : index
    %c0_103 = arith.constant 0 : index
    %c0_104 = arith.constant 0 : index
    %97 = vector.load %arg11[%c2_102, %c0_103, %c0_104] : memref<4x21x22xf32, #tpu.memory_space<vmem>>, vector<1x21x22xf32>
    %98 = vector.shape_cast %97 : vector<1x21x22xf32> to vector<21x22xf32>
    %cst_105 = arith.constant dense<0.000000e+00> : vector<32x22xf32>
    %99 = tpu.matmul %89, %98, %cst_105 {dimension_numbers = #tpu.dot_dimension_numbers<[1], [0], [0], [1], [0, 0, 1, 1], [], []>} : vector<32x21xf32>, vector<21x22xf32>, vector<32x22xf32> -> vector<32x22xf32>
    %c3_106 = arith.constant 3 : index
    %c0_107 = arith.constant 0 : index
    %c0_108 = arith.constant 0 : index
    %100 = vector.load %arg11[%c3_106, %c0_107, %c0_108] : memref<4x21x22xf32, #tpu.memory_space<vmem>>, vector<1x21x22xf32>
    %101 = vector.shape_cast %100 : vector<1x21x22xf32> to vector<21x22xf32>
    %cst_109 = arith.constant dense<0.000000e+00> : vector<32x22xf32>
    %102 = tpu.matmul %89, %101, %cst_109 {dimension_numbers = #tpu.dot_dimension_numbers<[1], [0], [0], [1], [0, 0, 1, 1], [], []>} : vector<32x21xf32>, vector<21x22xf32>, vector<32x22xf32> -> vector<32x22xf32>
    %103 = arith.maximumf %99, %102 : vector<32x22xf32>
    %104 = arith.maximumf %96, %103 : vector<32x22xf32>
    %c0_110 = arith.constant 0 : index
    %c0_111 = arith.constant 0 : index
    %c0_112 = arith.constant 0 : index
    %105 = vector.load %arg12[%c0_110, %c0_111, %c0_112] : memref<6x22x10xf32, #tpu.memory_space<vmem>>, vector<1x22x10xf32>
    %106 = vector.shape_cast %105 : vector<1x22x10xf32> to vector<22x10xf32>
    %cst_113 = arith.constant dense<0.000000e+00> : vector<32x10xf32>
    %107 = tpu.matmul %104, %106, %cst_113 {dimension_numbers = #tpu.dot_dimension_numbers<[1], [0], [0], [1], [0, 0, 1, 1], [], []>} : vector<32x22xf32>, vector<22x10xf32>, vector<32x10xf32> -> vector<32x10xf32>
    %c1_114 = arith.constant 1 : index
    %c0_115 = arith.constant 0 : index
    %c0_116 = arith.constant 0 : index
    %108 = vector.load %arg12[%c1_114, %c0_115, %c0_116] : memref<6x22x10xf32, #tpu.memory_space<vmem>>, vector<1x22x10xf32>
    %109 = vector.shape_cast %108 : vector<1x22x10xf32> to vector<22x10xf32>
    %cst_117 = arith.constant dense<0.000000e+00> : vector<32x10xf32>
    %110 = tpu.matmul %104, %109, %cst_117 {dimension_numbers = #tpu.dot_dimension_numbers<[1], [0], [0], [1], [0, 0, 1, 1], [], []>} : vector<32x22xf32>, vector<22x10xf32>, vector<32x10xf32> -> vector<32x10xf32>
    %c2_118 = arith.constant 2 : index
    %c0_119 = arith.constant 0 : index
    %c0_120 = arith.constant 0 : index
    %111 = vector.load %arg12[%c2_118, %c0_119, %c0_120] : memref<6x22x10xf32, #tpu.memory_space<vmem>>, vector<1x22x10xf32>
    %112 = vector.shape_cast %111 : vector<1x22x10xf32> to vector<22x10xf32>
    %cst_121 = arith.constant dense<0.000000e+00> : vector<32x10xf32>
    %113 = tpu.matmul %104, %112, %cst_121 {dimension_numbers = #tpu.dot_dimension_numbers<[1], [0], [0], [1], [0, 0, 1, 1], [], []>} : vector<32x22xf32>, vector<22x10xf32>, vector<32x10xf32> -> vector<32x10xf32>
    %c3_122 = arith.constant 3 : index
    %c0_123 = arith.constant 0 : index
    %c0_124 = arith.constant 0 : index
    %114 = vector.load %arg12[%c3_122, %c0_123, %c0_124] : memref<6x22x10xf32, #tpu.memory_space<vmem>>, vector<1x22x10xf32>
    %115 = vector.shape_cast %114 : vector<1x22x10xf32> to vector<22x10xf32>
    %cst_125 = arith.constant dense<0.000000e+00> : vector<32x10xf32>
    %116 = tpu.matmul %104, %115, %cst_125 {dimension_numbers = #tpu.dot_dimension_numbers<[1], [0], [0], [1], [0, 0, 1, 1], [], []>} : vector<32x22xf32>, vector<22x10xf32>, vector<32x10xf32> -> vector<32x10xf32>
    %c4_126 = arith.constant 4 : index
    %c0_127 = arith.constant 0 : index
    %c0_128 = arith.constant 0 : index
    %117 = vector.load %arg12[%c4_126, %c0_127, %c0_128] : memref<6x22x10xf32, #tpu.memory_space<vmem>>, vector<1x22x10xf32>
    %118 = vector.shape_cast %117 : vector<1x22x10xf32> to vector<22x10xf32>
    %cst_129 = arith.constant dense<0.000000e+00> : vector<32x10xf32>
    %119 = tpu.matmul %104, %118, %cst_129 {dimension_numbers = #tpu.dot_dimension_numbers<[1], [0], [0], [1], [0, 0, 1, 1], [], []>} : vector<32x22xf32>, vector<22x10xf32>, vector<32x10xf32> -> vector<32x10xf32>
    %c5_130 = arith.constant 5 : index
    %c0_131 = arith.constant 0 : index
    %c0_132 = arith.constant 0 : index
    %120 = vector.load %arg12[%c5_130, %c0_131, %c0_132] : memref<6x22x10xf32, #tpu.memory_space<vmem>>, vector<1x22x10xf32>
    %121 = vector.shape_cast %120 : vector<1x22x10xf32> to vector<22x10xf32>
    %cst_133 = arith.constant dense<0.000000e+00> : vector<32x10xf32>
    %122 = tpu.matmul %104, %121, %cst_133 {dimension_numbers = #tpu.dot_dimension_numbers<[1], [0], [0], [1], [0, 0, 1, 1], [], []>} : vector<32x22xf32>, vector<22x10xf32>, vector<32x10xf32> -> vector<32x10xf32>
    %123 = tpu.concatenate %107, %110, %113, %116, %119, %122 in 0 : vector<32x10xf32>, vector<32x10xf32>, vector<32x10xf32>, vector<32x10xf32>, vector<32x10xf32>, vector<32x10xf32> -> vector<192x10xf32>
    %c0_134 = arith.constant 0 : index
    %c0_135 = arith.constant 0 : index
    %124 = vector.load %arg13[%c0_134, %c0_135] : memref<16x192xf32, #tpu.memory_space<vmem>>, vector<16x192xf32>
    %cst_136 = arith.constant dense<0.000000e+00> : vector<16x10xf32>
    %125 = tpu.matmul %124, %123, %cst_136 {dimension_numbers = #tpu.dot_dimension_numbers<[1], [0], [0], [1], [0, 0, 1, 1], [], []>} : vector<16x192xf32>, vector<192x10xf32>, vector<16x10xf32> -> vector<16x10xf32>
    %c0_137 = arith.constant 0 : index
    %c0_138 = arith.constant 0 : index
    %126 = vector.load %arg14[%c0_137, %c0_138] : memref<16x1xf32, #tpu.memory_space<vmem>>, vector<16x1xf32>
    %127 = vector.broadcast %126 : vector<16x1xf32> to vector<16x10xf32>
    %128 = arith.addf %125, %127 : vector<16x10xf32>
    %cst_139 = arith.constant 0.000000e+00 : f32
    %129 = vector.broadcast %cst_139 : f32 to vector<16x10xf32>
    %130 = arith.maximumf %128, %129 : vector<16x10xf32>
    %c0_140 = arith.constant 0 : index
    %c0_141 = arith.constant 0 : index
    %c0_142 = arith.constant 0 : index
    %131 = vector.load %arg15[%c0_140, %c0_141, %c0_142] : memref<4x10x11xf32, #tpu.memory_space<vmem>>, vector<1x10x11xf32>
    %132 = vector.shape_cast %131 : vector<1x10x11xf32> to vector<10x11xf32>
    %cst_143 = arith.constant dense<0.000000e+00> : vector<16x11xf32>
    %133 = tpu.matmul %130, %132, %cst_143 {dimension_numbers = #tpu.dot_dimension_numbers<[1], [0], [0], [1], [0, 0, 1, 1], [], []>} : vector<16x10xf32>, vector<10x11xf32>, vector<16x11xf32> -> vector<16x11xf32>
    %c1_144 = arith.constant 1 : index
    %c0_145 = arith.constant 0 : index
    %c0_146 = arith.constant 0 : index
    %134 = vector.load %arg15[%c1_144, %c0_145, %c0_146] : memref<4x10x11xf32, #tpu.memory_space<vmem>>, vector<1x10x11xf32>
    %135 = vector.shape_cast %134 : vector<1x10x11xf32> to vector<10x11xf32>
    %cst_147 = arith.constant dense<0.000000e+00> : vector<16x11xf32>
    %136 = tpu.matmul %130, %135, %cst_147 {dimension_numbers = #tpu.dot_dimension_numbers<[1], [0], [0], [1], [0, 0, 1, 1], [], []>} : vector<16x10xf32>, vector<10x11xf32>, vector<16x11xf32> -> vector<16x11xf32>
    %137 = arith.maximumf %133, %136 : vector<16x11xf32>
    %c2_148 = arith.constant 2 : index
    %c0_149 = arith.constant 0 : index
    %c0_150 = arith.constant 0 : index
    %138 = vector.load %arg15[%c2_148, %c0_149, %c0_150] : memref<4x10x11xf32, #tpu.memory_space<vmem>>, vector<1x10x11xf32>
    %139 = vector.shape_cast %138 : vector<1x10x11xf32> to vector<10x11xf32>
    %cst_151 = arith.constant dense<0.000000e+00> : vector<16x11xf32>
    %140 = tpu.matmul %130, %139, %cst_151 {dimension_numbers = #tpu.dot_dimension_numbers<[1], [0], [0], [1], [0, 0, 1, 1], [], []>} : vector<16x10xf32>, vector<10x11xf32>, vector<16x11xf32> -> vector<16x11xf32>
    %c3_152 = arith.constant 3 : index
    %c0_153 = arith.constant 0 : index
    %c0_154 = arith.constant 0 : index
    %141 = vector.load %arg15[%c3_152, %c0_153, %c0_154] : memref<4x10x11xf32, #tpu.memory_space<vmem>>, vector<1x10x11xf32>
    %142 = vector.shape_cast %141 : vector<1x10x11xf32> to vector<10x11xf32>
    %cst_155 = arith.constant dense<0.000000e+00> : vector<16x11xf32>
    %143 = tpu.matmul %130, %142, %cst_155 {dimension_numbers = #tpu.dot_dimension_numbers<[1], [0], [0], [1], [0, 0, 1, 1], [], []>} : vector<16x10xf32>, vector<10x11xf32>, vector<16x11xf32> -> vector<16x11xf32>
    %144 = arith.maximumf %140, %143 : vector<16x11xf32>
    %145 = arith.maximumf %137, %144 : vector<16x11xf32>
    %c0_156 = arith.constant 0 : index
    %c0_157 = arith.constant 0 : index
    %c0_158 = arith.constant 0 : index
    %146 = vector.load %arg16[%c0_156, %c0_157, %c0_158] : memref<4x11x5xf32, #tpu.memory_space<vmem>>, vector<1x11x5xf32>
    %147 = vector.shape_cast %146 : vector<1x11x5xf32> to vector<11x5xf32>
    %cst_159 = arith.constant dense<0.000000e+00> : vector<16x5xf32>
    %148 = tpu.matmul %145, %147, %cst_159 {dimension_numbers = #tpu.dot_dimension_numbers<[1], [0], [0], [1], [0, 0, 1, 1], [], []>} : vector<16x11xf32>, vector<11x5xf32>, vector<16x5xf32> -> vector<16x5xf32>
    %c1_160 = arith.constant 1 : index
    %c0_161 = arith.constant 0 : index
    %c0_162 = arith.constant 0 : index
    %149 = vector.load %arg16[%c1_160, %c0_161, %c0_162] : memref<4x11x5xf32, #tpu.memory_space<vmem>>, vector<1x11x5xf32>
    %150 = vector.shape_cast %149 : vector<1x11x5xf32> to vector<11x5xf32>
    %cst_163 = arith.constant dense<0.000000e+00> : vector<16x5xf32>
    %151 = tpu.matmul %145, %150, %cst_163 {dimension_numbers = #tpu.dot_dimension_numbers<[1], [0], [0], [1], [0, 0, 1, 1], [], []>} : vector<16x11xf32>, vector<11x5xf32>, vector<16x5xf32> -> vector<16x5xf32>
    %c2_164 = arith.constant 2 : index
    %c0_165 = arith.constant 0 : index
    %c0_166 = arith.constant 0 : index
    %152 = vector.load %arg16[%c2_164, %c0_165, %c0_166] : memref<4x11x5xf32, #tpu.memory_space<vmem>>, vector<1x11x5xf32>
    %153 = vector.shape_cast %152 : vector<1x11x5xf32> to vector<11x5xf32>
    %cst_167 = arith.constant dense<0.000000e+00> : vector<16x5xf32>
    %154 = tpu.matmul %145, %153, %cst_167 {dimension_numbers = #tpu.dot_dimension_numbers<[1], [0], [0], [1], [0, 0, 1, 1], [], []>} : vector<16x11xf32>, vector<11x5xf32>, vector<16x5xf32> -> vector<16x5xf32>
    %c3_168 = arith.constant 3 : index
    %c0_169 = arith.constant 0 : index
    %c0_170 = arith.constant 0 : index
    %155 = vector.load %arg16[%c3_168, %c0_169, %c0_170] : memref<4x11x5xf32, #tpu.memory_space<vmem>>, vector<1x11x5xf32>
    %156 = vector.shape_cast %155 : vector<1x11x5xf32> to vector<11x5xf32>
    %cst_171 = arith.constant dense<0.000000e+00> : vector<16x5xf32>
    %157 = tpu.matmul %145, %156, %cst_171 {dimension_numbers = #tpu.dot_dimension_numbers<[1], [0], [0], [1], [0, 0, 1, 1], [], []>} : vector<16x11xf32>, vector<11x5xf32>, vector<16x5xf32> -> vector<16x5xf32>
    %158 = tpu.concatenate %148, %151, %154, %157 in 0 : vector<16x5xf32>, vector<16x5xf32>, vector<16x5xf32>, vector<16x5xf32> -> vector<64x5xf32>
    %c0_172 = arith.constant 0 : index
    %c0_173 = arith.constant 0 : index
    %159 = vector.load %arg17[%c0_172, %c0_173] : memref<8x64xf32, #tpu.memory_space<vmem>>, vector<8x64xf32>
    %cst_174 = arith.constant dense<0.000000e+00> : vector<8x5xf32>
    %160 = tpu.matmul %159, %158, %cst_174 {dimension_numbers = #tpu.dot_dimension_numbers<[1], [0], [0], [1], [0, 0, 1, 1], [], []>} : vector<8x64xf32>, vector<64x5xf32>, vector<8x5xf32> -> vector<8x5xf32>
    %c0_175 = arith.constant 0 : index
    %c0_176 = arith.constant 0 : index
    %161 = vector.load %arg18[%c0_175, %c0_176] : memref<8x1xf32, #tpu.memory_space<vmem>>, vector<8x1xf32>
    %162 = vector.broadcast %161 : vector<8x1xf32> to vector<8x5xf32>
    %163 = arith.addf %160, %162 : vector<8x5xf32>
    %cst_177 = arith.constant 0.000000e+00 : f32
    %164 = vector.broadcast %cst_177 : f32 to vector<8x5xf32>
    %165 = arith.maximumf %163, %164 : vector<8x5xf32>
    %c0_178 = arith.constant 0 : index
    %c0_179 = arith.constant 0 : index
    %c0_180 = arith.constant 0 : index
    %166 = vector.load %arg19[%c0_178, %c0_179, %c0_180] : memref<4x5x6xf32, #tpu.memory_space<vmem>>, vector<1x5x6xf32>
    %167 = vector.shape_cast %166 : vector<1x5x6xf32> to vector<5x6xf32>
    %cst_181 = arith.constant dense<0.000000e+00> : vector<8x6xf32>
    %168 = tpu.matmul %165, %167, %cst_181 {dimension_numbers = #tpu.dot_dimension_numbers<[1], [0], [0], [1], [0, 0, 1, 1], [], []>} : vector<8x5xf32>, vector<5x6xf32>, vector<8x6xf32> -> vector<8x6xf32>
    %c1_182 = arith.constant 1 : index
    %c0_183 = arith.constant 0 : index
    %c0_184 = arith.constant 0 : index
    %169 = vector.load %arg19[%c1_182, %c0_183, %c0_184] : memref<4x5x6xf32, #tpu.memory_space<vmem>>, vector<1x5x6xf32>
    %170 = vector.shape_cast %169 : vector<1x5x6xf32> to vector<5x6xf32>
    %cst_185 = arith.constant dense<0.000000e+00> : vector<8x6xf32>
    %171 = tpu.matmul %165, %170, %cst_185 {dimension_numbers = #tpu.dot_dimension_numbers<[1], [0], [0], [1], [0, 0, 1, 1], [], []>} : vector<8x5xf32>, vector<5x6xf32>, vector<8x6xf32> -> vector<8x6xf32>
    %172 = arith.maximumf %168, %171 : vector<8x6xf32>
    %c2_186 = arith.constant 2 : index
    %c0_187 = arith.constant 0 : index
    %c0_188 = arith.constant 0 : index
    %173 = vector.load %arg19[%c2_186, %c0_187, %c0_188] : memref<4x5x6xf32, #tpu.memory_space<vmem>>, vector<1x5x6xf32>
    %174 = vector.shape_cast %173 : vector<1x5x6xf32> to vector<5x6xf32>
    %cst_189 = arith.constant dense<0.000000e+00> : vector<8x6xf32>
    %175 = tpu.matmul %165, %174, %cst_189 {dimension_numbers = #tpu.dot_dimension_numbers<[1], [0], [0], [1], [0, 0, 1, 1], [], []>} : vector<8x5xf32>, vector<5x6xf32>, vector<8x6xf32> -> vector<8x6xf32>
    %c3_190 = arith.constant 3 : index
    %c0_191 = arith.constant 0 : index
    %c0_192 = arith.constant 0 : index
    %176 = vector.load %arg19[%c3_190, %c0_191, %c0_192] : memref<4x5x6xf32, #tpu.memory_space<vmem>>, vector<1x5x6xf32>
    %177 = vector.shape_cast %176 : vector<1x5x6xf32> to vector<5x6xf32>
    %cst_193 = arith.constant dense<0.000000e+00> : vector<8x6xf32>
    %178 = tpu.matmul %165, %177, %cst_193 {dimension_numbers = #tpu.dot_dimension_numbers<[1], [0], [0], [1], [0, 0, 1, 1], [], []>} : vector<8x5xf32>, vector<5x6xf32>, vector<8x6xf32> -> vector<8x6xf32>
    %179 = arith.maximumf %175, %178 : vector<8x6xf32>
    %180 = arith.maximumf %172, %179 : vector<8x6xf32>
    %c0_194 = arith.constant 0 : index
    %c0_195 = arith.constant 0 : index
    %c0_196 = arith.constant 0 : index
    %181 = vector.load %arg35[%c0_194, %c0_195, %c0_196] : memref<1x8x6xf32, #tpu.memory_space<vmem>>, vector<1x8x6xf32>
    %182 = vector.shape_cast %181 : vector<1x8x6xf32> to vector<8x6xf32>
    %183 = vector.shape_cast %180 : vector<8x6xf32> to vector<1x8x6xf32>
    tpu.vector_store %arg35[%c0_194, %c0_195, %c0_196], %183 {strides = array<i32>} : memref<1x8x6xf32, #tpu.memory_space<vmem>>, vector<1x8x6xf32>,
    %c0_197 = arith.constant 0 : index
    %c0_198 = arith.constant 0 : index
    %c0_199 = arith.constant 0 : index
    %184 = vector.load %arg20[%c0_197, %c0_198, %c0_199] : memref<4x6x12xf32, #tpu.memory_space<vmem>>, vector<1x6x12xf32>
    %185 = vector.shape_cast %184 : vector<1x6x12xf32> to vector<6x12xf32>
    %cst_200 = arith.constant dense<0.000000e+00> : vector<8x12xf32>
    %186 = tpu.matmul %180, %185, %cst_200 {dimension_numbers = #tpu.dot_dimension_numbers<[1], [0], [0], [1], [0, 0, 1, 1], [], []>} : vector<8x6xf32>, vector<6x12xf32>, vector<8x12xf32> -> vector<8x12xf32>
    %c1_201 = arith.constant 1 : index
    %c0_202 = arith.constant 0 : index
    %c0_203 = arith.constant 0 : index
    %187 = vector.load %arg20[%c1_201, %c0_202, %c0_203] : memref<4x6x12xf32, #tpu.memory_space<vmem>>, vector<1x6x12xf32>
    %188 = vector.shape_cast %187 : vector<1x6x12xf32> to vector<6x12xf32>
    %cst_204 = arith.constant dense<0.000000e+00> : vector<8x12xf32>
    %189 = tpu.matmul %180, %188, %cst_204 {dimension_numbers = #tpu.dot_dimension_numbers<[1], [0], [0], [1], [0, 0, 1, 1], [], []>} : vector<8x6xf32>, vector<6x12xf32>, vector<8x12xf32> -> vector<8x12xf32>
    %c2_205 = arith.constant 2 : index
    %c0_206 = arith.constant 0 : index
    %c0_207 = arith.constant 0 : index
    %190 = vector.load %arg20[%c2_205, %c0_206, %c0_207] : memref<4x6x12xf32, #tpu.memory_space<vmem>>, vector<1x6x12xf32>
    %191 = vector.shape_cast %190 : vector<1x6x12xf32> to vector<6x12xf32>
    %cst_208 = arith.constant dense<0.000000e+00> : vector<8x12xf32>
    %192 = tpu.matmul %180, %191, %cst_208 {dimension_numbers = #tpu.dot_dimension_numbers<[1], [0], [0], [1], [0, 0, 1, 1], [], []>} : vector<8x6xf32>, vector<6x12xf32>, vector<8x12xf32> -> vector<8x12xf32>
    %c3_209 = arith.constant 3 : index
    %c0_210 = arith.constant 0 : index
    %c0_211 = arith.constant 0 : index
    %193 = vector.load %arg20[%c3_209, %c0_210, %c0_211] : memref<4x6x12xf32, #tpu.memory_space<vmem>>, vector<1x6x12xf32>
    %194 = vector.shape_cast %193 : vector<1x6x12xf32> to vector<6x12xf32>
    %cst_212 = arith.constant dense<0.000000e+00> : vector<8x12xf32>
    %195 = tpu.matmul %180, %194, %cst_212 {dimension_numbers = #tpu.dot_dimension_numbers<[1], [0], [0], [1], [0, 0, 1, 1], [], []>} : vector<8x6xf32>, vector<6x12xf32>, vector<8x12xf32> -> vector<8x12xf32>
    %196 = tpu.concatenate %186, %189, %192, %195 in 0 : vector<8x12xf32>, vector<8x12xf32>, vector<8x12xf32>, vector<8x12xf32> -> vector<32x12xf32>
    %c0_213 = arith.constant 0 : index
    %c0_214 = arith.constant 0 : index
    %197 = vector.load %arg21[%c0_213, %c0_214] : memref<16x32xf32, #tpu.memory_space<vmem>>, vector<16x32xf32>
    %cst_215 = arith.constant dense<0.000000e+00> : vector<16x12xf32>
    %198 = tpu.matmul %197, %196, %cst_215 {dimension_numbers = #tpu.dot_dimension_numbers<[1], [0], [0], [1], [0, 0, 1, 1], [], []>} : vector<16x32xf32>, vector<32x12xf32>, vector<16x12xf32> -> vector<16x12xf32>
    %c0_216 = arith.constant 0 : index
    %c0_217 = arith.constant 0 : index
    %199 = vector.load %arg22[%c0_216, %c0_217] : memref<16x1xf32, #tpu.memory_space<vmem>>, vector<16x1xf32>
    %200 = vector.broadcast %199 : vector<16x1xf32> to vector<16x12xf32>
    %201 = arith.addf %198, %200 : vector<16x12xf32>
    %cst_218 = arith.constant 0.000000e+00 : f32
    %202 = vector.broadcast %cst_218 : f32 to vector<16x12xf32>
    %203 = arith.maximumf %201, %202 : vector<16x12xf32>
    %c0_219 = arith.constant 0 : index
    %c0_220 = arith.constant 0 : index
    %c0_221 = arith.constant 0 : index
    %204 = vector.load %arg23[%c0_219, %c0_220, %c0_221] : memref<6x12x22xf32, #tpu.memory_space<vmem>>, vector<1x12x22xf32>
    %205 = vector.shape_cast %204 : vector<1x12x22xf32> to vector<12x22xf32>
    %cst_222 = arith.constant dense<0.000000e+00> : vector<16x22xf32>
    %206 = tpu.matmul %203, %205, %cst_222 {dimension_numbers = #tpu.dot_dimension_numbers<[1], [0], [0], [1], [0, 0, 1, 1], [], []>} : vector<16x12xf32>, vector<12x22xf32>, vector<16x22xf32> -> vector<16x22xf32>
    %c1_223 = arith.constant 1 : index
    %c0_224 = arith.constant 0 : index
    %c0_225 = arith.constant 0 : index
    %207 = vector.load %arg23[%c1_223, %c0_224, %c0_225] : memref<6x12x22xf32, #tpu.memory_space<vmem>>, vector<1x12x22xf32>
    %208 = vector.shape_cast %207 : vector<1x12x22xf32> to vector<12x22xf32>
    %cst_226 = arith.constant dense<0.000000e+00> : vector<16x22xf32>
    %209 = tpu.matmul %203, %208, %cst_226 {dimension_numbers = #tpu.dot_dimension_numbers<[1], [0], [0], [1], [0, 0, 1, 1], [], []>} : vector<16x12xf32>, vector<12x22xf32>, vector<16x22xf32> -> vector<16x22xf32>
    %c2_227 = arith.constant 2 : index
    %c0_228 = arith.constant 0 : index
    %c0_229 = arith.constant 0 : index
    %210 = vector.load %arg23[%c2_227, %c0_228, %c0_229] : memref<6x12x22xf32, #tpu.memory_space<vmem>>, vector<1x12x22xf32>
    %211 = vector.shape_cast %210 : vector<1x12x22xf32> to vector<12x22xf32>
    %cst_230 = arith.constant dense<0.000000e+00> : vector<16x22xf32>
    %212 = tpu.matmul %203, %211, %cst_230 {dimension_numbers = #tpu.dot_dimension_numbers<[1], [0], [0], [1], [0, 0, 1, 1], [], []>} : vector<16x12xf32>, vector<12x22xf32>, vector<16x22xf32> -> vector<16x22xf32>
    %c3_231 = arith.constant 3 : index
    %c0_232 = arith.constant 0 : index
    %c0_233 = arith.constant 0 : index
    %213 = vector.load %arg23[%c3_231, %c0_232, %c0_233] : memref<6x12x22xf32, #tpu.memory_space<vmem>>, vector<1x12x22xf32>
    %214 = vector.shape_cast %213 : vector<1x12x22xf32> to vector<12x22xf32>
    %cst_234 = arith.constant dense<0.000000e+00> : vector<16x22xf32>
    %215 = tpu.matmul %203, %214, %cst_234 {dimension_numbers = #tpu.dot_dimension_numbers<[1], [0], [0], [1], [0, 0, 1, 1], [], []>} : vector<16x12xf32>, vector<12x22xf32>, vector<16x22xf32> -> vector<16x22xf32>
    %c4_235 = arith.constant 4 : index
    %c0_236 = arith.constant 0 : index
    %c0_237 = arith.constant 0 : index
    %216 = vector.load %arg23[%c4_235, %c0_236, %c0_237] : memref<6x12x22xf32, #tpu.memory_space<vmem>>, vector<1x12x22xf32>
    %217 = vector.shape_cast %216 : vector<1x12x22xf32> to vector<12x22xf32>
    %cst_238 = arith.constant dense<0.000000e+00> : vector<16x22xf32>
    %218 = tpu.matmul %203, %217, %cst_238 {dimension_numbers = #tpu.dot_dimension_numbers<[1], [0], [0], [1], [0, 0, 1, 1], [], []>} : vector<16x12xf32>, vector<12x22xf32>, vector<16x22xf32> -> vector<16x22xf32>
    %c5_239 = arith.constant 5 : index
    %c0_240 = arith.constant 0 : index
    %c0_241 = arith.constant 0 : index
    %219 = vector.load %arg23[%c5_239, %c0_240, %c0_241] : memref<6x12x22xf32, #tpu.memory_space<vmem>>, vector<1x12x22xf32>
    %220 = vector.shape_cast %219 : vector<1x12x22xf32> to vector<12x22xf32>
    %cst_242 = arith.constant dense<0.000000e+00> : vector<16x22xf32>
    %221 = tpu.matmul %203, %220, %cst_242 {dimension_numbers = #tpu.dot_dimension_numbers<[1], [0], [0], [1], [0, 0, 1, 1], [], []>} : vector<16x12xf32>, vector<12x22xf32>, vector<16x22xf32> -> vector<16x22xf32>
    %222 = tpu.concatenate %206, %209, %212, %215, %218, %221 in 0 : vector<16x22xf32>, vector<16x22xf32>, vector<16x22xf32>, vector<16x22xf32>, vector<16x22xf32>, vector<16x22xf32> -> vector<96x22xf32>
    %c0_243 = arith.constant 0 : index
    %c0_244 = arith.constant 0 : index
    %223 = vector.load %arg24[%c0_243, %c0_244] : memref<32x96xf32, #tpu.memory_space<vmem>>, vector<32x96xf32>
    %cst_245 = arith.constant dense<0.000000e+00> : vector<32x22xf32>
    %224 = tpu.matmul %223, %222, %cst_245 {dimension_numbers = #tpu.dot_dimension_numbers<[1], [0], [0], [1], [0, 0, 1, 1], [], []>} : vector<32x96xf32>, vector<96x22xf32>, vector<32x22xf32> -> vector<32x22xf32>
    %c0_246 = arith.constant 0 : index
    %c0_247 = arith.constant 0 : index
    %225 = vector.load %arg25[%c0_246, %c0_247] : memref<32x1xf32, #tpu.memory_space<vmem>>, vector<32x1xf32>
    %226 = vector.broadcast %225 : vector<32x1xf32> to vector<32x22xf32>
    %227 = arith.addf %224, %226 : vector<32x22xf32>
    %cst_248 = arith.constant 0.000000e+00 : f32
    %228 = vector.broadcast %cst_248 : f32 to vector<32x22xf32>
    %229 = arith.maximumf %227, %228 : vector<32x22xf32>
    %c0_249 = arith.constant 0 : index
    %c0_250 = arith.constant 0 : index
    %c0_251 = arith.constant 0 : index
    %230 = vector.load %arg26[%c0_249, %c0_250, %c0_251] : memref<8x22x65xf32, #tpu.memory_space<vmem>>, vector<1x22x65xf32>
    %231 = vector.shape_cast %230 : vector<1x22x65xf32> to vector<22x65xf32>
    %cst_252 = arith.constant dense<0.000000e+00> : vector<32x65xf32>
    %232 = tpu.matmul %229, %231, %cst_252 {dimension_numbers = #tpu.dot_dimension_numbers<[1], [0], [0], [1], [0, 0, 1, 1], [], []>} : vector<32x22xf32>, vector<22x65xf32>, vector<32x65xf32> -> vector<32x65xf32>
    %c1_253 = arith.constant 1 : index
    %c0_254 = arith.constant 0 : index
    %c0_255 = arith.constant 0 : index
    %233 = vector.load %arg26[%c1_253, %c0_254, %c0_255] : memref<8x22x65xf32, #tpu.memory_space<vmem>>, vector<1x22x65xf32>
    %234 = vector.shape_cast %233 : vector<1x22x65xf32> to vector<22x65xf32>
    %cst_256 = arith.constant dense<0.000000e+00> : vector<32x65xf32>
    %235 = tpu.matmul %229, %234, %cst_256 {dimension_numbers = #tpu.dot_dimension_numbers<[1], [0], [0], [1], [0, 0, 1, 1], [], []>} : vector<32x22xf32>, vector<22x65xf32>, vector<32x65xf32> -> vector<32x65xf32>
    %c2_257 = arith.constant 2 : index
    %c0_258 = arith.constant 0 : index
    %c0_259 = arith.constant 0 : index
    %236 = vector.load %arg26[%c2_257, %c0_258, %c0_259] : memref<8x22x65xf32, #tpu.memory_space<vmem>>, vector<1x22x65xf32>
    %237 = vector.shape_cast %236 : vector<1x22x65xf32> to vector<22x65xf32>
    %cst_260 = arith.constant dense<0.000000e+00> : vector<32x65xf32>
    %238 = tpu.matmul %229, %237, %cst_260 {dimension_numbers = #tpu.dot_dimension_numbers<[1], [0], [0], [1], [0, 0, 1, 1], [], []>} : vector<32x22xf32>, vector<22x65xf32>, vector<32x65xf32> -> vector<32x65xf32>
    %c3_261 = arith.constant 3 : index
    %c0_262 = arith.constant 0 : index
    %c0_263 = arith.constant 0 : index
    %239 = vector.load %arg26[%c3_261, %c0_262, %c0_263] : memref<8x22x65xf32, #tpu.memory_space<vmem>>, vector<1x22x65xf32>
    %240 = vector.shape_cast %239 : vector<1x22x65xf32> to vector<22x65xf32>
    %cst_264 = arith.constant dense<0.000000e+00> : vector<32x65xf32>
    %241 = tpu.matmul %229, %240, %cst_264 {dimension_numbers = #tpu.dot_dimension_numbers<[1], [0], [0], [1], [0, 0, 1, 1], [], []>} : vector<32x22xf32>, vector<22x65xf32>, vector<32x65xf32> -> vector<32x65xf32>
    %c4_265 = arith.constant 4 : index
    %c0_266 = arith.constant 0 : index
    %c0_267 = arith.constant 0 : index
    %242 = vector.load %arg26[%c4_265, %c0_266, %c0_267] : memref<8x22x65xf32, #tpu.memory_space<vmem>>, vector<1x22x65xf32>
    %243 = vector.shape_cast %242 : vector<1x22x65xf32> to vector<22x65xf32>
    %cst_268 = arith.constant dense<0.000000e+00> : vector<32x65xf32>
    %244 = tpu.matmul %229, %243, %cst_268 {dimension_numbers = #tpu.dot_dimension_numbers<[1], [0], [0], [1], [0, 0, 1, 1], [], []>} : vector<32x22xf32>, vector<22x65xf32>, vector<32x65xf32> -> vector<32x65xf32>
    %c5_269 = arith.constant 5 : index
    %c0_270 = arith.constant 0 : index
    %c0_271 = arith.constant 0 : index
    %245 = vector.load %arg26[%c5_269, %c0_270, %c0_271] : memref<8x22x65xf32, #tpu.memory_space<vmem>>, vector<1x22x65xf32>
    %246 = vector.shape_cast %245 : vector<1x22x65xf32> to vector<22x65xf32>
    %cst_272 = arith.constant dense<0.000000e+00> : vector<32x65xf32>
    %247 = tpu.matmul %229, %246, %cst_272 {dimension_numbers = #tpu.dot_dimension_numbers<[1], [0], [0], [1], [0, 0, 1, 1], [], []>} : vector<32x22xf32>, vector<22x65xf32>, vector<32x65xf32> -> vector<32x65xf32>
    %c6_273 = arith.constant 6 : index
    %c0_274 = arith.constant 0 : index
    %c0_275 = arith.constant 0 : index
    %248 = vector.load %arg26[%c6_273, %c0_274, %c0_275] : memref<8x22x65xf32, #tpu.memory_space<vmem>>, vector<1x22x65xf32>
    %249 = vector.shape_cast %248 : vector<1x22x65xf32> to vector<22x65xf32>
    %cst_276 = arith.constant dense<0.000000e+00> : vector<32x65xf32>
    %250 = tpu.matmul %229, %249, %cst_276 {dimension_numbers = #tpu.dot_dimension_numbers<[1], [0], [0], [1], [0, 0, 1, 1], [], []>} : vector<32x22xf32>, vector<22x65xf32>, vector<32x65xf32> -> vector<32x65xf32>
    %c7_277 = arith.constant 7 : index
    %c0_278 = arith.constant 0 : index
    %c0_279 = arith.constant 0 : index
    %251 = vector.load %arg26[%c7_277, %c0_278, %c0_279] : memref<8x22x65xf32, #tpu.memory_space<vmem>>, vector<1x22x65xf32>
    %252 = vector.shape_cast %251 : vector<1x22x65xf32> to vector<22x65xf32>
    %cst_280 = arith.constant dense<0.000000e+00> : vector<32x65xf32>
    %253 = tpu.matmul %229, %252, %cst_280 {dimension_numbers = #tpu.dot_dimension_numbers<[1], [0], [0], [1], [0, 0, 1, 1], [], []>} : vector<32x22xf32>, vector<22x65xf32>, vector<32x65xf32> -> vector<32x65xf32>
    %254 = tpu.concatenate %232, %235, %238, %241, %244, %247, %250, %253 in 0 : vector<32x65xf32>, vector<32x65xf32>, vector<32x65xf32>, vector<32x65xf32>, vector<32x65xf32>, vector<32x65xf32>, vector<32x65xf32>, vector<32x65xf32> -> vector<256x65xf32>
    %c0_281 = arith.constant 0 : index
    %c0_282 = arith.constant 0 : index
    %255 = vector.load %arg27[%c0_281, %c0_282] : memref<32x256xf32, #tpu.memory_space<vmem>>, vector<32x256xf32>
    %cst_283 = arith.constant dense<0.000000e+00> : vector<32x65xf32>
    %256 = tpu.matmul %255, %254, %cst_283 {dimension_numbers = #tpu.dot_dimension_numbers<[1], [0], [0], [1], [0, 0, 1, 1], [], []>} : vector<32x256xf32>, vector<256x65xf32>, vector<32x65xf32> -> vector<32x65xf32>
    %c0_284 = arith.constant 0 : index
    %c0_285 = arith.constant 0 : index
    %257 = vector.load %arg28[%c0_284, %c0_285] : memref<32x1xf32, #tpu.memory_space<vmem>>, vector<32x1xf32>
    %258 = vector.broadcast %257 : vector<32x1xf32> to vector<32x65xf32>
    %259 = arith.addf %256, %258 : vector<32x65xf32>
    %cst_286 = arith.constant 0.000000e+00 : f32
    %260 = vector.broadcast %cst_286 : f32 to vector<32x65xf32>
    %261 = arith.maximumf %259, %260 : vector<32x65xf32>
    %c0_287 = arith.constant 0 : index
    %c0_288 = arith.constant 0 : index
    %c0_289 = arith.constant 0 : index
    %262 = vector.load %arg29[%c0_287, %c0_288, %c0_289] : memref<8x65x128xf32, #tpu.memory_space<vmem>>, vector<1x65x128xf32>
    %263 = vector.shape_cast %262 : vector<1x65x128xf32> to vector<65x128xf32>
    %cst_290 = arith.constant dense<0.000000e+00> : vector<32x128xf32>
    %264 = tpu.matmul %261, %263, %cst_290 {dimension_numbers = #tpu.dot_dimension_numbers<[1], [0], [0], [1], [0, 0, 1, 1], [], []>} : vector<32x65xf32>, vector<65x128xf32>, vector<32x128xf32> -> vector<32x128xf32>
    %c1_291 = arith.constant 1 : index
    %c0_292 = arith.constant 0 : index
    %c0_293 = arith.constant 0 : index
    %265 = vector.load %arg29[%c1_291, %c0_292, %c0_293] : memref<8x65x128xf32, #tpu.memory_space<vmem>>, vector<1x65x128xf32>
    %266 = vector.shape_cast %265 : vector<1x65x128xf32> to vector<65x128xf32>
    %cst_294 = arith.constant dense<0.000000e+00> : vector<32x128xf32>
    %267 = tpu.matmul %261, %266, %cst_294 {dimension_numbers = #tpu.dot_dimension_numbers<[1], [0], [0], [1], [0, 0, 1, 1], [], []>} : vector<32x65xf32>, vector<65x128xf32>, vector<32x128xf32> -> vector<32x128xf32>
    %c2_295 = arith.constant 2 : index
    %c0_296 = arith.constant 0 : index
    %c0_297 = arith.constant 0 : index
    %268 = vector.load %arg29[%c2_295, %c0_296, %c0_297] : memref<8x65x128xf32, #tpu.memory_space<vmem>>, vector<1x65x128xf32>
    %269 = vector.shape_cast %268 : vector<1x65x128xf32> to vector<65x128xf32>
    %cst_298 = arith.constant dense<0.000000e+00> : vector<32x128xf32>
    %270 = tpu.matmul %261, %269, %cst_298 {dimension_numbers = #tpu.dot_dimension_numbers<[1], [0], [0], [1], [0, 0, 1, 1], [], []>} : vector<32x65xf32>, vector<65x128xf32>, vector<32x128xf32> -> vector<32x128xf32>
    %c3_299 = arith.constant 3 : index
    %c0_300 = arith.constant 0 : index
    %c0_301 = arith.constant 0 : index
    %271 = vector.load %arg29[%c3_299, %c0_300, %c0_301] : memref<8x65x128xf32, #tpu.memory_space<vmem>>, vector<1x65x128xf32>
    %272 = vector.shape_cast %271 : vector<1x65x128xf32> to vector<65x128xf32>
    %cst_302 = arith.constant dense<0.000000e+00> : vector<32x128xf32>
    %273 = tpu.matmul %261, %272, %cst_302 {dimension_numbers = #tpu.dot_dimension_numbers<[1], [0], [0], [1], [0, 0, 1, 1], [], []>} : vector<32x65xf32>, vector<65x128xf32>, vector<32x128xf32> -> vector<32x128xf32>
    %c4_303 = arith.constant 4 : index
    %c0_304 = arith.constant 0 : index
    %c0_305 = arith.constant 0 : index
    %274 = vector.load %arg29[%c4_303, %c0_304, %c0_305] : memref<8x65x128xf32, #tpu.memory_space<vmem>>, vector<1x65x128xf32>
    %275 = vector.shape_cast %274 : vector<1x65x128xf32> to vector<65x128xf32>
    %cst_306 = arith.constant dense<0.000000e+00> : vector<32x128xf32>
    %276 = tpu.matmul %261, %275, %cst_306 {dimension_numbers = #tpu.dot_dimension_numbers<[1], [0], [0], [1], [0, 0, 1, 1], [], []>} : vector<32x65xf32>, vector<65x128xf32>, vector<32x128xf32> -> vector<32x128xf32>
    %c5_307 = arith.constant 5 : index
    %c0_308 = arith.constant 0 : index
    %c0_309 = arith.constant 0 : index
    %277 = vector.load %arg29[%c5_307, %c0_308, %c0_309] : memref<8x65x128xf32, #tpu.memory_space<vmem>>, vector<1x65x128xf32>
    %278 = vector.shape_cast %277 : vector<1x65x128xf32> to vector<65x128xf32>
    %cst_310 = arith.constant dense<0.000000e+00> : vector<32x128xf32>
    %279 = tpu.matmul %261, %278, %cst_310 {dimension_numbers = #tpu.dot_dimension_numbers<[1], [0], [0], [1], [0, 0, 1, 1], [], []>} : vector<32x65xf32>, vector<65x128xf32>, vector<32x128xf32> -> vector<32x128xf32>
    %c6_311 = arith.constant 6 : index
    %c0_312 = arith.constant 0 : index
    %c0_313 = arith.constant 0 : index
    %280 = vector.load %arg29[%c6_311, %c0_312, %c0_313] : memref<8x65x128xf32, #tpu.memory_space<vmem>>, vector<1x65x128xf32>
    %281 = vector.shape_cast %280 : vector<1x65x128xf32> to vector<65x128xf32>
    %cst_314 = arith.constant dense<0.000000e+00> : vector<32x128xf32>
    %282 = tpu.matmul %261, %281, %cst_314 {dimension_numbers = #tpu.dot_dimension_numbers<[1], [0], [0], [1], [0, 0, 1, 1], [], []>} : vector<32x65xf32>, vector<65x128xf32>, vector<32x128xf32> -> vector<32x128xf32>
    %c7_315 = arith.constant 7 : index
    %c0_316 = arith.constant 0 : index
    %c0_317 = arith.constant 0 : index
    %283 = vector.load %arg29[%c7_315, %c0_316, %c0_317] : memref<8x65x128xf32, #tpu.memory_space<vmem>>, vector<1x65x128xf32>
    %284 = vector.shape_cast %283 : vector<1x65x128xf32> to vector<65x128xf32>
    %cst_318 = arith.constant dense<0.000000e+00> : vector<32x128xf32>
    %285 = tpu.matmul %261, %284, %cst_318 {dimension_numbers = #tpu.dot_dimension_numbers<[1], [0], [0], [1], [0, 0, 1, 1], [], []>} : vector<32x65xf32>, vector<65x128xf32>, vector<32x128xf32> -> vector<32x128xf32>
    %286 = tpu.concatenate %264, %267, %270, %273, %276, %279, %282, %285 in 0 : vector<32x128xf32>, vector<32x128xf32>, vector<32x128xf32>, vector<32x128xf32>, vector<32x128xf32>, vector<32x128xf32>, vector<32x128xf32>, vector<32x128xf32> -> vector<256x128xf32>
    %c0_319 = arith.constant 0 : index
    %c0_320 = arith.constant 0 : index
    %287 = vector.load %arg30[%c0_319, %c0_320] : memref<32x256xf32, #tpu.memory_space<vmem>>, vector<32x256xf32>
    %cst_321 = arith.constant dense<0.000000e+00> : vector<32x128xf32>
    %288 = tpu.matmul %287, %286, %cst_321 {dimension_numbers = #tpu.dot_dimension_numbers<[1], [0], [0], [1], [0, 0, 1, 1], [], []>} : vector<32x256xf32>, vector<256x128xf32>, vector<32x128xf32> -> vector<32x128xf32>
    %c0_322 = arith.constant 0 : index
    %c0_323 = arith.constant 0 : index
    %289 = vector.load %arg31[%c0_322, %c0_323] : memref<32x1xf32, #tpu.memory_space<vmem>>, vector<32x1xf32>
    %290 = vector.broadcast %289 : vector<32x1xf32> to vector<32x128xf32>
    %291 = arith.addf %288, %290 : vector<32x128xf32>
    %292 = math.tanh %291 : vector<32x128xf32>
    %c0_324 = arith.constant 0 : index
    %c0_325 = arith.constant 0 : index
    %293 = vector.load %arg32[%c0_324, %c0_325] : memref<32x32xf32, #tpu.memory_space<vmem>>, vector<32x32xf32>
    %cst_326 = arith.constant dense<0.000000e+00> : vector<32x128xf32>
    %294 = tpu.matmul %293, %292, %cst_326 {dimension_numbers = #tpu.dot_dimension_numbers<[1], [0], [0], [1], [0, 0, 1, 1], [], []>} : vector<32x32xf32>, vector<32x128xf32>, vector<32x128xf32> -> vector<32x128xf32>
    %c0_327 = arith.constant 0 : index
    %c0_328 = arith.constant 0 : index
    %295 = vector.load %arg33[%c0_327, %c0_328] : memref<32x1xf32, #tpu.memory_space<vmem>>, vector<32x1xf32>
    %296 = vector.broadcast %295 : vector<32x1xf32> to vector<32x128xf32>
    %297 = arith.addf %294, %296 : vector<32x128xf32>
    %c0_329 = arith.constant 0 : index
    %c0_330 = arith.constant 0 : index
    %c0_331 = arith.constant 0 : index
    %298 = vector.load %arg36[%c0_329, %c0_330, %c0_331] : memref<1x32x128xf32, #tpu.memory_space<vmem>>, vector<1x32x128xf32>
    %299 = vector.shape_cast %298 : vector<1x32x128xf32> to vector<32x128xf32>
    %300 = vector.shape_cast %297 : vector<32x128xf32> to vector<1x32x128xf32>
    tpu.vector_store %arg36[%c0_329, %c0_330, %c0_331], %300 {strides = array<i32>} : memref<1x32x128xf32, #tpu.memory_space<vmem>>, vector<1x32x128xf32>,
    return
  }
  func.func @transform_0(%arg0: i32) -> (i32, i32, i32) {
    %c0_i32 = arith.constant 0 : i32
    %c0_i32_0 = arith.constant 0 : i32
    %c0_i32_1 = arith.constant 0 : i32
    return %arg0, %c0_i32, %c0_i32_0 : i32, i32, i32
  }
  func.func @transform_1(%arg0: i32) -> (i32, i32) {
    %c0_i32 = arith.constant 0 : i32
    %c0_i32_0 = arith.constant 0 : i32
    %c0_i32_1 = arith.constant 0 : i32
    return %c0_i32, %c0_i32_0 : i32, i32
  }
  func.func @transform_2(%arg0: i32) -> (i32, i32) {
    %c0_i32 = arith.constant 0 : i32
    %c0_i32_0 = arith.constant 0 : i32
    %c0_i32_1 = arith.constant 0 : i32
    return %c0_i32, %c0_i32_0 : i32, i32
  }
  func.func @transform_3(%arg0: i32) -> (i32, i32, i32) {
    %c0_i32 = arith.constant 0 : i32
    %c0_i32_0 = arith.constant 0 : i32
    %c0_i32_1 = arith.constant 0 : i32
    %c0_i32_2 = arith.constant 0 : i32
    return %c0_i32, %c0_i32_0, %c0_i32_1 : i32, i32, i32
  }
  func.func @transform_4(%arg0: i32) -> (i32, i32) {
    %c0_i32 = arith.constant 0 : i32
    %c0_i32_0 = arith.constant 0 : i32
    %c0_i32_1 = arith.constant 0 : i32
    return %c0_i32, %c0_i32_0 : i32, i32
  }
  func.func @transform_5(%arg0: i32) -> (i32, i32) {
    %c0_i32 = arith.constant 0 : i32
    %c0_i32_0 = arith.constant 0 : i32
    %c0_i32_1 = arith.constant 0 : i32
    return %c0_i32, %c0_i32_0 : i32, i32
  }
  func.func @transform_6(%arg0: i32) -> (i32, i32, i32) {
    %c0_i32 = arith.constant 0 : i32
    %c0_i32_0 = arith.constant 0 : i32
    %c0_i32_1 = arith.constant 0 : i32
    %c0_i32_2 = arith.constant 0 : i32
    return %c0_i32, %c0_i32_0, %c0_i32_1 : i32, i32, i32
  }
  func.func @transform_7(%arg0: i32) -> (i32, i32, i32) {
    %c0_i32 = arith.constant 0 : i32
    %c0_i32_0 = arith.constant 0 : i32
    %c0_i32_1 = arith.constant 0 : i32
    %c0_i32_2 = arith.constant 0 : i32
    return %c0_i32, %c0_i32_0, %c0_i32_1 : i32, i32, i32
  }
  func.func @transform_8(%arg0: i32) -> (i32, i32) {
    %c0_i32 = arith.constant 0 : i32
    %c0_i32_0 = arith.constant 0 : i32
    %c0_i32_1 = arith.constant 0 : i32
    return %c0_i32, %c0_i32_0 : i32, i32
  }
  func.func @transform_9(%arg0: i32) -> (i32, i32) {
    %c0_i32 = arith.constant 0 : i32
    %c0_i32_0 = arith.constant 0 : i32
    %c0_i32_1 = arith.constant 0 : i32
    return %c0_i32, %c0_i32_0 : i32, i32
  }
  func.func @transform_10(%arg0: i32) -> (i32, i32, i32) {
    %c0_i32 = arith.constant 0 : i32
    %c0_i32_0 = arith.constant 0 : i32
    %c0_i32_1 = arith.constant 0 : i32
    %c0_i32_2 = arith.constant 0 : i32
    return %c0_i32, %c0_i32_0, %c0_i32_1 : i32, i32, i32
  }
  func.func @transform_11(%arg0: i32) -> (i32, i32, i32) {
    %c0_i32 = arith.constant 0 : i32
    %c0_i32_0 = arith.constant 0 : i32
    %c0_i32_1 = arith.constant 0 : i32
    %c0_i32_2 = arith.constant 0 : i32
    return %c0_i32, %c0_i32_0, %c0_i32_1 : i32, i32, i32
  }
  func.func @transform_12(%arg0: i32) -> (i32, i32) {
    %c0_i32 = arith.constant 0 : i32
    %c0_i32_0 = arith.constant 0 : i32
    %c0_i32_1 = arith.constant 0 : i32
    return %c0_i32, %c0_i32_0 : i32, i32
  }
  func.func @transform_13(%arg0: i32) -> (i32, i32) {
    %c0_i32 = arith.constant 0 : i32
    %c0_i32_0 = arith.constant 0 : i32
    %c0_i32_1 = arith.constant 0 : i32
    return %c0_i32, %c0_i32_0 : i32, i32
  }
  func.func @transform_14(%arg0: i32) -> (i32, i32, i32) {
    %c0_i32 = arith.constant 0 : i32
    %c0_i32_0 = arith.constant 0 : i32
    %c0_i32_1 = arith.constant 0 : i32
    %c0_i32_2 = arith.constant 0 : i32
    return %c0_i32, %c0_i32_0, %c0_i32_1 : i32, i32, i32
  }
  func.func @transform_15(%arg0: i32) -> (i32, i32, i32) {
    %c0_i32 = arith.constant 0 : i32
    %c0_i32_0 = arith.constant 0 : i32
    %c0_i32_1 = arith.constant 0 : i32
    %c0_i32_2 = arith.constant 0 : i32
    return %c0_i32, %c0_i32_0, %c0_i32_1 : i32, i32, i32
  }
  func.func @transform_16(%arg0: i32) -> (i32, i32) {
    %c0_i32 = arith.constant 0 : i32
    %c0_i32_0 = arith.constant 0 : i32
    %c0_i32_1 = arith.constant 0 : i32
    return %c0_i32, %c0_i32_0 : i32, i32
  }
  func.func @transform_17(%arg0: i32) -> (i32, i32) {
    %c0_i32 = arith.constant 0 : i32
    %c0_i32_0 = arith.constant 0 : i32
    %c0_i32_1 = arith.constant 0 : i32
    return %c0_i32, %c0_i32_0 : i32, i32
  }
  func.func @transform_18(%arg0: i32) -> (i32, i32, i32) {
    %c0_i32 = arith.constant 0 : i32
    %c0_i32_0 = arith.constant 0 : i32
    %c0_i32_1 = arith.constant 0 : i32
    %c0_i32_2 = arith.constant 0 : i32
    return %c0_i32, %c0_i32_0, %c0_i32_1 : i32, i32, i32
  }
  func.func @transform_19(%arg0: i32) -> (i32, i32, i32) {
    %c0_i32 = arith.constant 0 : i32
    %c0_i32_0 = arith.constant 0 : i32
    %c0_i32_1 = arith.constant 0 : i32
    %c0_i32_2 = arith.constant 0 : i32
    return %c0_i32, %c0_i32_0, %c0_i32_1 : i32, i32, i32
  }
  func.func @transform_20(%arg0: i32) -> (i32, i32) {
    %c0_i32 = arith.constant 0 : i32
    %c0_i32_0 = arith.constant 0 : i32
    %c0_i32_1 = arith.constant 0 : i32
    return %c0_i32, %c0_i32_0 : i32, i32
  }
  func.func @transform_21(%arg0: i32) -> (i32, i32) {
    %c0_i32 = arith.constant 0 : i32
    %c0_i32_0 = arith.constant 0 : i32
    %c0_i32_1 = arith.constant 0 : i32
    return %c0_i32, %c0_i32_0 : i32, i32
  }
  func.func @transform_22(%arg0: i32) -> (i32, i32, i32) {
    %c0_i32 = arith.constant 0 : i32
    %c0_i32_0 = arith.constant 0 : i32
    %c0_i32_1 = arith.constant 0 : i32
    %c0_i32_2 = arith.constant 0 : i32
    return %c0_i32, %c0_i32_0, %c0_i32_1 : i32, i32, i32
  }
  func.func @transform_23(%arg0: i32) -> (i32, i32) {
    %c0_i32 = arith.constant 0 : i32
    %c0_i32_0 = arith.constant 0 : i32
    %c0_i32_1 = arith.constant 0 : i32
    return %c0_i32, %c0_i32_0 : i32, i32
  }
  func.func @transform_24(%arg0: i32) -> (i32, i32) {
    %c0_i32 = arith.constant 0 : i32
    %c0_i32_0 = arith.constant 0 : i32
    %c0_i32_1 = arith.constant 0 : i32
    return %c0_i32, %c0_i32_0 : i32, i32
  }
  func.func @transform_25(%arg0: i32) -> (i32, i32, i32) {
    %c0_i32 = arith.constant 0 : i32
    %c0_i32_0 = arith.constant 0 : i32
    %c0_i32_1 = arith.constant 0 : i32
    %c0_i32_2 = arith.constant 0 : i32
    return %c0_i32, %c0_i32_0, %c0_i32_1 : i32, i32, i32
  }
  func.func @transform_26(%arg0: i32) -> (i32, i32) {
    %c0_i32 = arith.constant 0 : i32
    %c0_i32_0 = arith.constant 0 : i32
    %c0_i32_1 = arith.constant 0 : i32
    return %c0_i32, %c0_i32_0 : i32, i32
  }
  func.func @transform_27(%arg0: i32) -> (i32, i32) {
    %c0_i32 = arith.constant 0 : i32
    %c0_i32_0 = arith.constant 0 : i32
    %c0_i32_1 = arith.constant 0 : i32
    return %c0_i32, %c0_i32_0 : i32, i32
  }
  func.func @transform_28(%arg0: i32) -> (i32, i32, i32) {
    %c0_i32 = arith.constant 0 : i32
    %c0_i32_0 = arith.constant 0 : i32
    %c0_i32_1 = arith.constant 0 : i32
    %c0_i32_2 = arith.constant 0 : i32
    return %c0_i32, %c0_i32_0, %c0_i32_1 : i32, i32, i32
  }
  func.func @transform_29(%arg0: i32) -> (i32, i32) {
    %c0_i32 = arith.constant 0 : i32
    %c0_i32_0 = arith.constant 0 : i32
    %c0_i32_1 = arith.constant 0 : i32
    return %c0_i32, %c0_i32_0 : i32, i32
  }
  func.func @transform_30(%arg0: i32) -> (i32, i32) {
    %c0_i32 = arith.constant 0 : i32
    %c0_i32_0 = arith.constant 0 : i32
    %c0_i32_1 = arith.constant 0 : i32
    return %c0_i32, %c0_i32_0 : i32, i32
  }
  func.func @transform_31(%arg0: i32) -> (i32, i32) {
    %c0_i32 = arith.constant 0 : i32
    %c0_i32_0 = arith.constant 0 : i32
    %c0_i32_1 = arith.constant 0 : i32
    return %c0_i32, %c0_i32_0 : i32, i32
  }
  func.func @transform_32(%arg0: i32) -> (i32, i32) {
    %c0_i32 = arith.constant 0 : i32
    %c0_i32_0 = arith.constant 0 : i32
    %c0_i32_1 = arith.constant 0 : i32
    return %c0_i32, %c0_i32_0 : i32, i32
  }
  func.func @transform_33(%arg0: i32) -> (i32, i32, i32) {
    %c0_i32 = arith.constant 0 : i32
    %c0_i32_0 = arith.constant 0 : i32
    %c0_i32_1 = arith.constant 0 : i32
    return %arg0, %c0_i32, %c0_i32_0 : i32, i32, i32
  }
  func.func @transform_34(%arg0: i32) -> (i32, i32, i32) {
    %c0_i32 = arith.constant 0 : i32
    %c0_i32_0 = arith.constant 0 : i32
    %c0_i32_1 = arith.constant 0 : i32
    return %arg0, %c0_i32, %c0_i32_0 : i32, i32, i32
  }
  func.func @transform_35(%arg0: i32) -> (i32, i32, i32) {
    %c0_i32 = arith.constant 0 : i32
    %c0_i32_0 = arith.constant 0 : i32
    %c0_i32_1 = arith.constant 0 : i32
    return %arg0, %c0_i32, %c0_i32_0 : i32, i32, i32
  }
}

</mosaic_0001>

<bundles_post_ra>
// kernel: forward.1
= control target key start
LH: loop header
LB: loop body
LE: loop exit
PB: predicated region body
PF: predicated region fallthrough
CT: control target
= control target key end

     0   :  { %s5401_s6 = smov 1   ;;  %s5402_s10 = smov 2   ;;  %s6347_s0 = inlined_call_operand.smem [shape: u32[36], index: -1, kind: input, shape index: {}] }
   0x1   :  { %s5450_s5 = sld [smem:[%s6347_s0]]   ;;  %s5403_s14 = smov 3  }
   0x2   :  { %s5455_s9 = sld [smem:[%s6347_s0 + %s5401_s6]]   ;;  %s5404_s18 = smov 4  }
   0x3   :  { %s5460_s13 = sld [smem:[%s6347_s0 + %s5402_s10]]   ;;  %s5405_s22 = smov 5  }
   0x4   :  { %s5465_s17 = sld [smem:[%s6347_s0 + %s5403_s14]]   ;;  %s5406_s26 = smov 6  }
   0x5   :  { %s5470_s21 = sld [smem:[%s6347_s0 + %s5404_s18]]   ;;  %s5407_s30 = smov 7  }
   0x6   :  { %s5475_s25 = sld [smem:[%s6347_s0 + %s5405_s22]]   ;;  %s5408_s4 = smov 8  }
   0x7   :  { %6388 = sst [smem:[#allocation11_spill]] %s5450_s5  ;;  %s5409_s10 = smov 9  }
   0x8   :  { %s5480_s29 = sld [smem:[%s6347_s0 + %s5406_s26]]   ;;  %s5410_s15 = smov 10  }
   0x9   :  { %s5485_s3 = sld [smem:[%s6347_s0 + %s5407_s30]]   ;;  %s5411_s20 = smov 11  }
   0xa   :  { %s5490_s8 = sld [smem:[%s6347_s0 + %s5408_s4]]   ;;  %s5412_s26 = smov 12  }
   0xb   :  { %s5495_s14 = sld [smem:[%s6347_s0 + %s5409_s10]]   ;;  %s5413_s1 = smov 13  }
   0xc   :  { %s5500_s19 = sld [smem:[%s6347_s0 + %s5410_s15]]   ;;  %s5414_s7 = smov 14  }
   0xd   :  { %s5505_s24 = sld [smem:[%s6347_s0 + %s5411_s20]]   ;;  %s5415_s15 = smov 15  }
   0xe   :  { %s5510_s30 = sld [smem:[%s6347_s0 + %s5412_s26]]   ;;  %s5416_s22 = smov 16  }
   0xf   :  { %6389 = sst [smem:[#allocation12_spill]] %s5485_s3  ;;  %s5417_s28 = smov 17  }
  0x10   :  { %6390 = sst [smem:[#allocation13_spill]] %s5490_s8 }
  0x11   :  { %s5515_s6 = sld [smem:[%s6347_s0 + %s5413_s1]]  }
  0x12   :  { %6391 = sst [smem:[#allocation14_spill]] %s5500_s19 }
  0x13   :  { %6392 = sst [smem:[#allocation15_spill]] %s5505_s24 }
  0x14   :  { %6393 = sst [smem:[#allocation16_spill]] %s5510_s30 }
  0x15   :  { %s5520_s12 = sld [smem:[%s6347_s0 + %s5414_s7]]   ;;  %s5418_s7 = smov 18  }
  0x16   :  { %s5525_s20 = sld [smem:[%s6347_s0 + %s5415_s15]]   ;;  %s5419_s15 = smov 19  }
  0x17   :  { %6394 = sst [smem:[#allocation17_spill]] %s5515_s6 }
  0x18   :  { %s5530_s27 = sld [smem:[%s6347_s0 + %s5416_s22]]   ;;  %s5420_s22 = smov 20  }
  0x19   :  { %s5535_s4 = sld [smem:[%s6347_s0 + %s5417_s28]]   ;;  %s5421_s28 = smov 21  }
  0x1a   :  { %s5555_s30 = sld [smem:[%s6347_s0 + %s5421_s28]]   ;;  %s5425_s28 = smov 25  }
  0x1b   :  { %6395 = sst [smem:[#allocation18_spill]] %s5520_s12 }
  0x1c   :  { %6396 = sst [smem:[#allocation19_spill]] %s5525_s20 }
  0x1d   :  { %s5540_s12 = sld [smem:[%s6347_s0 + %s5418_s7]]   ;;  %s5422_s7 = smov 22  }
  0x1e   :  { %6397 = sst [smem:[#allocation20_spill]] %s5530_s27 }
  0x1f   :  { %6398 = sst [smem:[#allocation21_spill]] %s5535_s4 }
  0x20   :  { %s5545_s20 = sld [smem:[%s6347_s0 + %s5419_s15]]   ;;  %s5423_s15 = smov 23  }
  0x21   :  { %s5550_s27 = sld [smem:[%s6347_s0 + %s5420_s22]]   ;;  %s5424_s22 = smov 24  }
  0x22   :  { %s5575_s24 = sld [smem:[%s6347_s0 + %s5425_s28]]   ;;  %s5429_s28 = smov 29  }
  0x23   :  { %6399 = sst [smem:[#allocation22_spill]] %s5540_s12 }
  0x24   :  { %s5560_s12 = sld [smem:[%s6347_s0 + %s5422_s7]]   ;;  %s5426_s7 = smov 26  }
  0x26   :  { %6400 = sst [smem:[#allocation23_spill]] %s5545_s20 }
  0x27   :  { %6401 = sst [smem:[#allocation24_spill]] %s5550_s27 }
  0x28   :  { %s5565_s20 = sld [smem:[%s6347_s0 + %s5423_s15]]   ;;  %s5427_s15 = smov 27  }
  0x29   :  { %s5570_s27 = sld [smem:[%s6347_s0 + %s5424_s22]]   ;;  %s5428_s22 = smov 28  }
  0x2a   :  { %6402 = sst [smem:[#allocation25_spill]] %s5560_s12 }
  0x2b   :  { %6404 = sst [smem:[#allocation27_spill]] %s5575_s24 }
  0x2c   :  { %s5580_s12 = sld [smem:[%s6347_s0 + %s5426_s7]]   ;;  %s5430_s7 = smov 30  }
  0x2d   :  { %s5590_s19 = sld [smem:[%s6347_s0 + %s5428_s22]]   ;;  %s5432_s22 = smov 32  }
  0x2e   :  { %6403 = sst [smem:[#allocation26_spill]] %s5565_s20 }
  0x2f   :  { %s5585_s20 = sld [smem:[%s6347_s0 + %s5427_s15]]   ;;  %s5431_s15 = smov 31  }
  0x30   :  { %s5595_s24 = sld [smem:[%s6347_s0 + %s5429_s28]]   ;;  %s5433_s28 = smov 33  }
  0x31   :  { %s5605_s8 = sld [smem:[%s6347_s0 + %s5431_s15]]   ;;  %s5435_s15 = smov 35  }
  0x32   :  { %6405 = sst [smem:[#allocation28_spill]] %s5580_s12 }
  0x33   :  { %6406 = sst [smem:[#allocation29_spill]] %s5590_s19 }
  0x34   :  { %s5600_s12 = sld [smem:[%s6347_s0 + %s5430_s7]]   ;;  %s5434_s7 = smov 34  }
  0x35   :  { %s5610_s19 = sld [smem:[%s6347_s0 + %s5432_s22]]  }
  0x36   :  { %6407 = sst [smem:[#allocation30_spill]] %s5595_s24 }
  0x37   :  { %6408 = sst [smem:[#allocation31_spill]] %s5605_s8 }
  0x38   :  { %s5615_s24 = sld [smem:[%s6347_s0 + %s5433_s28]]  }
  0x39   :  { %s5620_s3 = sld [smem:[%s6347_s0 + %s5434_s7]]  }
  0x3a   :  { %s5625_s8 = sld [smem:[%s6347_s0 + %s5435_s15]]  }
  0x3f   :  { %6409 = sst [smem:[#allocation32_spill]] %s5620_s3 }
  0x40   :  { %77 = vsyncpa [#allocation3], 0 }
  0x41   :  { %78 = vsyncpa [#allocation4], 0 }
  0x42   :  { %80 = vsyncpa [#allocation4 + $0x1], 0 }
  0x43   :  { %81 = vsyncpa [#allocation7], 0 }
  0x44   :  { %83 = vsyncpa [#allocation7 + $0x1], 0  ;;  %s5627_s22 = smov 0   ;;  %s5629_s23 = smov 0  }
  0x45   :  { %s5631_s26 = smov 0   ;;  %s5633_s28 = smov 0  }
  0x46 LB: > { %s6410_s6 = sld [smem:[#allocation17_spill]]  ;;  %s5648_s0 = sadd.s32 4294967295, %s5399_s28   ;;  %s5387_s22 = sphi %s5627_s22, %s6457_s22   ;;  %s5399_s28 = sphi %s5633_s28, %s6454_s28   ;;  %s5395_s26 = sphi %s5631_s26, %s6456_s26   ;;  %s5391_s23 = sphi %s5629_s23, %s6458_s23  }
  0x47   : > { %6411 = sst [smem:[#allocation33_spill]] %s5387_s22  ;;  %s4630_s1 = sadd.s32 4294967294, %s5399_s28  }
  0x48   : > { %6412 = sst [smem:[#allocation34_spill]] %s5395_s26  ;;  %s5652_s2 = sadd.s32 1, %s5399_s28  }
  0x49   : > { %6413 = sst [smem:[#allocation35_spill]] %s5652_s2  ;;  %s794_s7 = sadd.s32 1, %s5395_s26 }
  0x4a   : > { %s791_s10 = ssub.s32 %s5399_s28, %s5652_s2  ;;  %p804_p0 = scmp.ne.s32.totalorder %s5395_s26, %s5391_s23 }
  0x4b   : > { %p792_p1 = scmp.eq.s32.totalorder %s791_s10, 0  ;;  %p805_p2 = scmp.eq.s32.totalorder %s5648_s0, 1 }
  0x4c   : > { %p810_p3 = scmp.ne.s32.totalorder %s5391_s23, %s5387_s22  ;;  %p811_p4 = scmp.eq.s32.totalorder %s4630_s1, 1 }
  0x4d   : > { %s5663_s11 = scalar_select %p792_p1, %s5395_s26, %s794_s7  }
  0x4e   : > { %p5665_p5 = por %p805_p2, %p804_p0  ;;  %p5669_p6 = por %p811_p4, %p810_p3 }
  0x4f   : > { %6414 = sst [smem:[#allocation36_spill]] %s5663_s11  ;;  %p4631_p7 = scmp.ge.s32.totalorder %s5399_s28, 1 }
  0x50   : > { %s6416_s16 = scalar_select %p5669_p6, 1, 0 }
  0x51   : > { %p870_p8 = scmp.lt.s32.totalorder %s5399_s28, 3  ;;  %p5176_p9 = scmp.eq.s32.totalorder %s5648_s0, 0 }
  0x52   : > { %6417 = sst [smem:[#allocation37_spill]] %s6416_s16  ;;  %s887_s1 = sshll.u32 %s5465_s17, 4  ;;  %s888_s1 = int_to_ptr.hbm [resolvable:$true] %s887_s1 }
  0x53   : > { %p5676_p10 = pnand %p4631_p7, %p870_p8  ;;  %s5436_s7 = smov [#allocation2]  }
  0x54   : > { %s889_s10 = sshll.u32 %s5436_s7, 4  ;;  %s5271_s26 = sshra.s32 %s888_s1, 4  ;;  %s890_s10 = int_to_ptr.vmem [resolvable:$true] %s889_s10  ;;  %s5272_s26 = int_to_ptr.hbm [resolvable:$true] %s5271_s26 }
  0x55   : > { %p5165_p11 = pneg %p5676_p10  ;;  %s5273_s2 = scalar_lea.hbm %s5272_s26, 1024 }
  0x56   : > { %p5274_p13 = scmp.ne.s32.totalorder %s5272_s26, %s5273_s2  ;;  %s5278_s16 = scalar_lea.hbm %s5465_s17, 1024 }
  0x57   : > { %p5685_p12 = pnand %p5176_p9, %p5165_p11  ;;  %p5279_p3 = scmp.lt.s32.totalorder %s5272_s26, %s5465_s17 }
  0x58   : > { %p5280_p4 = scmp.lt.s32.totalorder %s5278_s16, %s5273_s2 }
  0x59   : > { %p5275_p0 = pneg %p5685_p12 }
  0x5a   : > { %p5281_p7 = por %p5280_p4, %p5279_p3 }
  0x5b   : > { %p5276_p1 = pnand %p5275_p0, %p5274_p13 }
  0x5d   : > { %p5277_p2 = pneg %p5276_p1 }
  0x5f   : > { %p5282_p8 = pnand %p5281_p7, %p5277_p2 }
  0x61   : > { %5285 = shalt.err (!%p5282_p8)
}
  0x62   : > { %s5437_s7 = smov 128   ;;  %s5438_s22 = smov 8  }
  0x63   : > { %5168 = dma.hbm_to_vmem [thread:$0]  (!%p5685_p12), %s888_s1, 16384, %s890_s10, [#allocation3], %s5437_s7, %s5437_s7, %s5438_s22  }
  0x64   : > { %1000 = sbr.rel (%p5676_p10) target bundleno = 3598 (0xe0e), region = 152 }
  0x69   : > { %5374 = dma.done.wait (%p5176_p9), [#allocation3], 16384  }
  0x6a   : > { %5376 = vsyncadd (%p5176_p9), [#allocation3], 4294950912  ;;  %s6420_s5 = sld [smem:[#allocation11_spill]]  ;;  %p1098_p11 = scmp.lt.s32.totalorder %s5648_s0, 1  ;;  %v5439_v0 = vmov 0   ;;  %v1117_v1 = vld [vmem:[%s5460_s13 + $0x10] sm:$0xff] }
  0x6b   : > { %5253 = vset.pattern.permute.xlu1 %v5439_v0  ;;  %5252 = vset.pattern.permute.xlu0 %v5439_v0  ;;  %v1115_v2 = vld [vmem:[%s5460_s13] sm:$0xff]  ;;  %vm1139_vm0 = vcmask 261120   ;;  %v1118_v8 = vld [vmem:[%s5460_s13 + $0x18] sm:$0xff]  ;;  %v1116_v9 = vld [vmem:[%s5460_s13 + $0x8] sm:$0xff]  ;;  %s5738_s11 = sand.u32 1, %s5391_s23   ;;  %s6421_s4 = sld [smem:[#allocation21_spill]] }
  0x6c   : > { %s5703_s22 = scalar_select %p1098_p11, %s5648_s0, 1  ;;  %5254 = vset.pattern.permute.xlu2 %v5439_v0  ;;  %1131 = vperm.xlu1 %5253, %v1117_v1   ;;  %v1111_v7 = vld [vmem:[%s5455_s9] sm:$0xff]  ;;  %v1112_v10 = vld [vmem:[%s5455_s9 + $0x8] sm:$0xff]  ;;  %v1567_v11 = vld [vmem:[%s5475_s25 + $0x18] sm:$0xff]  ;;  %vm1671_vm1 = vcmask 1046528   ;;  %vm1658_vm2 = vcmask 515072  }
  0x6d   : > { %1121 = vperm.xlu0 %5252, %v1115_v2   ;;  %v1566_v12 = vld [vmem:[%s5475_s25 + $0x10] sm:$0xff]  ;;  %v2164_v15 = vld [vmem:[%s5495_s14 + $0x8] sm:$0xff]  ;;  %v1114_v16 = vld [vmem:[%s5455_s9 + $0x18] sm:$0xff]  ;;  %s6370_s16 = sshll.u32 %s5738_s11, 5  ;;  %s6422_s1 = sld [smem:[#allocation12_spill]]  ;;  %vm1847_vm3 = vcmask 523264  }
  0x6e   : > { %s5122_s26 = sshll.u32 %s5703_s22, 5  ;;  %v1113_v13 = vld [vmem:[%s5455_s9 + $0x10] sm:$0xff]  ;;  %v2652_v17 = vld [vmem:[%s6410_s6 + $0x8] sm:$0xff]  ;;  %v2651_v18 = vld [vmem:[%s6410_s6] sm:$0xff]  ;;  %s5743_s18 = scalar_lea.vmem [#allocation5], %s6370_s16  ;;  %vm2265_vm4 = vcmask 1044480  }
  0x6f   : > { %v2165_v14 = vld [vmem:[%s5495_s14 + $0x10] sm:$0xff]  ;;  %v3213_v19 = vld [vmem:[%s5555_s30 + $0x8] sm:$0xff]  ;;  %v3212_v20 = vld [vmem:[%s5555_s30] sm:$0xff]  ;;  %s6423_s10 = sld [smem:[#allocation13_spill]]  ;;  %vm2252_vm5 = vcmask 171008   ;;  %vm2434_vm6 = vcmask 1045504  }
  0x70   : > { %s1102_s2 = scalar_lea.vmem %s6420_s5, %s5122_s26  ;;  %v3442_v21 = vld [vmem:[%s5570_s27 + $0x10] sm:$0xff]  ;;  %v3441_v22 = vld [vmem:[%s5570_s27 + $0x8] sm:$0xff]  ;;  %v1204_v23 = vld [vmem:[#allocation2 + $0x78] sm:$0xff]  ;;  %s6424_s7 = sld [smem:[#allocation14_spill]]  ;;  %vm2421_vm7 = vcmask 179200   ;;  %vm2726_vm8 = vcmask 1041408  }
  0x71   : > { %v1110_v3 = vld [vmem:[%s1102_s2 + $0x18] sm:$0xff]  ;;  %v1109_v4 = vld [vmem:[%s1102_s2 + $0x10] sm:$0xff]  ;;  %v1108_v5 = vld [vmem:[%s1102_s2 + $0x8] sm:$0xff]  ;;  %1205 = vmatpush.msra.mxu1 %v1204_v23  ;;  %s6425_s26 = sld [smem:[#allocation15_spill]]  ;;  %vm2719_vm9 = vcmask 80896   ;;  %vm2855_vm10 = vcmask 1042432  }
  0x72   : > { %1164 = vmatpush.msra.mxu0 %v1110_v3  ;;  %v1107_v6 = vld [vmem:[%s1102_s2] sm:$0xff]  ;;  %v1250_v24 = vld [vmem:[#allocation2 + $0xf8] sm:$0xff]  ;;  %v1203_v27 = vld [vmem:[#allocation2 + $0x70] sm:$0xff]  ;;  %vm2848_vm11 = vcmask 89088   ;;  %vm3001_vm12 = vcmask 39936   ;;  %s6435_s3 = sld [smem:[#allocation32_spill]] }
  0x73   : > { %v1296_v25 = vld [vmem:[#allocation2 + $0x178] sm:$0xff]  ;;  %1251 = vmatpush.msra.mxu2 %v1250_v24  ;;  %v1249_v28 = vld [vmem:[#allocation2 + $0xf0] sm:$0xff]  ;;  %1206 = vmatpush.msra.mxu1 %v1203_v27  ;;  %v3818_v31 = vld [vmem:[%s5585_s20 + $0x8] sm:$0xff]  ;;  %vm3106_vm13 = vcmask 48128   ;;  %s6437_s5 = sld [smem:[#allocation25_spill]]  ;;  %vm3264_vm14 = vcmask 1043456  }
  0x74   : > { %1165 = vmatpush.msra.mxu0 %v1109_v4  ;;  %1136 = vperm.xlu1 %5253, %v1118_v8   ;;  %v1342_v26 = vld [vmem:[#allocation2 + $0x1f8] sm:$0xff]  ;;  %v1295_v29 = vld [vmem:[#allocation2 + $0x170] sm:$0xff]  ;;  %v3817_v32 = vld [vmem:[%s5585_s20] sm:$0xff]  ;;  %vm3257_vm15 = vcmask 97280  }
  0x75   : > { %1126 = vperm.xlu0 %5252, %v1116_v9   ;;  %1297 = vmatpush.msra.mxu3 %v1296_v25  ;;  %v1341_v30 = vld [vmem:[#allocation2 + $0x1f0] sm:$0xff]  ;;  %v4263_v33 = vld [vmem:[%s5600_s12 + $0x18] sm:$0xff]  ;;  %v4260_v35 = vld [vmem:[%s5600_s12] sm:$0xff] }
  0x76   : > { %1166 = vmatpush.msra.mxu0 %v1108_v5  ;;  %1252 = vmatpush.msra.mxu2 %v1249_v28  ;;  %v3820_v34 = vld [vmem:[%s5585_s20 + $0x18] sm:$0xff]  ;;  %v4261_v36 = vld [vmem:[%s5600_s12 + $0x8] sm:$0xff]  ;;  %v4352_v37 = vld [vmem:[%s5610_s19 + $0x10] sm:$0xff] }
  0x77   : > { %1298 = vmatpush.msra.mxu3 %v1295_v29  ;;  %v4351_v38 = vld [vmem:[%s5610_s19 + $0x8] sm:$0xff]  ;;  %v1201_v43 = vld [vmem:[#allocation2 + $0x60] sm:$0xff]  ;;  %v1200_v47 = vld [vmem:[#allocation2 + $0x58] sm:$0xff]  ;;  %s6426_s2 = smov %s6425_s26 }
  0x78   : > { %1167 = vmatpush.msra.mxu0 %v1107_v6  ;;  %v1202_v39 = vld [vmem:[#allocation2 + $0x68] sm:$0xff]  ;;  %v1247_v44 = vld [vmem:[#allocation2 + $0xe0] sm:$0xff]  ;;  %v1246_v48 = vld [vmem:[#allocation2 + $0xd8] sm:$0xff] }
  0x79   : > { %4641 = vmatmul.msk.f32.vlgmr.msra.gmra.mxu0 %vm1139_vm0, %v1111_v7  ;;  %v1248_v40 = vld [vmem:[#allocation2 + $0xe8] sm:$0xff]  ;;  %1207 = vmatpush.msra.mxu1 %v1202_v39  ;;  %v1293_v45 = vld [vmem:[#allocation2 + $0x160] sm:$0xff]  ;;  %v1292_v49 = vld [vmem:[#allocation2 + $0x158] sm:$0xff] }
  0x7a   : > { %1343 = vmatpush.msrb.mxu0 %v1342_v26  ;;  %v1294_v41 = vld [vmem:[#allocation2 + $0x168] sm:$0xff]  ;;  %1253 = vmatpush.msra.mxu2 %v1248_v40  ;;  %v1339_v46 = vld [vmem:[#allocation2 + $0x1e0] sm:$0xff]  ;;  %v1338_v50 = vld [vmem:[#allocation2 + $0x1d8] sm:$0xff] }
  0x7b   : > { %v1340_v42 = vld [vmem:[#allocation2 + $0x1e8] sm:$0xff]  ;;  %1299 = vmatpush.msra.mxu3 %v1294_v41  ;;  %1208 = vmatpush.msra.mxu1 %v1201_v43  ;;  %v1199_v51 = vld [vmem:[#allocation2 + $0x50] sm:$0xff]  ;;  %v1197_v59 = vld [vmem:[#allocation2 + $0x40] sm:$0xff] }
  0x7c   : > { %1585 = vperm.xlu1 %5253, %v1567_v11   ;;  %1344 = vmatpush.msrb.mxu0 %v1341_v30  ;;  %v1245_v52 = vld [vmem:[#allocation2 + $0xd0] sm:$0xff]  ;;  %v1198_v55 = vld [vmem:[#allocation2 + $0x48] sm:$0xff]  ;;  %v1243_v60 = vld [vmem:[#allocation2 + $0xc0] sm:$0xff] }
  0x7d   : > { %1580 = vperm.xlu0 %5252, %v1566_v12   ;;  %1254 = vmatpush.msra.mxu2 %v1247_v44  ;;  %v1291_v53 = vld [vmem:[#allocation2 + $0x150] sm:$0xff]  ;;  %v1244_v56 = vld [vmem:[#allocation2 + $0xc8] sm:$0xff]  ;;  %v1289_v61 = vld [vmem:[#allocation2 + $0x140] sm:$0xff] }
  0x7e   : > { %1345 = vmatpush.msrb.mxu0 %v1340_v42  ;;  %1300 = vmatpush.msra.mxu3 %v1293_v45  ;;  %v1337_v54 = vld [vmem:[#allocation2 + $0x1d0] sm:$0xff]  ;;  %v1290_v57 = vld [vmem:[#allocation2 + $0x148] sm:$0xff]  ;;  %v1335_v62 = vld [vmem:[#allocation2 + $0x1c0] sm:$0xff] }
  0x7f   : > { %1209 = vmatpush.msra.mxu1 %v1200_v47  ;;  %1255 = vmatpush.msra.mxu2 %v1246_v48  ;;  %v1336_v58 = vld [vmem:[#allocation2 + $0x1c8] sm:$0xff]  ;;  %v1196_v63 = vld [vmem:[#allocation2 + $0x38] sm:$0xff]  ;;  %v1195_v3 = vld [vmem:[#allocation2 + $0x30] sm:$0xff] }
  0x80   : > { %1346 = vmatpush.msrb.mxu0 %v1339_v46  ;;  %1301 = vmatpush.msra.mxu3 %v1292_v49  ;;  %v1242_v0 = vld [vmem:[#allocation2 + $0xb8] sm:$0xff]  ;;  %v1241_v4 = vld [vmem:[#allocation2 + $0xb0] sm:$0xff]  ;;  %v1194_v7 = vld [vmem:[#allocation2 + $0x28] sm:$0xff] }
  0x81   : > { %4642 = vmatmul.msk.f32.gmra.mxu0 %vm1139_vm0, %v1112_v10  ;;  %1210 = vmatpush.msra.mxu1 %v1199_v51  ;;  %v1288_v1 = vld [vmem:[#allocation2 + $0x138] sm:$0xff]  ;;  %v1287_v5 = vld [vmem:[#allocation2 + $0x130] sm:$0xff]  ;;  %v1240_v8 = vld [vmem:[#allocation2 + $0xa8] sm:$0xff] }
  0x82   : > { %1347 = vmatpush.msrb.mxu0 %v1338_v50  ;;  %1256 = vmatpush.msra.mxu2 %v1245_v52  ;;  %v1334_v2 = vld [vmem:[#allocation2 + $0x1b8] sm:$0xff]  ;;  %v1333_v6 = vld [vmem:[#allocation2 + $0x1b0] sm:$0xff]  ;;  %v1286_v9 = vld [vmem:[#allocation2 + $0x128] sm:$0xff] }
  0x83   : > { %1302 = vmatpush.msra.mxu3 %v1291_v53  ;;  %1211 = vmatpush.msra.mxu1 %v1198_v55  ;;  %v1332_v10 = vld [vmem:[#allocation2 + $0x1a8] sm:$0xff]  ;;  %v1193_v11 = vld [vmem:[#allocation2 + $0x20] sm:$0xff]  ;;  %v1384_v47 = vld [vmem:[#allocation2 + $0x258] sm:$0xff] }
  0x84   : > { %2179 = vperm.xlu1 %5253, %v2165_v14   ;;  %1348 = vmatpush.msrb.mxu0 %v1337_v54  ;;  %v1239_v12 = vld [vmem:[#allocation2 + $0xa0] sm:$0xff]  ;;  %v1190_v23 = vld [vmem:[#allocation2 + $0x8] sm:$0xff]  ;;  %v1430_v48 = vld [vmem:[#allocation2 + $0x2d8] sm:$0xff] }
  0x85   : > { %2174 = vperm.xlu0 %5252, %v2164_v15   ;;  %1257 = vmatpush.msra.mxu2 %v1244_v56  ;;  %v1331_v14 = vld [vmem:[#allocation2 + $0x1a0] sm:$0xff]  ;;  %v1192_v15 = vld [vmem:[#allocation2 + $0x18] sm:$0xff]  ;;  %v1236_v24 = vld [vmem:[#allocation2 + $0x88] sm:$0xff] }
  0x86   : > { %1303 = vmatpush.msra.mxu3 %v1290_v57  ;;  %1349 = vmatpush.msrb.mxu0 %v1336_v58  ;;  %v1282_v25 = vld [vmem:[#allocation2 + $0x108] sm:$0xff]  ;;  %v1189_v27 = vld [vmem:[#allocation2] sm:$0xff]  ;;  %v1476_v49 = vld [vmem:[#allocation2 + $0x358] sm:$0xff] }
  0x87   : > { %1212 = vmatpush.msra.mxu1 %v1197_v59  ;;  %1258 = vmatpush.msra.mxu2 %v1243_v60  ;;  %v1328_v26 = vld [vmem:[#allocation2 + $0x188] sm:$0xff]  ;;  %v1235_v28 = vld [vmem:[#allocation2 + $0x80] sm:$0xff]  ;;  %v1522_v50 = vld [vmem:[#allocation2 + $0x3d8] sm:$0xff] }
  0x88   : > { %1304 = vmatpush.msra.mxu3 %v1289_v61  ;;  %1350 = vmatpush.msrb.mxu0 %v1335_v62  ;;  %v1281_v29 = vld [vmem:[#allocation2 + $0x100] sm:$0xff]  ;;  %v1386_v39 = vld [vmem:[#allocation2 + $0x268] sm:$0xff]  ;;  %v1383_v51 = vld [vmem:[#allocation2 + $0x250] sm:$0xff] }
  0x89   : > { %4643 = vmatmul.msk.f32.gmra.mxu0 %vm1139_vm0, %v1113_v13  ;;  %1213 = vmatpush.msra.mxu1 %v1196_v63  ;;  %v1285_v13 = vld [vmem:[#allocation2 + $0x120] sm:$0xff]  ;;  %v1432_v40 = vld [vmem:[#allocation2 + $0x2e8] sm:$0xff]  ;;  %v1429_v52 = vld [vmem:[#allocation2 + $0x2d0] sm:$0xff] }
  0x8a   : > { %1259 = vmatpush.msra.mxu2 %v1242_v0  ;;  %1305 = vmatpush.msra.mxu3 %v1288_v1  ;;  %v1327_v30 = vld [vmem:[#allocation2 + $0x180] sm:$0xff]  ;;  %v1478_v41 = vld [vmem:[#allocation2 + $0x368] sm:$0xff]  ;;  %v1475_v53 = vld [vmem:[#allocation2 + $0x350] sm:$0xff] }
  0x8b   : > { %1351 = vmatpush.msrb.mxu0 %v1334_v2  ;;  %1214 = vmatpush.msra.mxu1 %v1195_v3  ;;  %v1524_v42 = vld [vmem:[#allocation2 + $0x3e8] sm:$0xff]  ;;  %v1385_v43 = vld [vmem:[#allocation2 + $0x260] sm:$0xff]  ;;  %v1521_v54 = vld [vmem:[#allocation2 + $0x3d0] sm:$0xff] }
  0x8c   : > { %2660 = vperm.xlu1 %5253, %v2652_v17   ;;  %1260 = vmatpush.msra.mxu2 %v1241_v4  ;;  %v1284_v17 = vld [vmem:[#allocation2 + $0x118] sm:$0xff]  ;;  %v1431_v44 = vld [vmem:[#allocation2 + $0x2e0] sm:$0xff]  ;;  %v1382_v55 = vld [vmem:[#allocation2 + $0x248] sm:$0xff] }
  0x8d   : > { %2655 = vperm.xlu0 %5252, %v2651_v18   ;;  %1306 = vmatpush.msra.mxu3 %v1287_v5  ;;  %v1330_v18 = vld [vmem:[#allocation2 + $0x198] sm:$0xff]  ;;  %v1477_v45 = vld [vmem:[#allocation2 + $0x360] sm:$0xff]  ;;  %v1428_v56 = vld [vmem:[#allocation2 + $0x2c8] sm:$0xff] }
  0x8e   : > { %1352 = vmatpush.msrb.mxu0 %v1333_v6  ;;  %1215 = vmatpush.msra.mxu1 %v1194_v7  ;;  %v1523_v46 = vld [vmem:[#allocation2 + $0x3e0] sm:$0xff]  ;;  %v1474_v57 = vld [vmem:[#allocation2 + $0x348] sm:$0xff]  ;;  %v1380_v63 = vld [vmem:[#allocation2 + $0x238] sm:$0xff] }
  0x8f   : > { %1261 = vmatpush.msra.mxu2 %v1240_v8  ;;  %1307 = vmatpush.msra.mxu3 %v1286_v9  ;;  %v1520_v58 = vld [vmem:[#allocation2 + $0x3c8] sm:$0xff]  ;;  %v1381_v59 = vld [vmem:[#allocation2 + $0x240] sm:$0xff]  ;;  %v1426_v0 = vld [vmem:[#allocation2 + $0x2b8] sm:$0xff] }
  0x90   : > { %1353 = vmatpush.msrb.mxu0 %v1332_v10  ;;  %1216 = vmatpush.msra.mxu1 %v1193_v11  ;;  %v1427_v60 = vld [vmem:[#allocation2 + $0x2c0] sm:$0xff]  ;;  %v1472_v1 = vld [vmem:[#allocation2 + $0x338] sm:$0xff]  ;;  %v1379_v3 = vld [vmem:[#allocation2 + $0x230] sm:$0xff] }
  0x91   : > { %4644 = vmatmul.msk.f32.gmra.mxu0 %vm1139_vm0, %v1114_v16  ;;  %1262 = vmatpush.msra.mxu2 %v1239_v12  ;;  %v1238_v16 = vld [vmem:[#allocation2 + $0x98] sm:$0xff]  ;;  %v1473_v61 = vld [vmem:[#allocation2 + $0x340] sm:$0xff]  ;;  %v1425_v4 = vld [vmem:[#allocation2 + $0x2b0] sm:$0xff] }
  0x92   : > { %1308 = vmatpush.msra.mxu3 %v1285_v13  ;;  %1354 = vmatpush.msrb.mxu0 %v1331_v14  ;;  %v1519_v62 = vld [vmem:[#allocation2 + $0x3c0] sm:$0xff]  ;;  %v1518_v2 = vld [vmem:[#allocation2 + $0x3b8] sm:$0xff]  ;;  %v1471_v5 = vld [vmem:[#allocation2 + $0x330] sm:$0xff] }
  0x93   : > { %1217 = vmatpush.msra.mxu1 %v1192_v15  ;;  %1263 = vmatpush.msra.mxu2 %v1238_v16  ;;  %v1517_v6 = vld [vmem:[#allocation2 + $0x3b0] sm:$0xff]  ;;  %v1378_v8 = vld [vmem:[#allocation2 + $0x228] sm:$0xff]  ;;  %v1377_v12 = vld [vmem:[#allocation2 + $0x220] sm:$0xff] }
  0x94   : > { %3221 = vperm.xlu1 %5253, %v3213_v19   ;;  %v1191_v19 = vld [vmem:[#allocation2 + $0x10] sm:$0xff]  ;;  %1309 = vmatpush.msra.mxu3 %v1284_v17  ;;  %v1424_v9 = vld [vmem:[#allocation2 + $0x2a8] sm:$0xff]  ;;  %v1423_v13 = vld [vmem:[#allocation2 + $0x2a0] sm:$0xff] }
  0x95   : > { %3216 = vperm.xlu0 %5252, %v3212_v20   ;;  %v1237_v20 = vld [vmem:[#allocation2 + $0x90] sm:$0xff]  ;;  %1355 = vmatpush.msrb.mxu0 %v1330_v18  ;;  %v1470_v10 = vld [vmem:[#allocation2 + $0x328] sm:$0xff]  ;;  %v1469_v15 = vld [vmem:[#allocation2 + $0x320] sm:$0xff] }
  0x96   : > { %1218 = vmatpush.msra.mxu1 %v1191_v19  ;;  %1264 = vmatpush.msra.mxu2 %v1237_v20  ;;  %v1516_v11 = vld [vmem:[#allocation2 + $0x3a8] sm:$0xff]  ;;  %v1515_v16 = vld [vmem:[#allocation2 + $0x3a0] sm:$0xff]  ;;  %v1376_v18 = vld [vmem:[#allocation2 + $0x218] sm:$0xff] }
  0x97   : > { %v1422_v19 = vld [vmem:[#allocation2 + $0x298] sm:$0xff] }
  0x98   : > { %1219 = vmatpush.msra.mxu1 %v1190_v23  ;;  %1265 = vmatpush.msra.mxu2 %v1236_v24  ;;  %v1468_v20 = vld [vmem:[#allocation2 + $0x318] sm:$0xff]  ;;  %v1421_v23 = vld [vmem:[#allocation2 + $0x290] sm:$0xff] }
  0x99   : > { %v1467_v24 = vld [vmem:[#allocation2 + $0x310] sm:$0xff] }
  0x9a   : > { %1220 = vmatpush.msra.mxu1 %v1189_v27  ;;  %1266 = vmatpush.msra.mxu2 %v1235_v28  ;;  %v1420_v27 = vld [vmem:[#allocation2 + $0x288] sm:$0xff] }
  0x9b   : > { %v1466_v28 = vld [vmem:[#allocation2 + $0x308] sm:$0xff] }
  0x9c   : > { %3456 = vperm.xlu1 %5253, %v3442_v21   ;;  %v1283_v21 = vld [vmem:[#allocation2 + $0x110] sm:$0xff] }
  0x9d   : > { %3451 = vperm.xlu0 %5252, %v3441_v22   ;;  %v1329_v22 = vld [vmem:[#allocation2 + $0x190] sm:$0xff]  ;;  %1310 = vmatpush.msra.mxu3 %v1283_v21  ;;  %v1514_v21 = vld [vmem:[#allocation2 + $0x398] sm:$0xff] }
  0x9e   : > { %1356 = vmatpush.msrb.mxu0 %v1329_v22  ;;  %v1375_v22 = vld [vmem:[#allocation2 + $0x210] sm:$0xff] }
  0x9f   : > { %1311 = vmatpush.msra.mxu3 %v1282_v25  ;;  %v1513_v25 = vld [vmem:[#allocation2 + $0x390] sm:$0xff] }
  0xa0   : > { %1357 = vmatpush.msrb.mxu0 %v1328_v26  ;;  %v1374_v26 = vld [vmem:[#allocation2 + $0x208] sm:$0xff] }
  0xa1   : > { %1312 = vmatpush.msra.mxu3 %v1281_v29  ;;  %v1512_v29 = vld [vmem:[#allocation2 + $0x388] sm:$0xff] }
  0xa2   : > { %1358 = vmatpush.msrb.mxu0 %v1327_v30 }
  0xa4   : > { %3828 = vperm.xlu1 %5253, %v3818_v31   ;;  %v1388_v31 = vld [vmem:[#allocation2 + $0x278] sm:$0xff] }
  0xa5   : > { %3823 = vperm.xlu0 %5252, %v3817_v32   ;;  %v1434_v32 = vld [vmem:[#allocation2 + $0x2f8] sm:$0xff]  ;;  %1389 = vmatpush.msrb.mxu1 %v1388_v31 }
  0xa6   : > { %1435 = vmatpush.msrb.mxu2 %v1434_v32 }
  0xac   : > { %4281 = vperm.xlu1 %5253, %v4263_v33   ;;  %v1480_v33 = vld [vmem:[#allocation2 + $0x378] sm:$0xff] }
  0xad   : > { %3838 = vperm.xlu0 %5252, %v3820_v34   ;;  %v1526_v34 = vld [vmem:[#allocation2 + $0x3f8] sm:$0xff]  ;;  %1481 = vmatpush.msrb.mxu3 %v1480_v33 }
  0xae   : > { %1527 = vmatpush.msra.mxu0 %v1526_v34  ;;  %v1373_v34 = vld [vmem:[#allocation2 + $0x200] sm:$0xff] }
  0xb4   : > { %4266 = vperm.xlu1 %5253, %v4260_v35   ;;  %v1387_v35 = vld [vmem:[#allocation2 + $0x270] sm:$0xff] }
  0xb5   : > { %4271 = vperm.xlu0 %5252, %v4261_v36   ;;  %v1433_v36 = vld [vmem:[#allocation2 + $0x2f0] sm:$0xff]  ;;  %1390 = vmatpush.msrb.mxu1 %v1387_v35  ;;  %v1419_v35 = vld [vmem:[#allocation2 + $0x280] sm:$0xff] }
  0xb6   : > { %1436 = vmatpush.msrb.mxu2 %v1433_v36  ;;  %v1465_v36 = vld [vmem:[#allocation2 + $0x300] sm:$0xff] }
  0xb7   : > { %1391 = vmatpush.msrb.mxu1 %v1386_v39 }
  0xb8   : > { %1437 = vmatpush.msrb.mxu2 %v1432_v40 }
  0xb9   : > { %1392 = vmatpush.msrb.mxu1 %v1385_v43 }
  0xba   : > { %1438 = vmatpush.msrb.mxu2 %v1431_v44 }
  0xbb   : > { %1393 = vmatpush.msrb.mxu1 %v1384_v47 }
  0xbc   : > { %4366 = vperm.xlu1 %5253, %v4352_v37   ;;  %v1479_v37 = vld [vmem:[#allocation2 + $0x370] sm:$0xff]  ;;  %1439 = vmatpush.msrb.mxu2 %v1430_v48 }
  0xbd   : > { %4361 = vperm.xlu0 %5252, %v4351_v38   ;;  %v1525_v38 = vld [vmem:[#allocation2 + $0x3f0] sm:$0xff]  ;;  %1482 = vmatpush.msrb.mxu3 %v1479_v37  ;;  %v1511_v37 = vld [vmem:[#allocation2 + $0x380] sm:$0xff] }
  0xbe   : > { %1528 = vmatpush.msra.mxu0 %v1525_v38  ;;  %1394 = vmatpush.msrb.mxu1 %v1383_v51  ;;  %v1564_v51 = vld [vmem:[%s5475_s25] sm:$0xff] }
  0xbf   : > { %1483 = vmatpush.msrb.mxu3 %v1478_v41  ;;  %1440 = vmatpush.msrb.mxu2 %v1429_v52 }
  0xc0   : > { %1529 = vmatpush.msra.mxu0 %v1524_v42  ;;  %1395 = vmatpush.msrb.mxu1 %v1382_v55 }
  0xc1   : > { %1484 = vmatpush.msrb.mxu3 %v1477_v45  ;;  %1441 = vmatpush.msrb.mxu2 %v1428_v56  ;;  %v1565_v56 = vld [vmem:[%s5475_s25 + $0x8] sm:$0xff] }
  0xc2   : > { %1530 = vmatpush.msra.mxu0 %v1523_v46  ;;  %1396 = vmatpush.msrb.mxu1 %v1381_v59 }
  0xc3   : > { %1485 = vmatpush.msrb.mxu3 %v1476_v49  ;;  %1442 = vmatpush.msrb.mxu2 %v1427_v60 }
  0xc4   : > { %1531 = vmatpush.msra.mxu0 %v1522_v50  ;;  %1397 = vmatpush.msrb.mxu1 %v1380_v63 }
  0xc5   : > { %1486 = vmatpush.msrb.mxu3 %v1475_v53  ;;  %1443 = vmatpush.msrb.mxu2 %v1426_v0 }
  0xc6   : > { %1532 = vmatpush.msra.mxu0 %v1521_v54  ;;  %1398 = vmatpush.msrb.mxu1 %v1379_v3 }
  0xc7   : > { %1487 = vmatpush.msrb.mxu3 %v1474_v57  ;;  %1444 = vmatpush.msrb.mxu2 %v1425_v4  ;;  %v2970_v4 = vld [vmem:[%s6421_s4] sm:$0xff] }
  0xc8   : > { %1533 = vmatpush.msra.mxu0 %v1520_v58  ;;  %1399 = vmatpush.msrb.mxu1 %v1378_v8 }
  0xc9   : > { %1488 = vmatpush.msrb.mxu3 %v1473_v61  ;;  %1445 = vmatpush.msrb.mxu2 %v1424_v9  ;;  %v2163_v61 = vld [vmem:[%s5495_s14] sm:$0xff] }
  0xca   : > { %1534 = vmatpush.msra.mxu0 %v1519_v62  ;;  %1400 = vmatpush.msrb.mxu1 %v1377_v12  ;;  %v3440_v9 = vld [vmem:[%s5570_s27] sm:$0xff] }
  0xcb   : > { %1489 = vmatpush.msrb.mxu3 %v1472_v1  ;;  %1446 = vmatpush.msrb.mxu2 %v1423_v13  ;;  %v1560_v13 = vld [vmem:[%s5470_s21 + $0x20] sm:$0xff] }
  0xcc   : > { %1535 = vmatpush.msra.mxu0 %v1518_v2  ;;  %1401 = vmatpush.msrb.mxu1 %v1376_v18  ;;  %v2166_v2 = vld [vmem:[%s5495_s14 + $0x18] sm:$0xff] }
  0xcd   : > { %1490 = vmatpush.msrb.mxu3 %v1471_v5  ;;  %1447 = vmatpush.msrb.mxu2 %v1422_v19  ;;  %v1562_v19 = vld [vmem:[%s5470_s21 + $0x30] sm:$0xff] }
  0xce   : > { %1536 = vmatpush.msra.mxu0 %v1517_v6  ;;  %1402 = vmatpush.msrb.mxu1 %v1375_v22 }
  0xcf   : > { %1491 = vmatpush.msrb.mxu3 %v1470_v10  ;;  %1448 = vmatpush.msrb.mxu2 %v1421_v23  ;;  %v3819_v23 = vld [vmem:[%s5585_s20 + $0x10] sm:$0xff] }
  0xd0   : > { %1537 = vmatpush.msra.mxu0 %v1516_v11  ;;  %1403 = vmatpush.msrb.mxu1 %v1374_v26 }
  0xd1   : > { %1492 = vmatpush.msrb.mxu3 %v1469_v15  ;;  %1449 = vmatpush.msrb.mxu2 %v1420_v27  ;;  %v4350_v27 = vld [vmem:[%s5610_s19] sm:$0xff] }
  0xd2   : > { %1538 = vmatpush.msra.mxu0 %v1515_v16  ;;  %1404 = vmatpush.msrb.mxu1 %v1373_v34  ;;  %v1657_v34 = vld [vmem:[%s5480_s29 + $0x38] sm:$0x7f] }
  0xd3   : > { %1493 = vmatpush.msrb.mxu3 %v1468_v20  ;;  %1450 = vmatpush.msrb.mxu2 %v1419_v35  ;;  %v1558_v20 = vld [vmem:[%s5470_s21 + $0x10] sm:$0xff]  ;;  %v4657_v35 = vld [vmem:[%s5480_s29 + $0x78] sm:$0x7f] }
  0xd4   : > { %1539 = vmatpush.msra.mxu0 %v1514_v21  ;;  %1570 = vperm.xlu2 %5254, %v1564_v51   ;;  %v4653_v51 = vld [vmem:[%s5480_s29 + $0x58] sm:$0xff] }
  0xd5   : > { %1494 = vmatpush.msrb.mxu3 %v1467_v24 }
  0xd6   : > { %1540 = vmatpush.msra.mxu0 %v1513_v25  ;;  %v4262_v25 = vld [vmem:[%s5600_s12 + $0x10] sm:$0xff] }
  0xd7   : > { %1495 = vmatpush.msrb.mxu3 %v1466_v28 }
  0xd8   : > { %1541 = vmatpush.msra.mxu0 %v1512_v29  ;;  %v1557_v29 = vld [vmem:[%s5470_s21 + $0x8] sm:$0xff] }
  0xd9   : > { %1496 = vmatpush.msrb.mxu3 %v1465_v36  ;;  %v1656_v36 = vld [vmem:[%s5480_s29 + $0x30] sm:$0xff] }
  0xda   : > { %1542 = vmatpush.msra.mxu0 %v1511_v37  ;;  %v4670_v37 = vld [vmem:[%s5480_s29 + $0xb8] sm:$0x7f] }
  0xdc   : > { %1575 = vperm.xlu2 %5254, %v1565_v56   ;;  %v4665_v56 = vld [vmem:[%s5480_s29 + $0x90] sm:$0xff] }
  0xde   : > { %v1132_v38 = vpop.permute.xlu1 %1131 }
  0xdf   : > { %v1122_v7 = vpop.permute.xlu0 %1121 }
  0xe4   : > { %2169 = vperm.xlu2 %5254, %v2163_v61   ;;  %v4677_v61 = vld [vmem:[%s5480_s29 + $0xc8] sm:$0xff] }
  0xe6   : > { %v1137_v42 = vpop.permute.xlu1 %1136 }
  0xe7   : > { %v1127_v30 = vpop.permute.xlu0 %1126 }
  0xec   : > { %2184 = vperm.xlu2 %5254, %v2166_v2  }
  0xf4   : > { %2973 = vperm.xlu2 %5254, %v2970_v4  }
  0xf6   : > { %v1169_v14 = vpop.f32.mrf.mxu0 }
  0xf7   : > { %v1170_v17 = vadd.f32 %v1169_v14, %v1122_v7  ;;  %v1556_v14 = vld [vmem:[%s5470_s21] sm:$0xff] }
  0xf9   : > { %1181 = vst [vmem:[%s5743_s18] sm:$0xff] %v1170_v17  ;;  %5255 = vtanh.f32 %v1170_v17  ;;  %v3443_v17 = vld [vmem:[%s5570_s27 + $0x18] sm:$0xff] }
  0xfc   : > { %3446 = vperm.xlu2 %5254, %v3440_v9   ;;  %v1845_v9 = vld [vmem:[%s6422_s1 + $0x30] sm:$0xff] }
  0xfe   : > { %v1172_v31 = vpop.f32.mrf.mxu0 }
  0xff   : > { %v5256_v32 = vpop.eup %5255  ;;  %v1173_v33 = vadd.f32 %v1172_v31, %v1127_v30  ;;  %v1561_v30 = vld [vmem:[%s5470_s21 + $0x28] sm:$0xff]  ;;  %v4353_v31 = vld [vmem:[%s5610_s19 + $0x18] sm:$0xff] }
 0x100   : > { %1221 = vmatmul.f32.vlgmr.msra.gmra.mxu1 %v5256_v32  ;;  %1267 = vmatmul.f32.vlgmr.msra.gmra.mxu2 %v5256_v32 }
 0x101   : > { %1182 = vst [vmem:[%s5743_s18 + $0x8] sm:$0xff] %v1173_v33  ;;  %5257 = vtanh.f32 %v1173_v33  ;;  %1313 = vmatmul.f32.vlgmr.msra.gmra.mxu3 %v5256_v32  ;;  %1359 = vmatmul.f32.vlgmr.msrb.gmra.mxu0 %v5256_v32  ;;  %v1563_v33 = vld [vmem:[%s5470_s21 + $0x38] sm:$0xff] }
 0x104   : > { %3461 = vperm.xlu2 %5254, %v3443_v17  }
 0x106   : > { %v1175_v39 = vpop.f32.mrf.mxu0 }
 0x107   : > { %v5258_v40 = vpop.eup %5257  ;;  %v1176_v41 = vadd.f32 %v1175_v39, %v1132_v38  ;;  %v4683_v38 = vld [vmem:[%s5480_s29 + $0xf8] sm:$0x7f]  ;;  %v4656_v39 = vld [vmem:[%s5480_s29 + $0x70] sm:$0xff] }
 0x108   : > { %1224 = vmatmul.f32.gmra.mxu1 %v5258_v40  ;;  %1270 = vmatmul.f32.gmra.mxu2 %v5258_v40 }
 0x109   : > { %1183 = vst [vmem:[%s5743_s18 + $0x10] sm:$0xff] %v1176_v41  ;;  %5259 = vtanh.f32 %v1176_v41  ;;  %1316 = vmatmul.f32.gmra.mxu3 %v5258_v40  ;;  %1362 = vmatmul.f32.gmra.mxu0 %v5258_v40  ;;  %v4682_v41 = vld [vmem:[%s5480_s29 + $0xf0] sm:$0xff] }
 0x10c   : > { %3833 = vperm.xlu2 %5254, %v3819_v23  }
 0x10e   : > { %v1178_v43 = vpop.f32.mrf.mxu0 }
 0x10f   : > { %v5260_v44 = vpop.eup %5259  ;;  %v1179_v45 = vadd.f32 %v1178_v43, %v1137_v42  ;;  %v1655_v42 = vld [vmem:[%s5480_s29 + $0x28] sm:$0xff] }
 0x110   : > { %1227 = vmatmul.f32.gmra.mxu1 %v5260_v44  ;;  %1273 = vmatmul.f32.gmra.mxu2 %v5260_v44  ;;  %v4655_v43 = vld [vmem:[%s5480_s29 + $0x68] sm:$0xff] }
 0x111   : > { %1184 = vst [vmem:[%s5743_s18 + $0x18] sm:$0xff] %v1179_v45  ;;  %5261 = vtanh.f32 %v1179_v45  ;;  %1319 = vmatmul.f32.gmra.mxu3 %v5260_v44  ;;  %1365 = vmatmul.f32.gmra.mxu0 %v5260_v44  ;;  %v4681_v45 = vld [vmem:[%s5480_s29 + $0xe8] sm:$0xff] }
 0x114   : > { %4276 = vperm.xlu2 %5254, %v4262_v25  }
 0x117   : > { %v5262_v46 = vpop.eup %5261 }
 0x118   : > { %1230 = vmatmul.f32.gmra.mxu1 %v5262_v46  ;;  %1276 = vmatmul.f32.gmra.mxu2 %v5262_v46 }
 0x119   : > { %1322 = vmatmul.f32.gmra.mxu3 %v5262_v46  ;;  %1368 = vmatmul.f32.gmra.mxu0 %v5262_v46 }
 0x11c   : > { %4356 = vperm.xlu2 %5254, %v4350_v27  }
 0x120   : > { %1405 = vmatmul.f32.vlgmr.msrb.gmra.mxu1 %v5256_v32  ;;  %1451 = vmatmul.f32.vlgmr.msrb.gmra.mxu2 %v5256_v32 }
 0x121   : > { %1497 = vmatmul.f32.vlgmr.msrb.gmra.mxu3 %v5256_v32  ;;  %1543 = vmatmul.f32.vlgmr.msra.gmra.mxu0 %v5256_v32  ;;  %v1559_v32 = vld [vmem:[%s5470_s21 + $0x18] sm:$0xff] }
 0x124   : > { %4371 = vperm.xlu2 %5254, %v4353_v31  }
 0x128   : > { %1408 = vmatmul.f32.gmra.mxu1 %v5258_v40  ;;  %1454 = vmatmul.f32.gmra.mxu2 %v5258_v40 }
 0x129   : > { %1500 = vmatmul.f32.gmra.mxu3 %v5258_v40  ;;  %1546 = vmatmul.f32.gmra.mxu0 %v5258_v40  ;;  %v4669_v40 = vld [vmem:[%s5480_s29 + $0xb0] sm:$0xff] }
 0x130   : > { %1411 = vmatmul.f32.gmra.mxu1 %v5260_v44  ;;  %1457 = vmatmul.f32.gmra.mxu2 %v5260_v44 }
 0x131   : > { %1503 = vmatmul.f32.gmra.mxu3 %v5260_v44  ;;  %1549 = vmatmul.f32.gmra.mxu0 %v5260_v44  ;;  %v4668_v44 = vld [vmem:[%s5480_s29 + $0xa8] sm:$0xff] }
 0x138   : > { %1414 = vmatmul.f32.gmra.mxu1 %v5262_v46  ;;  %1460 = vmatmul.f32.gmra.mxu2 %v5262_v46 }
 0x139   : > { %1506 = vmatmul.f32.gmra.mxu3 %v5262_v46  ;;  %1552 = vmatmul.f32.gmra.mxu0 %v5262_v46  ;;  %v1654_v46 = vld [vmem:[%s5480_s29 + $0x20] sm:$0xff] }
 0x17d   : > { %v5750_v52 = vpop.f32.mrf.mxu1 }
 0x17e   : > { %v1360_v47 = vpop.f32.mrf.mxu0 }
 0x183   : > { %v1268_v48 = vpop.f32.mrf.mxu2 }
 0x184   : > { %v1314_v49 = vpop.f32.mrf.mxu3 }
 0x185   : > { %v1225_v57 = vpop.f32.mrf.mxu1 }
 0x186   : > { %v1363_v50 = vpop.f32.mrf.mxu0 }
 0x18b   : > { %v1271_v53 = vpop.f32.mrf.mxu2 }
 0x18c   : > { %v1317_v54 = vpop.f32.mrf.mxu3 }
 0x18d   : > { %v1228_v62 = vpop.f32.mrf.mxu1 }
 0x18e   : > { %v1366_v55 = vpop.f32.mrf.mxu0 }
 0x193   : > { %v1274_v58 = vpop.f32.mrf.mxu2 }
 0x194   : > { %v1320_v59 = vpop.f32.mrf.mxu3 }
 0x195   : > { %v1231_v5 = vpop.f32.mrf.mxu1 }
 0x196   : > { %v1369_v60 = vpop.f32.mrf.mxu0 }
 0x197   : > { %1588 = vmatpush.msra.mxu1 %v1369_v60  ;;  %5125 = vmatpush.msra.mxu3 %v1369_v60  ;;  %v4664_v60 = vld [vmem:[%s5480_s29 + $0x88] sm:$0xff] }
 0x199   : > { %1589 = vmatpush.msra.mxu1 %v1366_v55  ;;  %5126 = vmatpush.msra.mxu3 %v1366_v55  ;;  %v4652_v55 = vld [vmem:[%s5480_s29 + $0x50] sm:$0xff] }
 0x19b   : > { %1590 = vmatpush.msra.mxu1 %v1363_v50  ;;  %5127 = vmatpush.msra.mxu3 %v1363_v50  ;;  %v1277_v0 = vpop.f32.mrf.mxu2  ;;  %v1653_v50 = vld [vmem:[%s5480_s29 + $0x18] sm:$0xff] }
 0x19c   : > { %v1323_v63 = vpop.f32.mrf.mxu3 }
 0x19d   : > { %1591 = vmatpush.msra.mxu1 %v1360_v47  ;;  %5128 = vmatpush.msra.mxu3 %v1360_v47  ;;  %v5759_v11 = vpop.f32.mrf.mxu1  ;;  %v4654_v47 = vld [vmem:[%s5480_s29 + $0x60] sm:$0xff] }
 0x19e   : > { %v1544_v1 = vpop.f32.mrf.mxu0 }
 0x19f   : > { %1592 = vmatpush.msra.mxu1 %v1323_v63  ;;  %5129 = vmatpush.msra.mxu3 %v1323_v63  ;;  %v4650_v63 = vld [vmem:[%s5480_s29 + $0x40] sm:$0xff] }
 0x1a1   : > { %1593 = vmatpush.msra.mxu1 %v1320_v59  ;;  %5130 = vmatpush.msra.mxu3 %v1320_v59  ;;  %v4651_v59 = vld [vmem:[%s5480_s29 + $0x48] sm:$0xff] }
 0x1a3   : > { %1594 = vmatpush.msra.mxu1 %v1317_v54  ;;  %5131 = vmatpush.msra.mxu3 %v1317_v54  ;;  %v5756_v7 = vpop.f32.mrf.mxu2  ;;  %v1652_v54 = vld [vmem:[%s5480_s29 + $0x10] sm:$0xff] }
 0x1a4   : > { %v1498_v3 = vpop.f32.mrf.mxu3 }
 0x1a5   : > { %1595 = vmatpush.msra.mxu1 %v1314_v49  ;;  %5132 = vmatpush.msra.mxu3 %v1314_v49  ;;  %v1409_v18 = vpop.f32.mrf.mxu1  ;;  %v4680_v49 = vld [vmem:[%s5480_s29 + $0xe0] sm:$0xff] }
 0x1a6   : > { %v1547_v6 = vpop.f32.mrf.mxu0 }
 0x1a7   : > { %1596 = vmatpush.msra.mxu1 %v1277_v0  ;;  %5133 = vmatpush.msra.mxu3 %v1277_v0  ;;  %v4663_v0 = vld [vmem:[%s5480_s29 + $0x80] sm:$0xff] }
 0x1a9   : > { %1597 = vmatpush.msra.mxu1 %v1274_v58  ;;  %5134 = vmatpush.msra.mxu3 %v1274_v58  ;;  %v1651_v58 = vld [vmem:[%s5480_s29 + $0x8] sm:$0xff] }
 0x1ab   : > { %1598 = vmatpush.msra.mxu1 %v1271_v53  ;;  %5135 = vmatpush.msra.mxu3 %v1271_v53  ;;  %v1455_v12 = vpop.f32.mrf.mxu2  ;;  %v4679_v53 = vld [vmem:[%s5480_s29 + $0xd8] sm:$0xff] }
 0x1ac   : > { %v1501_v8 = vpop.f32.mrf.mxu3 }
 0x1ad   : > { %1599 = vmatpush.msra.mxu1 %v1268_v48  ;;  %5136 = vmatpush.msra.mxu3 %v1268_v48  ;;  %v1412_v24 = vpop.f32.mrf.mxu1  ;;  %v4667_v48 = vld [vmem:[%s5480_s29 + $0xa0] sm:$0xff] }
 0x1ae   : > { %v1550_v10 = vpop.f32.mrf.mxu0 }
 0x1af   : > { %1600 = vmatpush.msra.mxu1 %v1231_v5  ;;  %5137 = vmatpush.msra.mxu3 %v1231_v5  ;;  %v1846_v5 = vld [vmem:[%s6422_s1 + $0x38] sm:$0xff] }
 0x1b1   : > { %1601 = vmatpush.msra.mxu1 %v1228_v62  ;;  %5138 = vmatpush.msra.mxu3 %v1228_v62  ;;  %v1650_v62 = vld [vmem:[%s5480_s29] sm:$0xff] }
 0x1b3   : > { %1602 = vmatpush.msra.mxu1 %v1225_v57  ;;  %5139 = vmatpush.msra.mxu3 %v1225_v57  ;;  %v1458_v21 = vpop.f32.mrf.mxu2  ;;  %v4678_v57 = vld [vmem:[%s5480_s29 + $0xd0] sm:$0xff] }
 0x1b4   : > { %v1504_v15 = vpop.f32.mrf.mxu3 }
 0x1b5   : > { %1603 = vmatpush.msra.mxu1 %v5750_v52  ;;  %5140 = vmatpush.msra.mxu3 %v5750_v52  ;;  %v1415_v28 = vpop.f32.mrf.mxu1  ;;  %v4666_v52 = vld [vmem:[%s5480_s29 + $0x98] sm:$0xff] }
 0x1b6   : > { %v1553_v16 = vpop.f32.mrf.mxu0  ;;  %1610 = vmatmul.f32.vlgmr.msra.gmra.mxu3 %v1560_v13  ;;  %1604 = vmatmul.f32.vlgmr.msra.gmra.mxu1 %v1556_v14  ;;  %v4723_v13 = vld [vmem:[%s6422_s1 + $0xf0] sm:$0xff] }
 0x1b7   : > { %1617 = vmatpush.msrb.mxu0 %v1553_v16  ;;  %5141 = vmatpush.msra.mxu2 %v1553_v16 }
 0x1b8   : > { %4645 = vmatpush.msk.msrb.mxu3 %vm1671_vm1, %v1657_v34  ;;  %4671 = vmatpush.msk.msrb.mxu1 %vm1671_vm1, %v4670_v37  ;;  %v1844_v34 = vld [vmem:[%s6422_s1 + $0x28] sm:$0xff] }
 0x1b9   : > { %1618 = vmatpush.msrb.mxu0 %v1550_v10  ;;  %5142 = vmatpush.msra.mxu2 %v1550_v10  ;;  %v4699_v10 = vld [vmem:[%s6422_s1 + $0x70] sm:$0xff]  ;;  %v4722_v37 = vld [vmem:[%s6422_s1 + $0xe8] sm:$0xff] }
 0x1ba   : > { %1684 = vmatpush.msrb.mxu3 %v1656_v36  ;;  %1770 = vmatpush.msrb.mxu1 %v4669_v40  ;;  %v4710_v36 = vld [vmem:[%s6422_s1 + $0xa8] sm:$0xff]  ;;  %v4709_v40 = vld [vmem:[%s6422_s1 + $0xa0] sm:$0xff] }
 0x1bb   : > { %1619 = vmatpush.msrb.mxu0 %v1547_v6  ;;  %5143 = vmatpush.msra.mxu2 %v1547_v6  ;;  %v1461_v26 = vpop.f32.mrf.mxu2  ;;  %v4700_v6 = vld [vmem:[%s6422_s1 + $0x78] sm:$0xff] }
 0x1bc   : > { %v1507_v22 = vpop.f32.mrf.mxu3  ;;  %1685 = vmatpush.msrb.mxu3 %v1655_v42  ;;  %1771 = vmatpush.msrb.mxu1 %v4668_v44  ;;  %v1842_v42 = vld [vmem:[%s6422_s1 + $0x18] sm:$0xff] }
 0x1bd   : > { %1620 = vmatpush.msrb.mxu0 %v1544_v1  ;;  %5144 = vmatpush.msra.mxu2 %v1544_v1  ;;  %v4676_v1 = vld [vmem:[%s5480_s29 + $0xc0] sm:$0xff]  ;;  %v4708_v44 = vld [vmem:[%s6422_s1 + $0x98] sm:$0xff] }
 0x1be   : > { %1613 = vmatmul.f32.gmra.mxu3 %v1562_v19  ;;  %1607 = vmatmul.f32.gmra.mxu1 %v1558_v20 }
 0x1bf   : > { %1621 = vmatpush.msrb.mxu0 %v1507_v22  ;;  %5145 = vmatpush.msra.mxu2 %v1507_v22 }
 0x1c0   : > { %1686 = vmatpush.msrb.mxu3 %v1654_v46  ;;  %1772 = vmatpush.msrb.mxu1 %v4667_v48  ;;  %v1841_v46 = vld [vmem:[%s6422_s1 + $0x10] sm:$0xff] }
 0x1c1   : > { %1622 = vmatpush.msrb.mxu0 %v1504_v15  ;;  %5146 = vmatpush.msra.mxu2 %v1504_v15  ;;  %v4707_v48 = vld [vmem:[%s6422_s1 + $0x90] sm:$0xff] }
 0x1c2   : > { %1687 = vmatpush.msrb.mxu3 %v1653_v50  ;;  %1773 = vmatpush.msrb.mxu1 %v4666_v52  ;;  %v1840_v50 = vld [vmem:[%s6422_s1 + $0x8] sm:$0xff] }
 0x1c3   : > { %1623 = vmatpush.msrb.mxu0 %v1501_v8  ;;  %5147 = vmatpush.msra.mxu2 %v1501_v8  ;;  %v4724_v8 = vld [vmem:[%s6422_s1 + $0xf8] sm:$0xff]  ;;  %v4706_v52 = vld [vmem:[%s6422_s1 + $0x88] sm:$0xff] }
 0x1c4   : > { %1688 = vmatpush.msrb.mxu3 %v1652_v54  ;;  %1774 = vmatpush.msrb.mxu1 %v4665_v56  ;;  %v1839_v54 = vld [vmem:[%s6422_s1] sm:$0xff] }
 0x1c5   : > { %1624 = vmatpush.msrb.mxu0 %v1498_v3  ;;  %5148 = vmatpush.msra.mxu2 %v1498_v3  ;;  %v1571_v3 = vpop.permute.xlu2 %1570  ;;  %v4705_v56 = vld [vmem:[%s6422_s1 + $0x80] sm:$0xff] }
 0x1c6   : > { %1689 = vmatpush.msrb.mxu3 %v1651_v58  ;;  %1775 = vmatpush.msrb.mxu1 %v4664_v60  ;;  %v4736_v58 = vld [vmem:[%s6422_s1 + $0x138] sm:$0xff] }
 0x1c7   : > { %1625 = vmatpush.msrb.mxu0 %v1461_v26  ;;  %5149 = vmatpush.msra.mxu2 %v1461_v26  ;;  %v4760_v60 = vld [vmem:[%s6422_s1 + $0x1b8] sm:$0xff] }
 0x1c8   : > { %1690 = vmatpush.msrb.mxu3 %v1650_v62  ;;  %1776 = vmatpush.msrb.mxu1 %v4663_v0  ;;  %v4735_v62 = vld [vmem:[%s6422_s1 + $0x130] sm:$0xff] }
 0x1c9   : > { %1626 = vmatpush.msrb.mxu0 %v1458_v21  ;;  %5150 = vmatpush.msra.mxu2 %v1458_v21  ;;  %v4759_v0 = vld [vmem:[%s6422_s1 + $0x1b0] sm:$0xff] }
 0x1ca   : > { %1868 = vmatpush.msra.mxu3 %v1846_v5  ;;  %v4746_v5 = vld [vmem:[%s6422_s1 + $0x168] sm:$0xff] }
 0x1cb   : > { %1627 = vmatpush.msrb.mxu0 %v1455_v12  ;;  %5151 = vmatpush.msra.mxu2 %v1455_v12  ;;  %v4711_v12 = vld [vmem:[%s6422_s1 + $0xb0] sm:$0xff] }
 0x1cc   : > { %1869 = vmatpush.msra.mxu3 %v1845_v9  ;;  %v4745_v9 = vld [vmem:[%s6422_s1 + $0x160] sm:$0xff] }
 0x1cd   : > { %1628 = vmatpush.msrb.mxu0 %v5756_v7  ;;  %5152 = vmatpush.msra.mxu2 %v5756_v7  ;;  %v4712_v7 = vld [vmem:[%s6422_s1 + $0xb8] sm:$0xff]  ;;  %v1576_v17 = vpop.permute.xlu2 %1575 }
 0x1ce   : > { %1944 = vmatpush.msra.mxu1 %v4712_v7  ;;  %1870 = vmatpush.msra.mxu3 %v1844_v34  ;;  %v4770_v7 = vld [vmem:[%s6422_s1 + $0x1e8] sm:$0xff]  ;;  %v4765_v34 = vld [vmem:[%s6422_s1 + $0x1c0] sm:$0xff] }
 0x1cf   : > { %1629 = vmatpush.msrb.mxu0 %v1415_v28  ;;  %5153 = vmatpush.msra.mxu2 %v1415_v28 }
 0x1d0   : > { %1945 = vmatpush.msra.mxu1 %v4711_v12  ;;  %v4732_v12 = vld [vmem:[%s6422_s1 + $0x118] sm:$0xff] }
 0x1d1   : > { %1630 = vmatpush.msrb.mxu0 %v1412_v24  ;;  %5154 = vmatpush.msra.mxu2 %v1412_v24  ;;  %v1581_v24 = vpop.permute.xlu0 %1580 }
 0x1d2   : > { %1946 = vmatpush.msra.mxu1 %v4710_v36 }
 0x1d3   : > { %1631 = vmatpush.msrb.mxu0 %v1409_v18  ;;  %5155 = vmatpush.msra.mxu2 %v1409_v18 }
 0x1d4   : > { %1947 = vmatpush.msra.mxu1 %v4709_v40 }
 0x1d5   : > { %1632 = vmatpush.msrb.mxu0 %v5759_v11  ;;  %5156 = vmatpush.msra.mxu2 %v5759_v11 }
 0x1d6   : > { %1633 = vmatmul.f32.vlgmr.msrb.gmra.mxu0 %v1557_v29  ;;  %1639 = vmatmul.f32.vlgmr.msra.gmra.mxu2 %v1561_v30  ;;  %v1586_v29 = vpop.permute.xlu1 %1585 }
 0x1d7   : > { %4658 = vmatpush.msk.msra.mxu0 %vm1671_vm1, %v4657_v35  ;;  %4684 = vmatpush.msk.msrb.mxu2 %vm1671_vm1, %v4683_v38  ;;  %v4698_v35 = vld [vmem:[%s6422_s1 + $0x68] sm:$0xff]  ;;  %v1843_v38 = vld [vmem:[%s6422_s1 + $0x20] sm:$0xff]  ;;  %vm3464_vm1 = vcmask 785408  }
 0x1d8   : > { %1871 = vmatpush.msra.mxu3 %v1843_v38  ;;  %1948 = vmatpush.msra.mxu1 %v4708_v44 }
 0x1d9   : > { %1725 = vmatpush.msra.mxu0 %v4656_v39  ;;  %1811 = vmatpush.msrb.mxu2 %v4682_v41  ;;  %v4697_v39 = vld [vmem:[%s6422_s1 + $0x60] sm:$0xff] }
 0x1da   : > { %v4721_v41 = vld [vmem:[%s6422_s1 + $0xe0] sm:$0xff]  ;;  %1872 = vmatpush.msra.mxu3 %v1842_v42  ;;  %1949 = vmatpush.msra.mxu1 %v4707_v48 }
 0x1db   : > { %1726 = vmatpush.msra.mxu0 %v4655_v43  ;;  %1812 = vmatpush.msrb.mxu2 %v4681_v45  ;;  %v4696_v43 = vld [vmem:[%s6422_s1 + $0x58] sm:$0xff] }
 0x1dc   : > { %v4720_v45 = vld [vmem:[%s6422_s1 + $0xd8] sm:$0xff]  ;;  %1873 = vmatpush.msra.mxu3 %v1841_v46  ;;  %1950 = vmatpush.msra.mxu1 %v4706_v52 }
 0x1dd   : > { %1727 = vmatpush.msra.mxu0 %v4654_v47  ;;  %1813 = vmatpush.msrb.mxu2 %v4680_v49  ;;  %v4695_v47 = vld [vmem:[%s6422_s1 + $0x50] sm:$0xff] }
 0x1de   : > { %1636 = vmatmul.f32.gmra.mxu0 %v1559_v32  ;;  %1642 = vmatmul.f32.gmra.mxu2 %v1563_v33  ;;  %v4719_v49 = vld [vmem:[%s6422_s1 + $0xd0] sm:$0xff] }
 0x1df   : > { %1728 = vmatpush.msra.mxu0 %v4653_v51  ;;  %1814 = vmatpush.msrb.mxu2 %v4679_v53  ;;  %v4694_v51 = vld [vmem:[%s6422_s1 + $0x48] sm:$0xff] }
 0x1e0   : > { %1874 = vmatpush.msra.mxu3 %v1840_v50  ;;  %v4718_v53 = vld [vmem:[%s6422_s1 + $0xc8] sm:$0xff]  ;;  %1951 = vmatpush.msra.mxu1 %v4705_v56 }
 0x1e1   : > { %1729 = vmatpush.msra.mxu0 %v4652_v55  ;;  %1815 = vmatpush.msrb.mxu2 %v4678_v57  ;;  %v4693_v55 = vld [vmem:[%s6422_s1 + $0x40] sm:$0xff] }
 0x1e2   : > { %1875 = vmatpush.msra.mxu3 %v1839_v54  ;;  %v4717_v57 = vld [vmem:[%s6422_s1 + $0xc0] sm:$0xff] }
 0x1e3   : > { %1730 = vmatpush.msra.mxu0 %v4651_v59  ;;  %1816 = vmatpush.msrb.mxu2 %v4677_v61  ;;  %v4748_v59 = vld [vmem:[%s6422_s1 + $0x178] sm:$0xff] }
 0x1e4   : > { %v4772_v61 = vld [vmem:[%s6422_s1 + $0x1f8] sm:$0xff] }
 0x1e5   : > { %1731 = vmatpush.msra.mxu0 %v4650_v63  ;;  %1817 = vmatpush.msrb.mxu2 %v4676_v1  ;;  %v4747_v63 = vld [vmem:[%s6422_s1 + $0x170] sm:$0xff] }
 0x1e7   : > { %1906 = vmatpush.msrb.mxu0 %v4700_v6  ;;  %1982 = vmatpush.msra.mxu2 %v4724_v8  ;;  %v4758_v6 = vld [vmem:[%s6422_s1 + $0x1a8] sm:$0xff]  ;;  %v4733_v8 = vld [vmem:[%s6422_s1 + $0x120] sm:$0xff] }
 0x1e9   : > { %1907 = vmatpush.msrb.mxu0 %v4699_v10  ;;  %1983 = vmatpush.msra.mxu2 %v4723_v13  ;;  %v4757_v10 = vld [vmem:[%s6422_s1 + $0x1a0] sm:$0xff]  ;;  %v4744_v13 = vld [vmem:[%s6422_s1 + $0x158] sm:$0xff] }
 0x1eb   : > { %1908 = vmatpush.msrb.mxu0 %v4698_v35  ;;  %1984 = vmatpush.msra.mxu2 %v4722_v37 }
 0x1ed   : > { %1909 = vmatpush.msrb.mxu0 %v4697_v39  ;;  %1985 = vmatpush.msra.mxu2 %v4721_v41 }
 0x1ef   : > { %1910 = vmatpush.msrb.mxu0 %v4696_v43  ;;  %1986 = vmatpush.msra.mxu2 %v4720_v45 }
 0x1f1   : > { %1911 = vmatpush.msrb.mxu0 %v4695_v47  ;;  %1987 = vmatpush.msra.mxu2 %v4719_v49 }
 0x1f3   : > { %1912 = vmatpush.msrb.mxu0 %v4694_v51  ;;  %1988 = vmatpush.msra.mxu2 %v4718_v53 }
 0x1f5   : > { %1913 = vmatpush.msrb.mxu0 %v4693_v55  ;;  %1989 = vmatpush.msra.mxu2 %v4717_v57 }
 0x233   : > { %v1605_v2 = vpop.f32.mrf.mxu1 }
 0x234   : > { %v1606_v4 = vadd.f32 %v1605_v2, %v1571_v3  ;;  %v4771_v2 = vld [vmem:[%s6422_s1 + $0x1f0] sm:$0xff] }
 0x239   : > { %v1611_v19 = vpop.f32.mrf.mxu3 }
 0x23a   : > { %v1612_v25 = vadd.f32 %v1611_v19, %v1581_v24 }
 0x23b   : > { %v1608_v16 = vpop.f32.mrf.mxu1 }
 0x23c   : > { %v1609_v18 = vadd.f32 %v1608_v16, %v1576_v17  ;;  %v4768_v16 = vld [vmem:[%s6422_s1 + $0x1d8] sm:$0xff]  ;;  %v4731_v17 = vld [vmem:[%s6422_s1 + $0x110] sm:$0xff] }
 0x241   : > { %v1614_v27 = vpop.f32.mrf.mxu3 }
 0x242   : > { %v1615_v31 = vadd.f32 %v1614_v27, %v1586_v29  ;;  %v4766_v27 = vld [vmem:[%s6422_s1 + $0x1c8] sm:$0xff] }
 0x253   : > { %v1634_v11 = vpop.f32.mrf.mxu0 }
 0x254   : > { %v1635_v14 = vadd.f32 %v1634_v11, %v1606_v4  ;;  %v4734_v4 = vld [vmem:[%s6422_s1 + $0x128] sm:$0xff]  ;;  %v4769_v11 = vld [vmem:[%s6422_s1 + $0x1e0] sm:$0xff] }
 0x256   : > { %v1646_v15 = vmax.f32 %v1635_v14, 0.0  ;;  %v4756_v14 = vld [vmem:[%s6422_s1 + $0x198] sm:$0xff] }
 0x258   : > { %4646 = vmatmul.msk.f32.vlgmr.msrb.gmra.mxu3 %vm1658_vm2, %v1646_v15  ;;  %4659 = vmatmul.msk.f32.vlgmr.msra.gmra.mxu0 %vm1658_vm2, %v1646_v15 }
 0x259   : > { %4672 = vmatmul.msk.f32.vlgmr.msrb.gmra.mxu1 %vm1658_vm2, %v1646_v15  ;;  %4685 = vmatmul.msk.f32.vlgmr.msrb.gmra.mxu2 %vm1658_vm2, %v1646_v15  ;;  %v1640_v22 = vpop.f32.mrf.mxu2 }
 0x25a   : > { %v1641_v26 = vadd.f32 %v1640_v22, %v1612_v25  ;;  %2020 = vmatpush.msrb.mxu3 %v4736_v58  ;;  %2058 = vmatpush.msra.mxu0 %v4748_v59  ;;  %v4767_v22 = vld [vmem:[%s6422_s1 + $0x1d0] sm:$0xff]  ;;  %v4742_v25 = vld [vmem:[%s6422_s1 + $0x148] sm:$0xff] }
 0x25b   : > { %v1637_v20 = vpop.f32.mrf.mxu0  ;;  %2096 = vmatpush.msrb.mxu1 %v4760_v60  ;;  %2134 = vmatpush.msrb.mxu2 %v4772_v61 }
 0x25c   : > { %v1638_v21 = vadd.f32 %v1637_v20, %v1609_v18  ;;  %v1648_v28 = vmax.f32 %v1641_v26, 0.0  ;;  %2021 = vmatpush.msrb.mxu3 %v4735_v62  ;;  %2059 = vmatpush.msra.mxu0 %v4747_v63  ;;  %v4743_v18 = vld [vmem:[%s6422_s1 + $0x150] sm:$0xff]  ;;  %v4754_v26 = vld [vmem:[%s6422_s1 + $0x188] sm:$0xff] }
 0x25d   : > { %2097 = vmatpush.msrb.mxu1 %v4759_v0  ;;  %2135 = vmatpush.msrb.mxu2 %v4771_v2 }
 0x25e   : > { %v1647_v23 = vmax.f32 %v1638_v21, 0.0  ;;  %2022 = vmatpush.msrb.mxu3 %v4734_v4  ;;  %2060 = vmatpush.msra.mxu0 %v4746_v5  ;;  %v4755_v21 = vld [vmem:[%s6422_s1 + $0x190] sm:$0xff] }
 0x25f   : > { %2098 = vmatpush.msrb.mxu1 %v4758_v6  ;;  %2136 = vmatpush.msrb.mxu2 %v4770_v7 }
 0x260   : > { %4647 = vmatmul.msk.f32.gmra.mxu3 %vm1658_vm2, %v1647_v23  ;;  %4660 = vmatmul.msk.f32.gmra.mxu0 %vm1658_vm2, %v1647_v23 }
 0x261   : > { %4673 = vmatmul.msk.f32.gmra.mxu1 %vm1658_vm2, %v1647_v23  ;;  %4686 = vmatmul.msk.f32.gmra.mxu2 %vm1658_vm2, %v1647_v23  ;;  %v1643_v30 = vpop.f32.mrf.mxu2  ;;  %v4730_v23 = vld [vmem:[%s6422_s1 + $0x108] sm:$0xff] }
 0x262   : > { %v1644_v32 = vadd.f32 %v1643_v30, %v1615_v31  ;;  %2023 = vmatpush.msrb.mxu3 %v4733_v8  ;;  %2061 = vmatpush.msra.mxu0 %v4745_v9  ;;  %v4729_v31 = vld [vmem:[%s6422_s1 + $0x100] sm:$0xff] }
 0x263   : > { %2099 = vmatpush.msrb.mxu1 %v4757_v10  ;;  %2137 = vmatpush.msrb.mxu2 %v4769_v11 }
 0x264   : > { %v1649_v33 = vmax.f32 %v1644_v32, 0.0  ;;  %2024 = vmatpush.msrb.mxu3 %v4732_v12  ;;  %2062 = vmatpush.msra.mxu0 %v4744_v13  ;;  %v4741_v32 = vld [vmem:[%s6422_s1 + $0x140] sm:$0xff] }
 0x265   : > { %2100 = vmatpush.msrb.mxu1 %v4756_v14  ;;  %2138 = vmatpush.msrb.mxu2 %v4768_v16  ;;  %v2155_v14 = vld [vmem:[%s6423_s10] sm:$0xff] }
 0x266   : > { %2025 = vmatpush.msrb.mxu3 %v4731_v17  ;;  %2063 = vmatpush.msra.mxu0 %v4743_v18  ;;  %v2157_v18 = vld [vmem:[%s6423_s10 + $0x10] sm:$0xff] }
 0x267   : > { %2101 = vmatpush.msrb.mxu1 %v4755_v21  ;;  %2139 = vmatpush.msrb.mxu2 %v4767_v22  ;;  %v2159_v21 = vld [vmem:[%s6423_s10 + $0x20] sm:$0xff] }
 0x268   : > { %4648 = vmatmul.msk.f32.gmra.mxu3 %vm1658_vm2, %v1648_v28  ;;  %4661 = vmatmul.msk.f32.gmra.mxu0 %vm1658_vm2, %v1648_v28 }
 0x269   : > { %4674 = vmatmul.msk.f32.gmra.mxu1 %vm1658_vm2, %v1648_v28  ;;  %4687 = vmatmul.msk.f32.gmra.mxu2 %vm1658_vm2, %v1648_v28 }
 0x26a   : > { %2026 = vmatpush.msrb.mxu3 %v4730_v23  ;;  %2064 = vmatpush.msra.mxu0 %v4742_v25 }
 0x26b   : > { %2102 = vmatpush.msrb.mxu1 %v4754_v26  ;;  %2140 = vmatpush.msrb.mxu2 %v4766_v27  ;;  %v2156_v26 = vld [vmem:[%s6423_s10 + $0x8] sm:$0xff]  ;;  %v2158_v27 = vld [vmem:[%s6423_s10 + $0x18] sm:$0xff] }
 0x26c   : > { %2027 = vmatpush.msrb.mxu3 %v4729_v31  ;;  %2065 = vmatpush.msra.mxu0 %v4741_v32  ;;  %v4792_v31 = vld [vmem:[%s6424_s7 + $0x40] sm:$0x1f]  ;;  %v2251_v32 = vld [vmem:[%s6424_s7 + $0x10] sm:$0x1f] }
 0x26d   : > { %2141 = vmatpush.msrb.mxu2 %v4765_v34  ;;  %v2250_v34 = vld [vmem:[%s6424_s7 + $0x8] sm:$0xff] }
 0x270   : > { %4649 = vmatmul.msk.f32.gmra.mxu3 %vm1658_vm2, %v1649_v33  ;;  %4662 = vmatmul.msk.f32.gmra.mxu0 %vm1658_vm2, %v1649_v33 }
 0x271   : > { %4675 = vmatmul.msk.f32.gmra.mxu1 %vm1658_vm2, %v1649_v33  ;;  %4688 = vmatmul.msk.f32.gmra.mxu2 %vm1658_vm2, %v1649_v33  ;;  %v4753_v33 = vld [vmem:[%s6422_s1 + $0x180] sm:$0xff]  ;;  %s6429_s1 = sld [smem:[#allocation18_spill]]  ;;  %vm3925_vm2 = vcmask 1040384  }
 0x272   : > { %2103 = vmatpush.msrb.mxu1 %v4753_v33  ;;  %v4800_v33 = vld [vmem:[%s6424_s7 + $0x58] sm:$0x1f] }
 0x2d5   : > { %v1733_v1 = vpop.f32.mrf.mxu0 }
 0x2d6   : > { %v1778_v3 = vpop.f32.mrf.mxu1 }
 0x2db   : > { %v1692_v15 = vpop.f32.mrf.mxu3 }
 0x2dc   : > { %v1745_v19 = vmax.f32 %v1692_v15, %v1733_v1  ;;  %v1819_v20 = vpop.f32.mrf.mxu2 }
 0x2dd   : > { %v1831_v24 = vmax.f32 %v1778_v3, %v1819_v20  ;;  %v1736_v29 = vpop.f32.mrf.mxu0 }
 0x2de   : > { %v1781_v30 = vpop.f32.mrf.mxu1 }
 0x2df   : > { %v1835_v28 = vmax.f32 %v1745_v19, %v1831_v24  ;;  %v2161_v24 = vld [vmem:[%s6423_s10 + $0x30] sm:$0xff] }
 0x2e1   : > { %4689 = vmatmul.msk.f32.vlgmr.msra.gmra.mxu3 %vm1847_vm3, %v1835_v28  ;;  %4701 = vmatmul.msk.f32.vlgmr.msrb.gmra.mxu0 %vm1847_vm3, %v1835_v28 }
 0x2e2   : > { %4713 = vmatmul.msk.f32.vlgmr.msra.gmra.mxu1 %vm1847_vm3, %v1835_v28  ;;  %4725 = vmatmul.msk.f32.vlgmr.msra.gmra.mxu2 %vm1847_vm3, %v1835_v28 }
 0x2e3   : > { %v1695_v35 = vpop.f32.mrf.mxu3  ;;  %4777 = vmatpush.msk.msra.mxu1 %vm2265_vm4, %v2251_v32 }
 0x2e4   : > { %v1746_v36 = vmax.f32 %v1695_v35, %v1736_v29  ;;  %v1822_v37 = vpop.f32.mrf.mxu2  ;;  %v2162_v29 = vld [vmem:[%s6423_s10 + $0x38] sm:$0xff]  ;;  %v4783_v35 = vld [vmem:[%s6424_s7 + $0x20] sm:$0xff] }
 0x2e5   : > { %v1832_v38 = vmax.f32 %v1781_v30, %v1822_v37  ;;  %v1739_v40 = vpop.f32.mrf.mxu0  ;;  %v4784_v30 = vld [vmem:[%s6424_s7 + $0x28] sm:$0x1f]  ;;  %v4799_v37 = vld [vmem:[%s6424_s7 + $0x50] sm:$0xff]  ;;  %2283 = vmatpush.msra.mxu1 %v2250_v34 }
 0x2e6   : > { %v1784_v41 = vpop.f32.mrf.mxu1  ;;  %4785 = vmatpush.msk.msra.mxu2 %vm2265_vm4, %v4784_v30 }
 0x2e7   : > { %v1836_v39 = vmax.f32 %v1746_v36, %v1832_v38  ;;  %v4791_v36 = vld [vmem:[%s6424_s7 + $0x38] sm:$0xff]  ;;  %v2249_v38 = vld [vmem:[%s6424_s7] sm:$0xff] }
 0x2e8   : > { %2319 = vmatpush.msra.mxu2 %v4783_v35  ;;  %2284 = vmatpush.msra.mxu1 %v2249_v38 }
 0x2e9   : > { %4690 = vmatmul.msk.f32.gmra.mxu3 %vm1847_vm3, %v1836_v39  ;;  %4702 = vmatmul.msk.f32.gmra.mxu0 %vm1847_vm3, %v1836_v39 }
 0x2ea   : > { %4714 = vmatmul.msk.f32.gmra.mxu1 %vm1847_vm3, %v1836_v39  ;;  %4726 = vmatmul.msk.f32.gmra.mxu2 %vm1847_vm3, %v1836_v39 }
 0x2eb   : > { %v1698_v42 = vpop.f32.mrf.mxu3 }
 0x2ec   : > { %v1747_v43 = vmax.f32 %v1698_v42, %v1739_v40  ;;  %v1825_v44 = vpop.f32.mrf.mxu2  ;;  %v4790_v40 = vld [vmem:[%s6424_s7 + $0x30] sm:$0xff] }
 0x2ed   : > { %v1833_v45 = vmax.f32 %v1784_v41, %v1825_v44  ;;  %v1742_v47 = vpop.f32.mrf.mxu0  ;;  %v4798_v41 = vld [vmem:[%s6424_s7 + $0x48] sm:$0xff] }
 0x2ee   : > { %v1787_v49 = vpop.f32.mrf.mxu1 }
 0x2ef   : > { %v1837_v46 = vmax.f32 %v1747_v43, %v1833_v45  ;;  %v2170_v43 = vpop.permute.xlu2 %2169 }
 0x2f1   : > { %4691 = vmatmul.msk.f32.gmra.mxu3 %vm1847_vm3, %v1837_v46  ;;  %4703 = vmatmul.msk.f32.gmra.mxu0 %vm1847_vm3, %v1837_v46 }
 0x2f2   : > { %4715 = vmatmul.msk.f32.gmra.mxu1 %vm1847_vm3, %v1837_v46  ;;  %4727 = vmatmul.msk.f32.gmra.mxu2 %vm1847_vm3, %v1837_v46 }
 0x2f3   : > { %v1701_v48 = vpop.f32.mrf.mxu3 }
 0x2f4   : > { %v1748_v50 = vmax.f32 %v1701_v48, %v1742_v47  ;;  %v1828_v51 = vpop.f32.mrf.mxu2 }
 0x2f5   : > { %v1834_v52 = vmax.f32 %v1787_v49, %v1828_v51  ;;  %v2175_v49 = vpop.permute.xlu0 %2174 }
 0x2f7   : > { %v1838_v53 = vmax.f32 %v1748_v50, %v1834_v52 }
 0x2f9   : > { %4692 = vmatmul.msk.f32.gmra.mxu3 %vm1847_vm3, %v1838_v53  ;;  %4704 = vmatmul.msk.f32.gmra.mxu0 %vm1847_vm3, %v1838_v53 }
 0x2fa   : > { %4716 = vmatmul.msk.f32.gmra.mxu1 %vm1847_vm3, %v1838_v53  ;;  %4728 = vmatmul.msk.f32.gmra.mxu2 %vm1847_vm3, %v1838_v53 }
 0x301   : > { %4737 = vmatmul.msk.f32.vlgmr.msrb.gmra.mxu3 %vm1847_vm3, %v1835_v28  ;;  %4749 = vmatmul.msk.f32.vlgmr.msra.gmra.mxu0 %vm1847_vm3, %v1835_v28 }
 0x302   : > { %4761 = vmatmul.msk.f32.vlgmr.msrb.gmra.mxu1 %vm1847_vm3, %v1835_v28  ;;  %4773 = vmatmul.msk.f32.vlgmr.msrb.gmra.mxu2 %vm1847_vm3, %v1835_v28  ;;  %v2160_v28 = vld [vmem:[%s6423_s10 + $0x28] sm:$0xff] }
 0x309   : > { %4738 = vmatmul.msk.f32.gmra.mxu3 %vm1847_vm3, %v1836_v39  ;;  %4750 = vmatmul.msk.f32.gmra.mxu0 %vm1847_vm3, %v1836_v39 }
 0x30a   : > { %4762 = vmatmul.msk.f32.gmra.mxu1 %vm1847_vm3, %v1836_v39  ;;  %4774 = vmatmul.msk.f32.gmra.mxu2 %vm1847_vm3, %v1836_v39  ;;  %v4782_v39 = vld [vmem:[%s6424_s7 + $0x18] sm:$0xff]  ;;  %s5321_s7 = scalar_lea.hbm %s5615_s24, 64 }
 0x30b   : > { %2320 = vmatpush.msra.mxu2 %v4782_v39 }
 0x311   : > { %4739 = vmatmul.msk.f32.gmra.mxu3 %vm1847_vm3, %v1837_v46  ;;  %4751 = vmatmul.msk.f32.gmra.mxu0 %vm1847_vm3, %v1837_v46 }
 0x312   : > { %4763 = vmatmul.msk.f32.gmra.mxu1 %vm1847_vm3, %v1837_v46  ;;  %4775 = vmatmul.msk.f32.gmra.mxu2 %vm1847_vm3, %v1837_v46 }
 0x319   : > { %4740 = vmatmul.msk.f32.gmra.mxu3 %vm1847_vm3, %v1838_v53  ;;  %4752 = vmatmul.msk.f32.gmra.mxu0 %vm1847_vm3, %v1838_v53 }
 0x31a   : > { %4764 = vmatmul.msk.f32.gmra.mxu1 %vm1847_vm3, %v1838_v53  ;;  %4776 = vmatmul.msk.f32.gmra.mxu2 %vm1847_vm3, %v1838_v53 }
 0x35e   : > { %v1915_v56 = vpop.f32.mrf.mxu0 }
 0x35f   : > { %v1953_v54 = vpop.f32.mrf.mxu1 }
 0x364   : > { %v1877_v59 = vpop.f32.mrf.mxu3 }
 0x365   : > { %v1991_v55 = vpop.f32.mrf.mxu2 }
 0x366   : > { %v1918_v60 = vpop.f32.mrf.mxu0 }
 0x367   : > { %v1956_v57 = vpop.f32.mrf.mxu1 }
 0x36c   : > { %v1880_v63 = vpop.f32.mrf.mxu3 }
 0x36d   : > { %v1994_v58 = vpop.f32.mrf.mxu2 }
 0x36e   : > { %v1921_v0 = vpop.f32.mrf.mxu0 }
 0x36f   : > { %v1959_v61 = vpop.f32.mrf.mxu1 }
 0x374   : > { %v1883_v3 = vpop.f32.mrf.mxu3 }
 0x375   : > { %v1997_v62 = vpop.f32.mrf.mxu2 }
 0x376   : > { %v1924_v4 = vpop.f32.mrf.mxu0 }
 0x377   : > { %v1962_v1 = vpop.f32.mrf.mxu1 }
 0x37c   : > { %v1886_v7 = vpop.f32.mrf.mxu3 }
 0x37d   : > { %v2000_v2 = vpop.f32.mrf.mxu2 }
 0x37e   : > { %2187 = vmatpush.msra.mxu3 %v2000_v2  ;;  %v2067_v9 = vpop.f32.mrf.mxu0  ;;  %v4813_v2 = vld [vmem:[%s6425_s26 + $0x28] sm:$0x3f]  ;;  %s6427_s26 = sld [smem:[#allocation16_spill]] }
 0x37f   : > { %v2105_v6 = vpop.f32.mrf.mxu1  ;;  %4814 = vmatpush.msk.msrb.mxu2 %vm2434_vm6, %v4813_v2 }
 0x380   : > { %2188 = vmatpush.msra.mxu3 %v1997_v62 }
 0x382   : > { %2189 = vmatpush.msra.mxu3 %v1994_v58 }
 0x384   : > { %2190 = vmatpush.msra.mxu3 %v1991_v55  ;;  %v2029_v12 = vpop.f32.mrf.mxu3  ;;  %v2180_v55 = vpop.permute.xlu1 %2179  ;;  %s6428_s16 = smov %s6427_s26 }
 0x385   : > { %v2143_v5 = vpop.f32.mrf.mxu2 }
 0x386   : > { %2191 = vmatpush.msra.mxu3 %v1962_v1  ;;  %v2070_v13 = vpop.f32.mrf.mxu0 }
 0x387   : > { %v2108_v10 = vpop.f32.mrf.mxu1 }
 0x388   : > { %2192 = vmatpush.msra.mxu3 %v1959_v61  ;;  %v2185_v61 = vpop.permute.xlu2 %2184 }
 0x38a   : > { %2193 = vmatpush.msra.mxu3 %v1956_v57 }
 0x38c   : > { %2194 = vmatpush.msra.mxu3 %v1953_v54  ;;  %v2032_v17 = vpop.f32.mrf.mxu3 }
 0x38d   : > { %v2146_v8 = vpop.f32.mrf.mxu2 }
 0x38e   : > { %2195 = vmatpush.msra.mxu3 %v1924_v4  ;;  %v2073_v19 = vpop.f32.mrf.mxu0  ;;  %v4821_v4 = vld [vmem:[%s6426_s2 + $0x40] sm:$0x3f] }
 0x38f   : > { %v2111_v15 = vpop.f32.mrf.mxu1 }
 0x390   : > { %2196 = vmatpush.msra.mxu3 %v1921_v0 }
 0x392   : > { %2197 = vmatpush.msra.mxu3 %v1918_v60 }
 0x394   : > { %2198 = vmatpush.msra.mxu3 %v1915_v56  ;;  %v2035_v22 = vpop.f32.mrf.mxu3 }
 0x395   : > { %v2149_v11 = vpop.f32.mrf.mxu2 }
 0x396   : > { %2199 = vmatpush.msra.mxu3 %v1886_v7  ;;  %v2076_v23 = vpop.f32.mrf.mxu0  ;;  %v4812_v7 = vld [vmem:[%s6426_s2 + $0x20] sm:$0xff] }
 0x397   : > { %v2114_v20 = vpop.f32.mrf.mxu1  ;;  %2488 = vmatpush.msrb.mxu2 %v4812_v7 }
 0x398   : > { %2200 = vmatpush.msra.mxu3 %v1883_v3  ;;  %v2420_v3 = vld [vmem:[%s6426_s2 + $0x10] sm:$0x3f] }
 0x399   : > { %4806 = vmatpush.msk.msrb.mxu1 %vm2434_vm6, %v2420_v3 }
 0x39a   : > { %2201 = vmatpush.msra.mxu3 %v1880_v63 }
 0x39c   : > { %2202 = vmatpush.msra.mxu3 %v1877_v59  ;;  %v2038_v25 = vpop.f32.mrf.mxu3 }
 0x39d   : > { %v2152_v16 = vpop.f32.mrf.mxu2  ;;  %2203 = vmatmul.f32.vlgmr.msra.gmra.mxu3 %v2155_v14 }
 0x39e   : > { %2216 = vmatpush.msrb.mxu0 %v2152_v16  ;;  %4793 = vmatpush.msk.msrb.mxu3 %vm2265_vm4, %v4792_v31  ;;  %v4845_v16 = vld [vmem:[%s6426_s2 + $0x88] sm:$0x3f] }
 0x3a0   : > { %2217 = vmatpush.msrb.mxu0 %v2149_v11  ;;  %2359 = vmatpush.msrb.mxu3 %v4791_v36  ;;  %v4811_v11 = vld [vmem:[%s6426_s2 + $0x18] sm:$0xff] }
 0x3a1   : > { %2489 = vmatpush.msrb.mxu2 %v4811_v11  ;;  %v2650_v11 = vld [vmem:[%s6428_s16 + $0x18] sm:$0xff] }
 0x3a2   : > { %2218 = vmatpush.msrb.mxu0 %v2146_v8  ;;  %2360 = vmatpush.msrb.mxu3 %v4790_v40  ;;  %v4820_v8 = vld [vmem:[%s6426_s2 + $0x38] sm:$0xff] }
 0x3a4   : > { %2219 = vmatpush.msrb.mxu0 %v2143_v5  ;;  %v4829_v5 = vld [vmem:[%s6426_s2 + $0x58] sm:$0x3f]  ;;  %4822 = vmatpush.msk.msra.mxu3 %vm2434_vm6, %v4821_v4 }
 0x3a5   : > { %2206 = vmatmul.f32.gmra.mxu3 %v2157_v18  ;;  %v4836_v18 = vld [vmem:[%s6426_s2 + $0x68] sm:$0xff] }
 0x3a6   : > { %2220 = vmatpush.msrb.mxu0 %v2114_v20  ;;  %2524 = vmatpush.msra.mxu3 %v4820_v8  ;;  %v4844_v20 = vld [vmem:[%s6426_s2 + $0x80] sm:$0xff]  ;;  %v2649_v8 = vld [vmem:[%s6428_s16 + $0x10] sm:$0xff] }
 0x3a8   : > { %2221 = vmatpush.msrb.mxu0 %v2111_v15 }
 0x3aa   : > { %2222 = vmatpush.msrb.mxu0 %v2108_v10  ;;  %v2418_v10 = vld [vmem:[%s6426_s2] sm:$0xff] }
 0x3ac   : > { %2223 = vmatpush.msrb.mxu0 %v2105_v6  ;;  %v2419_v6 = vld [vmem:[%s6426_s2 + $0x8] sm:$0xff] }
 0x3ad   : > { %2209 = vmatmul.f32.gmra.mxu3 %v2159_v21  ;;  %2452 = vmatpush.msrb.mxu1 %v2419_v6 }
 0x3ae   : > { %2224 = vmatpush.msrb.mxu0 %v2076_v23  ;;  %v4835_v23 = vld [vmem:[%s6426_s2 + $0x60] sm:$0xff] }
 0x3af   : > { %2453 = vmatpush.msrb.mxu1 %v2418_v10  ;;  %v2648_v10 = vld [vmem:[%s6428_s16 + $0x8] sm:$0xff] }
 0x3b0   : > { %2225 = vmatpush.msrb.mxu0 %v2073_v19 }
 0x3b2   : > { %2226 = vmatpush.msrb.mxu0 %v2070_v13  ;;  %v4827_v13 = vld [vmem:[%s6426_s2 + $0x48] sm:$0xff] }
 0x3b4   : > { %2227 = vmatpush.msrb.mxu0 %v2067_v9  ;;  %v4828_v9 = vld [vmem:[%s6426_s2 + $0x50] sm:$0xff] }
 0x3b5   : > { %2212 = vmatmul.f32.gmra.mxu3 %v2161_v24  ;;  %v4843_v24 = vld [vmem:[%s6426_s2 + $0x78] sm:$0xff] }
 0x3b6   : > { %2228 = vmatpush.msrb.mxu0 %v2038_v25 }
 0x3b8   : > { %2229 = vmatpush.msrb.mxu0 %v2035_v22 }
 0x3ba   : > { %2230 = vmatpush.msrb.mxu0 %v2032_v17  ;;  %v4837_v17 = vld [vmem:[%s6426_s2 + $0x70] sm:$0x3f] }
 0x3bc   : > { %2231 = vmatpush.msrb.mxu0 %v2029_v12  ;;  %v4819_v12 = vld [vmem:[%s6426_s2 + $0x30] sm:$0xff] }
 0x3bd   : > { %2232 = vmatmul.f32.vlgmr.msrb.gmra.mxu0 %v2156_v26  ;;  %2525 = vmatpush.msra.mxu3 %v4819_v12  ;;  %v4867_v12 = vld [vmem:[%s6429_s1 + $0x38] sm:$0x3] }
 0x3be   : > { %4801 = vmatpush.msk.msra.mxu0 %vm2265_vm4, %v4800_v33 }
 0x3c0   : > { %2395 = vmatpush.msra.mxu0 %v4799_v37 }
 0x3c2   : > { %2396 = vmatpush.msra.mxu0 %v4798_v41 }
 0x3c4   : > { %4830 = vmatpush.msk.msrb.mxu0 %vm2434_vm6, %v4829_v5  ;;  %v2647_v5 = vld [vmem:[%s6427_s26] sm:$0xff]  ;;  %s6430_s26 = sld [smem:[#allocation19_spill]] }
 0x3c5   : > { %2235 = vmatmul.f32.gmra.mxu0 %v2158_v27 }
 0x3c6   : > { %2560 = vmatpush.msrb.mxu0 %v4828_v9 }
 0x3c8   : > { %2561 = vmatpush.msrb.mxu0 %v4827_v13  ;;  %v2718_v13 = vld [vmem:[%s6429_s1 + $0x8] sm:$0x3] }
 0x3ca   : > { %s6431_s2 = smov %s6430_s26 }
 0x3cd   : > { %2238 = vmatmul.f32.gmra.mxu0 %v2160_v28 }
 0x3d5   : > { %2241 = vmatmul.f32.gmra.mxu0 %v2162_v29 }
 0x420   : > { %v2204_v42 = vpop.f32.mrf.mxu3 }
 0x421   : > { %v2205_v44 = vadd.f32 %v2204_v42, %v2170_v43 }
 0x428   : > { %v2207_v45 = vpop.f32.mrf.mxu3 }
 0x429   : > { %v2208_v50 = vadd.f32 %v2207_v45, %v2175_v49 }
 0x430   : > { %v2210_v53 = vpop.f32.mrf.mxu3 }
 0x431   : > { %v2211_v56 = vadd.f32 %v2210_v53, %v2180_v55 }
 0x438   : > { %v2213_v60 = vpop.f32.mrf.mxu3 }
 0x439   : > { %v2214_v62 = vadd.f32 %v2213_v60, %v2185_v61 }
 0x43a   : > { %v2233_v46 = vpop.f32.mrf.mxu0 }
 0x43b   : > { %v2234_v47 = vadd.f32 %v2233_v46, %v2205_v44 }
 0x43d   : > { %v2245_v48 = vmax.f32 %v2234_v47, 0.0 }
 0x43f   : > { %4778 = vmatmul.msk.f32.vlgmr.msra.gmra.mxu1 %vm2252_vm5, %v2245_v48  ;;  %4786 = vmatmul.msk.f32.vlgmr.msra.gmra.mxu2 %vm2252_vm5, %v2245_v48 }
 0x440   : > { %4794 = vmatmul.msk.f32.vlgmr.msrb.gmra.mxu3 %vm2252_vm5, %v2245_v48  ;;  %4802 = vmatmul.msk.f32.vlgmr.msra.gmra.mxu0 %vm2252_vm5, %v2245_v48 }
 0x441   : > { %4846 = vmatpush.msk.msra.mxu2 %vm2434_vm6, %v4845_v16  ;;  %4838 = vmatpush.msk.msra.mxu1 %vm2434_vm6, %v4837_v17  ;;  %v2717_v16 = vld [vmem:[%s6429_s1] sm:$0xff]  ;;  %v4856_v17 = vld [vmem:[%s6429_s1 + $0x10] sm:$0xff] }
 0x442   : > { %v2236_v51 = vpop.f32.mrf.mxu0 }
 0x443   : > { %v2237_v52 = vadd.f32 %v2236_v51, %v2208_v50  ;;  %2596 = vmatpush.msra.mxu1 %v4836_v18  ;;  %2632 = vmatpush.msra.mxu2 %v4844_v20  ;;  %v4861_v18 = vld [vmem:[%s6429_s1 + $0x20] sm:$0xff] }
 0x445   : > { %v2246_v54 = vmax.f32 %v2237_v52, 0.0  ;;  %2597 = vmatpush.msra.mxu1 %v4835_v23  ;;  %2633 = vmatpush.msra.mxu2 %v4843_v24 }
 0x447   : > { %4779 = vmatmul.msk.f32.gmra.mxu1 %vm2252_vm5, %v2246_v54  ;;  %4787 = vmatmul.msk.f32.gmra.mxu2 %vm2252_vm5, %v2246_v54 }
 0x448   : > { %4795 = vmatmul.msk.f32.gmra.mxu3 %vm2252_vm5, %v2246_v54  ;;  %4803 = vmatmul.msk.f32.gmra.mxu0 %vm2252_vm5, %v2246_v54 }
 0x44a   : > { %v2239_v57 = vpop.f32.mrf.mxu0 }
 0x44b   : > { %v2240_v58 = vadd.f32 %v2239_v57, %v2211_v56 }
 0x44d   : > { %v2247_v59 = vmax.f32 %v2240_v58, 0.0 }
 0x44f   : > { %4780 = vmatmul.msk.f32.gmra.mxu1 %vm2252_vm5, %v2247_v59  ;;  %4788 = vmatmul.msk.f32.gmra.mxu2 %vm2252_vm5, %v2247_v59 }
 0x450   : > { %4796 = vmatmul.msk.f32.gmra.mxu3 %vm2252_vm5, %v2247_v59  ;;  %4804 = vmatmul.msk.f32.gmra.mxu0 %vm2252_vm5, %v2247_v59 }
 0x452   : > { %v2242_v63 = vpop.f32.mrf.mxu0 }
 0x453   : > { %v2243_v0 = vadd.f32 %v2242_v63, %v2214_v62 }
 0x455   : > { %v2248_v1 = vmax.f32 %v2243_v0, 0.0 }
 0x457   : > { %4781 = vmatmul.msk.f32.gmra.mxu1 %vm2252_vm5, %v2248_v1  ;;  %4789 = vmatmul.msk.f32.gmra.mxu2 %vm2252_vm5, %v2248_v1 }
 0x458   : > { %4797 = vmatmul.msk.f32.gmra.mxu3 %vm2252_vm5, %v2248_v1  ;;  %4805 = vmatmul.msk.f32.gmra.mxu0 %vm2252_vm5, %v2248_v1 }
 0x4bc   : > { %v2286_v14 = vpop.f32.mrf.mxu1 }
 0x4bd   : > { %v2398_v15 = vpop.f32.mrf.mxu0 }
 0x4c2   : > { %v2322_v19 = vpop.f32.mrf.mxu2 }
 0x4c3   : > { %v2334_v21 = vmax.f32 %v2286_v14, %v2322_v19  ;;  %v2362_v22 = vpop.f32.mrf.mxu3  ;;  %v4857_v14 = vld [vmem:[%s6429_s1 + $0x18] sm:$0x3]  ;;  %v4866_v19 = vld [vmem:[%s6429_s1 + $0x30] sm:$0xff] }
 0x4c4   : > { %v2410_v25 = vmax.f32 %v2362_v22, %v2398_v15  ;;  %v2289_v27 = vpop.f32.mrf.mxu1  ;;  %v4862_v15 = vld [vmem:[%s6429_s1 + $0x28] sm:$0x3]  ;;  %s6433_s1 = sld [smem:[#allocation22_spill]] }
 0x4c5   : > { %v2401_v28 = vpop.f32.mrf.mxu0 }
 0x4c6   : > { %v2414_v26 = vmax.f32 %v2334_v21, %v2410_v25  ;;  %v2656_v21 = vpop.permute.xlu0 %2655 }
 0x4c8   : > { %4807 = vmatmul.msk.f32.vlgmr.msrb.gmra.mxu1 %vm2421_vm7, %v2414_v26  ;;  %4815 = vmatmul.msk.f32.vlgmr.msrb.gmra.mxu2 %vm2421_vm7, %v2414_v26 }
 0x4c9   : > { %4823 = vmatmul.msk.f32.vlgmr.msra.gmra.mxu3 %vm2421_vm7, %v2414_v26  ;;  %4831 = vmatmul.msk.f32.vlgmr.msrb.gmra.mxu0 %vm2421_vm7, %v2414_v26 }
 0x4ca   : > { %v2325_v29 = vpop.f32.mrf.mxu2  ;;  %4868 = vmatpush.msk.msrb.mxu2 %vm2726_vm8, %v4867_v12  ;;  %4863 = vmatpush.msk.msrb.mxu1 %vm2726_vm8, %v4862_v15 }
 0x4cb   : > { %v2335_v30 = vmax.f32 %v2289_v27, %v2325_v29  ;;  %v2365_v31 = vpop.f32.mrf.mxu3  ;;  %v2661_v27 = vpop.permute.xlu1 %2660 }
 0x4cc   : > { %v2411_v32 = vmax.f32 %v2365_v31, %v2401_v28  ;;  %v2292_v34 = vpop.f32.mrf.mxu1  ;;  %2805 = vmatpush.msrb.mxu1 %v4861_v18  ;;  %2834 = vmatpush.msrb.mxu2 %v4866_v19 }
 0x4cd   : > { %v2404_v35 = vpop.f32.mrf.mxu0 }
 0x4ce   : > { %v2415_v33 = vmax.f32 %v2335_v30, %v2411_v32  ;;  %v2847_v32 = vld [vmem:[%s6430_s26 + $0x8] sm:$0x7]  ;;  %s6432_s26 = sld [smem:[#allocation20_spill]] }
 0x4d0   : > { %4808 = vmatmul.msk.f32.gmra.mxu1 %vm2421_vm7, %v2415_v33  ;;  %4816 = vmatmul.msk.f32.gmra.mxu2 %vm2421_vm7, %v2415_v33 }
 0x4d1   : > { %4824 = vmatmul.msk.f32.gmra.mxu3 %vm2421_vm7, %v2415_v33  ;;  %4832 = vmatmul.msk.f32.gmra.mxu0 %vm2421_vm7, %v2415_v33 }
 0x4d2   : > { %v2328_v36 = vpop.f32.mrf.mxu2 }
 0x4d3   : > { %v2336_v37 = vmax.f32 %v2292_v34, %v2328_v36  ;;  %v2368_v38 = vpop.f32.mrf.mxu3  ;;  %v4880_v34 = vld [vmem:[%s6431_s2 + $0x28] sm:$0x7]  ;;  %v2846_v36 = vld [vmem:[%s6431_s2] sm:$0xff] }
 0x4d4   : > { %v2412_v39 = vmax.f32 %v2368_v38, %v2404_v35  ;;  %v2295_v41 = vpop.f32.mrf.mxu1  ;;  %v4885_v35 = vld [vmem:[%s6431_s2 + $0x38] sm:$0x7]  ;;  %v4879_v38 = vld [vmem:[%s6431_s2 + $0x20] sm:$0xff] }
 0x4d5   : > { %v2407_v43 = vpop.f32.mrf.mxu0 }
 0x4d6   : > { %v2416_v40 = vmax.f32 %v2336_v37, %v2412_v39  ;;  %v4874_v37 = vld [vmem:[%s6431_s2 + $0x10] sm:$0xff] }
 0x4d7   : > { %v4884_v39 = vld [vmem:[%s6431_s2 + $0x30] sm:$0xff] }
 0x4d8   : > { %4809 = vmatmul.msk.f32.gmra.mxu1 %vm2421_vm7, %v2416_v40  ;;  %4817 = vmatmul.msk.f32.gmra.mxu2 %vm2421_vm7, %v2416_v40 }
 0x4d9   : > { %4825 = vmatmul.msk.f32.gmra.mxu3 %vm2421_vm7, %v2416_v40  ;;  %4833 = vmatmul.msk.f32.gmra.mxu0 %vm2421_vm7, %v2416_v40 }
 0x4da   : > { %v2331_v42 = vpop.f32.mrf.mxu2 }
 0x4db   : > { %v2337_v44 = vmax.f32 %v2295_v41, %v2331_v42  ;;  %v2371_v45 = vpop.f32.mrf.mxu3 }
 0x4dc   : > { %v2413_v46 = vmax.f32 %v2371_v45, %v2407_v43 }
 0x4de   : > { %v2417_v47 = vmax.f32 %v2337_v44, %v2413_v46 }
 0x4e0   : > { %4810 = vmatmul.msk.f32.gmra.mxu1 %vm2421_vm7, %v2417_v47  ;;  %4818 = vmatmul.msk.f32.gmra.mxu2 %vm2421_vm7, %v2417_v47 }
 0x4e1   : > { %4826 = vmatmul.msk.f32.gmra.mxu3 %vm2421_vm7, %v2417_v47  ;;  %4834 = vmatmul.msk.f32.gmra.mxu0 %vm2421_vm7, %v2417_v47 }
 0x4e8   : > { %4839 = vmatmul.msk.f32.vlgmr.msra.gmra.mxu1 %vm2421_vm7, %v2414_v26  ;;  %4847 = vmatmul.msk.f32.vlgmr.msra.gmra.mxu2 %vm2421_vm7, %v2414_v26 }
 0x4e9   : > { %4881 = vmatpush.msk.msra.mxu1 %vm2855_vm10, %v4880_v34  ;;  %4886 = vmatpush.msk.msra.mxu2 %vm2855_vm10, %v4885_v35  ;;  %v4932_v34 = vld [vmem:[%s6437_s5 + $0x40] sm:$0xff]  ;;  %v4937_v35 = vld [vmem:[%s6437_s5 + $0x50] sm:$0xff] }
 0x4eb   : > { %2932 = vmatpush.msra.mxu1 %v4879_v38  ;;  %2961 = vmatpush.msra.mxu2 %v4884_v39 }
 0x4f0   : > { %4840 = vmatmul.msk.f32.gmra.mxu1 %vm2421_vm7, %v2415_v33  ;;  %4848 = vmatmul.msk.f32.gmra.mxu2 %vm2421_vm7, %v2415_v33  ;;  %v4875_v33 = vld [vmem:[%s6431_s2 + $0x18] sm:$0x7]  ;;  %s6434_s2 = sld [smem:[#allocation23_spill]] }
 0x4f8   : > { %4841 = vmatmul.msk.f32.gmra.mxu1 %vm2421_vm7, %v2416_v40  ;;  %4849 = vmatmul.msk.f32.gmra.mxu2 %vm2421_vm7, %v2416_v40 }
 0x500   : > { %4842 = vmatmul.msk.f32.gmra.mxu1 %vm2421_vm7, %v2417_v47  ;;  %4850 = vmatmul.msk.f32.gmra.mxu2 %vm2421_vm7, %v2417_v47 }
 0x545   : > { %v2455_v48 = vpop.f32.mrf.mxu1 }
 0x546   : > { %v2563_v49 = vpop.f32.mrf.mxu0 }
 0x54b   : > { %v2491_v50 = vpop.f32.mrf.mxu2 }
 0x54c   : > { %v2527_v51 = vpop.f32.mrf.mxu3 }
 0x54d   : > { %v2458_v53 = vpop.f32.mrf.mxu1 }
 0x54e   : > { %v2566_v52 = vpop.f32.mrf.mxu0 }
 0x553   : > { %v2494_v54 = vpop.f32.mrf.mxu2 }
 0x554   : > { %v2530_v55 = vpop.f32.mrf.mxu3 }
 0x555   : > { %v2461_v57 = vpop.f32.mrf.mxu1 }
 0x556   : > { %v2569_v56 = vpop.f32.mrf.mxu0 }
 0x55b   : > { %v2497_v58 = vpop.f32.mrf.mxu2 }
 0x55c   : > { %v2533_v59 = vpop.f32.mrf.mxu3 }
 0x55d   : > { %v2464_v61 = vpop.f32.mrf.mxu1 }
 0x55e   : > { %v2572_v60 = vpop.f32.mrf.mxu0 }
 0x55f   : > { %2669 = vmatpush.msrb.mxu3 %v2572_v60 }
 0x561   : > { %2670 = vmatpush.msrb.mxu3 %v2569_v56 }
 0x563   : > { %2671 = vmatpush.msrb.mxu3 %v2566_v52  ;;  %v2500_v62 = vpop.f32.mrf.mxu2 }
 0x564   : > { %v2536_v63 = vpop.f32.mrf.mxu3 }
 0x565   : > { %2672 = vmatpush.msrb.mxu3 %v2563_v49  ;;  %v2599_v1 = vpop.f32.mrf.mxu1 }
 0x567   : > { %2673 = vmatpush.msrb.mxu3 %v2536_v63  ;;  %v3000_v63 = vld [vmem:[%s6433_s1] sm:$0x1f] }
 0x569   : > { %2674 = vmatpush.msrb.mxu3 %v2533_v59 }
 0x56b   : > { %2675 = vmatpush.msrb.mxu3 %v2530_v55  ;;  %v2635_v0 = vpop.f32.mrf.mxu2 }
 0x56d   : > { %2676 = vmatpush.msrb.mxu3 %v2527_v51  ;;  %v2602_v3 = vpop.f32.mrf.mxu1 }
 0x56f   : > { %2677 = vmatpush.msrb.mxu3 %v2500_v62  ;;  %v2969_v62 = vld [vmem:[%s6432_s26] sm:$0xff]  ;;  %s4640_s26 = sshll.u32 %s5703_s22, 3  ;;  %s6439_s22 = sld [smem:[#allocation27_spill]] }
 0x570   : > { %s1106_s4 = scalar_lea.vmem %s6435_s3, %s4640_s26  ;;  %s6441_s26 = sld [smem:[#allocation28_spill]] }
 0x571   : > { %2678 = vmatpush.msrb.mxu3 %v2497_v58 }
 0x573   : > { %2679 = vmatpush.msrb.mxu3 %v2494_v54  ;;  %v2638_v2 = vpop.f32.mrf.mxu2 }
 0x575   : > { %2680 = vmatpush.msrb.mxu3 %v2491_v50  ;;  %v2605_v6 = vpop.f32.mrf.mxu1 }
 0x577   : > { %2681 = vmatpush.msrb.mxu3 %v2464_v61 }
 0x579   : > { %2682 = vmatpush.msrb.mxu3 %v2461_v57 }
 0x57b   : > { %2683 = vmatpush.msrb.mxu3 %v2458_v53  ;;  %v2641_v4 = vpop.f32.mrf.mxu2 }
 0x57d   : > { %2684 = vmatpush.msrb.mxu3 %v2455_v48  ;;  %v2608_v9 = vpop.f32.mrf.mxu1 }
 0x57e   : > { %2685 = vmatmul.f32.vlgmr.msrb.gmra.mxu3 %v2647_v5 }
 0x57f   : > { %4853 = vmatpush.msk.msra.mxu3 %vm2726_vm8, %v2718_v13 }
 0x581   : > { %2745 = vmatpush.msra.mxu3 %v2717_v16 }
 0x583   : > { %v2644_v7 = vpop.f32.mrf.mxu2  ;;  %4871 = vmatpush.msk.msrb.mxu3 %vm2855_vm10, %v2847_v32  ;;  %v4933_v32 = vld [vmem:[%s6437_s5 + $0x48] sm:$0xf] }
 0x584   : > { %2700 = vmatpush.msra.mxu0 %v2644_v7  ;;  %v3108_v7 = vld [vmem:[%s6434_s2] sm:$0x3f] }
 0x585   : > { %2874 = vmatpush.msrb.mxu3 %v2846_v36  ;;  %v3217_v36 = vpop.permute.xlu0 %3216 }
 0x586   : > { %2688 = vmatmul.f32.gmra.mxu3 %v2649_v8  ;;  %2701 = vmatpush.msra.mxu0 %v2641_v4  ;;  %v4903_v8 = vld [vmem:[%s6434_s2 + $0x8] sm:$0x3f] }
 0x588   : > { %2702 = vmatpush.msra.mxu0 %v2638_v2  ;;  %v4895_v2 = vld [vmem:[%s6433_s1 + $0x10] sm:$0x1f] }
 0x58a   : > { %2703 = vmatpush.msra.mxu0 %v2635_v0  ;;  %v4892_v0 = vld [vmem:[%s6433_s1 + $0x8] sm:$0x1f] }
 0x58c   : > { %2704 = vmatpush.msra.mxu0 %v2608_v9  ;;  %v4906_v9 = vld [vmem:[%s6434_s2 + $0x10] sm:$0x3f] }
 0x58e   : > { %2705 = vmatpush.msra.mxu0 %v2605_v6 }
 0x590   : > { %2706 = vmatpush.msra.mxu0 %v2602_v3  ;;  %v2974_v3 = vpop.permute.xlu2 %2973 }
 0x592   : > { %2707 = vmatpush.msra.mxu0 %v2599_v1  ;;  %v4898_v1 = vld [vmem:[%s6433_s1 + $0x18] sm:$0x1f]  ;;  %s6436_s1 = sld [smem:[#allocation24_spill]] }
 0x593   : > { %4851 = vmatmul.msk.f32.vlgmr.msra.gmra.mxu0 %vm1847_vm3, %v2648_v10  ;;  %v4909_v10 = vld [vmem:[%s6434_s2 + $0x18] sm:$0x3f] }
 0x594   : > { %4858 = vmatpush.msk.msrb.mxu0 %vm2726_vm8, %v4857_v14 }
 0x596   : > { %2774 = vmatpush.msrb.mxu0 %v4856_v17 }
 0x598   : > { %4876 = vmatpush.msk.msra.mxu0 %vm2855_vm10, %v4875_v33  ;;  %v4938_v33 = vld [vmem:[%s6437_s5 + $0x58] sm:$0xf] }
 0x59a   : > { %2903 = vmatpush.msra.mxu0 %v4874_v37 }
 0x59b   : > { %4852 = vmatmul.msk.f32.gmra.mxu0 %vm1847_vm3, %v2650_v11 }
 0x601   : > { %v2686_v20 = vpop.f32.mrf.mxu3 }
 0x602   : > { %v2687_v22 = vadd.f32 %v2686_v20, %v2656_v21  ;;  %v3210_v21 = vld [vmem:[%s6436_s1] sm:$0xff] }
 0x609   : > { %v2689_v26 = vpop.f32.mrf.mxu3 }
 0x60a   : > { %v2690_v28 = vadd.f32 %v2689_v26, %v2661_v27  ;;  %v4923_v26 = vld [vmem:[%s6437_s5 + $0x28] sm:$0xf]  ;;  %v4928_v27 = vld [vmem:[%s6437_s5 + $0x38] sm:$0xf] }
 0x610   : > { %v2709_v23 = vpop.f32.mrf.mxu0 }
 0x611   : > { %v2710_v24 = vadd.f32 %v2709_v23, %v2687_v22  ;;  %v3211_v23 = vld [vmem:[%s6436_s1 + $0x8] sm:$0xff]  ;;  %s6440_s1 = smov %s6439_s22 }
 0x613   : > { %v2715_v25 = vmax.f32 %v2710_v24, 0.0  ;;  %v3256_v24 = vld [vmem:[%s6437_s5 + $0x8] sm:$0xf] }
 0x615   : > { %4854 = vmatmul.msk.f32.vlgmr.msra.gmra.mxu3 %vm2719_vm9, %v2715_v25  ;;  %4859 = vmatmul.msk.f32.vlgmr.msrb.gmra.mxu0 %vm2719_vm9, %v2715_v25 }
 0x616   : > { %4864 = vmatmul.msk.f32.vlgmr.msrb.gmra.mxu1 %vm2719_vm9, %v2715_v25  ;;  %4869 = vmatmul.msk.f32.vlgmr.msrb.gmra.mxu2 %vm2719_vm9, %v2715_v25  ;;  %v4918_v25 = vld [vmem:[%s6437_s5 + $0x18] sm:$0xf] }
 0x617   : > { %4890 = vmatpush.msk.msrb.mxu0 %vm2265_vm4, %v3000_v63  ;;  %4899 = vmatpush.msk.msrb.mxu1 %vm2265_vm4, %v4898_v1  ;;  %v4961_v63 = vld [vmem:[%s6440_s1 + $0x40] sm:$0x3f] }
 0x618   : > { %v2712_v29 = vpop.f32.mrf.mxu0  ;;  %4901 = vmatpush.msk.msrb.mxu2 %vm2434_vm6, %v3108_v7  ;;  %v4952_v1 = vld [vmem:[%s6440_s1 + $0x20] sm:$0xff]  ;;  %v4967_v7 = vld [vmem:[%s6440_s1 + $0x48] sm:$0xff] }
 0x619   : > { %v2713_v30 = vadd.f32 %v2712_v29, %v2690_v28  ;;  %v3255_v28 = vld [vmem:[%s6437_s5] sm:$0xff]  ;;  %v4917_v29 = vld [vmem:[%s6437_s5 + $0x10] sm:$0xff] }
 0x61b   : > { %v2716_v31 = vmax.f32 %v2713_v30, 0.0  ;;  %v4922_v30 = vld [vmem:[%s6437_s5 + $0x20] sm:$0xff] }
 0x61d   : > { %4855 = vmatmul.msk.f32.gmra.mxu3 %vm2719_vm9, %v2716_v31  ;;  %4860 = vmatmul.msk.f32.gmra.mxu0 %vm2719_vm9, %v2716_v31 }
 0x61e   : > { %4865 = vmatmul.msk.f32.gmra.mxu1 %vm2719_vm9, %v2716_v31  ;;  %4870 = vmatmul.msk.f32.gmra.mxu2 %vm2719_vm9, %v2716_v31  ;;  %v4927_v31 = vld [vmem:[%s6437_s5 + $0x30] sm:$0xff] }
 0x692   : > { %v2776_v40 = vpop.f32.mrf.mxu0 }
 0x693   : > { %v2807_v41 = vpop.f32.mrf.mxu1 }
 0x698   : > { %v2747_v42 = vpop.f32.mrf.mxu3 }
 0x699   : > { %v2782_v43 = vmax.f32 %v2747_v42, %v2776_v40  ;;  %v2836_v44 = vpop.f32.mrf.mxu2  ;;  %v3222_v40 = vpop.permute.xlu1 %3221 }
 0x69a   : > { %v2842_v45 = vmax.f32 %v2807_v41, %v2836_v44  ;;  %v2779_v47 = vpop.f32.mrf.mxu0 }
 0x69b   : > { %v2810_v49 = vpop.f32.mrf.mxu1 }
 0x69c   : > { %v2844_v46 = vmax.f32 %v2782_v43, %v2842_v45 }
 0x69e   : > { %4872 = vmatmul.msk.f32.vlgmr.msrb.gmra.mxu3 %vm2848_vm11, %v2844_v46  ;;  %4877 = vmatmul.msk.f32.vlgmr.msra.gmra.mxu0 %vm2848_vm11, %v2844_v46 }
 0x69f   : > { %4882 = vmatmul.msk.f32.vlgmr.msra.gmra.mxu1 %vm2848_vm11, %v2844_v46  ;;  %4887 = vmatmul.msk.f32.vlgmr.msra.gmra.mxu2 %vm2848_vm11, %v2844_v46 }
 0x6a0   : > { %v2750_v48 = vpop.f32.mrf.mxu3  ;;  %4896 = vmatpush.msk.msra.mxu0 %vm2265_vm4, %v4895_v2  ;;  %4910 = vmatpush.msk.msra.mxu1 %vm2434_vm6, %v4909_v10  ;;  %v4960_v2 = vld [vmem:[%s6440_s1 + $0x38] sm:$0xff]  ;;  %v4985_v10 = vld [vmem:[%s6440_s1 + $0x88] sm:$0x3f] }
 0x6a1   : > { %v2783_v50 = vmax.f32 %v2750_v48, %v2779_v47  ;;  %v2839_v51 = vpop.f32.mrf.mxu2 }
 0x6a2   : > { %v2843_v52 = vmax.f32 %v2810_v49, %v2839_v51 }
 0x6a4   : > { %v2845_v53 = vmax.f32 %v2783_v50, %v2843_v52 }
 0x6a6   : > { %4873 = vmatmul.msk.f32.gmra.mxu3 %vm2848_vm11, %v2845_v53  ;;  %4878 = vmatmul.msk.f32.gmra.mxu0 %vm2848_vm11, %v2845_v53 }
 0x6a7   : > { %4883 = vmatmul.msk.f32.gmra.mxu1 %vm2848_vm11, %v2845_v53  ;;  %4888 = vmatmul.msk.f32.gmra.mxu2 %vm2848_vm11, %v2845_v53 }
 0x71b   : > { %v2905_v56 = vpop.f32.mrf.mxu0 }
 0x71c   : > { %v2934_v55 = vpop.f32.mrf.mxu1 }
 0x721   : > { %v2876_v58 = vpop.f32.mrf.mxu3 }
 0x722   : > { %v2963_v54 = vpop.f32.mrf.mxu2 }
 0x723   : > { %v2908_v60 = vpop.f32.mrf.mxu0 }
 0x724   : > { %v2937_v59 = vpop.f32.mrf.mxu1 }
 0x729   : > { %v2879_v61 = vpop.f32.mrf.mxu3 }
 0x72a   : > { %v2966_v57 = vpop.f32.mrf.mxu2 }
 0x72b   : > { %2987 = vmatpush.msra.mxu3 %v2966_v57  ;;  %v4969_v57 = vld [vmem:[%s6439_s22 + $0x58] sm:$0x3f]  ;;  %s6443_s22 = sld [smem:[#allocation29_spill]] }
 0x72d   : > { %2988 = vmatpush.msra.mxu3 %v2963_v54 }
 0x72f   : > { %2989 = vmatpush.msra.mxu3 %v2937_v59 }
 0x731   : > { %2990 = vmatpush.msra.mxu3 %v2934_v55  ;;  %s6444_s2 = smov %s6443_s22 }
 0x733   : > { %2991 = vmatpush.msra.mxu3 %v2908_v60 }
 0x735   : > { %2992 = vmatpush.msra.mxu3 %v2905_v56 }
 0x737   : > { %2993 = vmatpush.msra.mxu3 %v2879_v61  ;;  %v3512_v61 = vld [vmem:[%s6440_s1 + $0x10] sm:$0x3f] }
 0x739   : > { %2994 = vmatpush.msra.mxu3 %v2876_v58 }
 0x73a   : > { %4889 = vmatmul.msk.f32.vlgmr.msra.gmra.mxu3 %vm1847_vm3, %v2969_v62  ;;  %v4953_v62 = vld [vmem:[%s6440_s1 + $0x28] sm:$0x3f]  ;;  %vm3912_vm3 = vcmask 531456  }
 0x73b   : > { %4893 = vmatpush.msk.msrb.mxu3 %vm2265_vm4, %v4892_v0  ;;  %v3511_v0 = vld [vmem:[%s6440_s1 + $0x8] sm:$0xff] }
 0x73d   : > { %4904 = vmatpush.msk.msra.mxu3 %vm2434_vm6, %v4903_v8  ;;  %v5001_v8 = vld [vmem:[%s6440_s1 + $0xb8] sm:$0x3f] }
 0x7bd   : > { %v2996_v4 = vpop.f32.mrf.mxu3 }
 0x7be   : > { %v2997_v5 = vadd.f32 %v2996_v4, %v2974_v3  ;;  %v4968_v3 = vld [vmem:[%s6440_s1 + $0x50] sm:$0xff]  ;;  %v3510_v4 = vld [vmem:[%s6440_s1] sm:$0xff] }
 0x7c0   : > { %v2999_v6 = vmax.f32 %v2997_v5, 0.0  ;;  %v4951_v5 = vld [vmem:[%s6440_s1 + $0x18] sm:$0xff] }
 0x7c2   : > { %4891 = vmatmul.msk.f32.vlgmr.msrb.gmra.mxu0 %vm3001_vm12, %v2999_v6  ;;  %4894 = vmatmul.msk.f32.vlgmr.msrb.gmra.mxu3 %vm3001_vm12, %v2999_v6 }
 0x7c3   : > { %4900 = vmatmul.msk.f32.vlgmr.msrb.gmra.mxu1 %vm3001_vm12, %v2999_v6  ;;  %4907 = vmatpush.msk.msrb.mxu0 %vm2434_vm6, %v4906_v9  ;;  %v4977_v9 = vld [vmem:[%s6440_s1 + $0x70] sm:$0x3f] }
 0x7c4   : > { %4914 = vmatpush.msk.msrb.mxu3 %vm3264_vm14, %v3256_v24  ;;  %4924 = vmatpush.msk.msrb.mxu1 %vm3264_vm14, %v4923_v26  ;;  %v3452_v24 = vpop.permute.xlu0 %3451 }
 0x7c6   : > { %3283 = vmatpush.msrb.mxu3 %v3255_v28  ;;  %3341 = vmatpush.msrb.mxu1 %v4922_v30  ;;  %v3457_v28 = vpop.permute.xlu1 %3456 }
 0x7ca   : > { %4897 = vmatmul.msk.f32.vlgmr.msra.gmra.mxu0 %vm3001_vm12, %v2999_v6  ;;  %v4959_v6 = vld [vmem:[%s6440_s1 + $0x30] sm:$0xff] }
 0x7cb   : > { %4919 = vmatpush.msk.msra.mxu0 %vm3264_vm14, %v4918_v25 }
 0x7cd   : > { %3312 = vmatpush.msra.mxu0 %v4917_v29 }
 0x83f   : > { %v3025_v11 = vpop.f32.mrf.mxu0 }
 0x840   : > { %v3101_v13 = vpop.f32.mrf.mxu1 }
 0x845   : > { %v3050_v12 = vpop.f32.mrf.mxu3 }
 0x846   : > { %v3053_v15 = vmax.f32 %v3025_v11, %v3050_v12  ;;  %v4993_v11 = vld [vmem:[%s6440_s1 + $0xa0] sm:$0x3f]  ;;  %v4976_v12 = vld [vmem:[%s6440_s1 + $0x68] sm:$0xff] }
 0x847   : > { %v3076_v14 = vpop.f32.mrf.mxu0 }
 0x848   : > { %v3104_v16 = vmax.f32 %v3076_v14, %v3101_v13  ;;  %v4984_v13 = vld [vmem:[%s6440_s1 + $0x80] sm:$0xff]  ;;  %v3447_v14 = vpop.permute.xlu2 %3446 }
 0x84a   : > { %v3105_v17 = vmax.f32 %v3053_v15, %v3104_v16  ;;  %v4992_v16 = vld [vmem:[%s6440_s1 + $0x98] sm:$0xff] }
 0x84c   : > { %3107 = vst.msk [vmem:[%s1106_s4] sm:$0xff] %vm3106_vm13, %v3105_v17  ;;  %4902 = vmatmul.msk.f32.vlgmr.msrb.gmra.mxu2 %vm3106_vm13, %v3105_v17  ;;  %4905 = vmatmul.msk.f32.vlgmr.msra.gmra.mxu3 %vm3106_vm13, %v3105_v17  ;;  %s6438_s4 = sld [smem:[#allocation26_spill]] }
 0x84d   : > { %4908 = vmatmul.msk.f32.vlgmr.msrb.gmra.mxu0 %vm3106_vm13, %v3105_v17  ;;  %4911 = vmatmul.msk.f32.vlgmr.msra.gmra.mxu1 %vm3106_vm13, %v3105_v17  ;;  %v5000_v17 = vld [vmem:[%s6440_s1 + $0xb0] sm:$0xff] }
 0x84e   : > { %4934 = vmatpush.msk.msra.mxu3 %vm3264_vm14, %v4933_v32  ;;  %4939 = vmatpush.msk.msrb.mxu0 %vm3264_vm14, %v4938_v33 }
 0x850   : > { %3399 = vmatpush.msra.mxu3 %v4932_v34  ;;  %3428 = vmatpush.msrb.mxu0 %v4937_v35  ;;  %v3462_v32 = vpop.permute.xlu2 %3461 }
 0x852   : > { %v3436_v56 = vld [vmem:[%s6438_s4] sm:$0xff]  ;;  %v3437_v58 = vld [vmem:[%s6438_s4 + $0x8] sm:$0xff]  ;;  %v3438_v59 = vld [vmem:[%s6438_s4 + $0x10] sm:$0xff] }
 0x853   : > { %v3439_v60 = vld [vmem:[%s6438_s4 + $0x18] sm:$0xff]  ;;  %s4420_s4 = scalar_lea.sflag [#allocation4], %s5738_s11 }
 0x8ca   : > { %v3207_v18 = vpop.f32.mrf.mxu1  ;;  %v3182_v19 = vpop.f32.mrf.mxu0 }
 0x8cb   : > { %3242 = vmatpush.msra.mxu2 %v3207_v18  ;;  %v4975_v18 = vld [vmem:[%s6440_s1 + $0x60] sm:$0xff] }
 0x8cd   : > { %3243 = vmatpush.msra.mxu2 %v3182_v19 }
 0x8cf   : > { %v3157_v20 = vpop.f32.mrf.mxu3  ;;  %v3132_v22 = vpop.f32.mrf.mxu2 }
 0x8d0   : > { %3244 = vmatpush.msra.mxu2 %v3157_v20  ;;  %v4983_v20 = vld [vmem:[%s6440_s1 + $0x78] sm:$0xff] }
 0x8d2   : > { %3245 = vmatpush.msra.mxu2 %v3132_v22  ;;  %v4999_v22 = vld [vmem:[%s6440_s1 + $0xa8] sm:$0xff] }
 0x8d3   : > { %4912 = vmatmul.msk.f32.vlgmr.msra.gmra.mxu2 %vm1139_vm0, %v3210_v21  ;;  %v4991_v21 = vld [vmem:[%s6440_s1 + $0x90] sm:$0xff]  ;;  %s6442_s1 = smov %s6441_s26 }
 0x8d4   : > { %4929 = vmatpush.msk.msrb.mxu2 %vm3264_vm14, %v4928_v27 }
 0x8d6   : > { %3370 = vmatpush.msrb.mxu2 %v4927_v31 }
 0x8d8   : > { %4946 = vmatpush.msk.msra.mxu2 %vm2434_vm6, %v3512_v61 }
 0x8da   : > { %3542 = vmatpush.msra.mxu2 %v3511_v0  ;;  %v3811_v0 = vld [vmem:[%s6442_s1 + $0x10] sm:$0xff] }
 0x8db   : > { %4913 = vmatmul.msk.f32.gmra.mxu2 %vm1139_vm0, %v3211_v23 }
 0x8dc   : > { %3543 = vmatpush.msra.mxu2 %v3510_v4 }
 0x956   : > { %v3247_v37 = vpop.f32.mrf.mxu2 }
 0x957   : > { %v3248_v38 = vadd.f32 %v3247_v37, %v3217_v36 }
 0x959   : > { %v3253_v39 = vmax.f32 %v3248_v38, 0.0 }
 0x95b   : > { %4915 = vmatmul.msk.f32.vlgmr.msrb.gmra.mxu3 %vm3257_vm15, %v3253_v39  ;;  %4920 = vmatmul.msk.f32.vlgmr.msra.gmra.mxu0 %vm3257_vm15, %v3253_v39 }
 0x95c   : > { %4925 = vmatmul.msk.f32.vlgmr.msrb.gmra.mxu1 %vm3257_vm15, %v3253_v39  ;;  %4930 = vmatmul.msk.f32.vlgmr.msrb.gmra.mxu2 %vm3257_vm15, %v3253_v39 }
 0x95d   : > { %4954 = vmatpush.msk.msrb.mxu3 %vm2434_vm6, %v4953_v62  ;;  %4962 = vmatpush.msk.msra.mxu0 %vm2434_vm6, %v4961_v63 }
 0x95e   : > { %v3250_v41 = vpop.f32.mrf.mxu2  ;;  %4978 = vmatpush.msk.msrb.mxu2 %vm2434_vm6, %v4977_v9  ;;  %v3812_v9 = vld [vmem:[%s6442_s1 + $0x18] sm:$0xff] }
 0x95f   : > { %v3251_v42 = vadd.f32 %v3250_v41, %v3222_v40  ;;  %3578 = vmatpush.msrb.mxu3 %v4952_v1  ;;  %3614 = vmatpush.msra.mxu0 %v4960_v2 }
 0x960   : > { %3686 = vmatpush.msrb.mxu2 %v4976_v12  ;;  %v3911_v12 = vld [vmem:[%s6443_s22 + $0x40] sm:$0x1]  ;;  %s6447_s22 = sld [smem:[#allocation31_spill]] }
 0x961   : > { %v3254_v43 = vmax.f32 %v3251_v42, 0.0  ;;  %3579 = vmatpush.msrb.mxu3 %v4951_v5  ;;  %3615 = vmatpush.msra.mxu0 %v4959_v6  ;;  %v3815_v6 = vld [vmem:[%s6442_s1 + $0x30] sm:$0xff] }
 0x962   : > { %3687 = vmatpush.msrb.mxu2 %v4975_v18  ;;  %v5033_v18 = vld [vmem:[%s6444_s2 + $0xc8] sm:$0xff] }
 0x963   : > { %4916 = vmatmul.msk.f32.gmra.mxu3 %vm3257_vm15, %v3254_v43  ;;  %4921 = vmatmul.msk.f32.gmra.mxu0 %vm3257_vm15, %v3254_v43 }
 0x964   : > { %4926 = vmatmul.msk.f32.gmra.mxu1 %vm3257_vm15, %v3254_v43  ;;  %4931 = vmatmul.msk.f32.gmra.mxu2 %vm3257_vm15, %v3254_v43 }
 0x96b   : > { %4935 = vmatmul.msk.f32.vlgmr.msra.gmra.mxu3 %vm3257_vm15, %v3253_v39  ;;  %4940 = vmatmul.msk.f32.vlgmr.msrb.gmra.mxu0 %vm3257_vm15, %v3253_v39 }
 0x96c   : > { %4986 = vmatpush.msk.msra.mxu3 %vm2434_vm6, %v4985_v10  ;;  %4994 = vmatpush.msk.msrb.mxu0 %vm2434_vm6, %v4993_v11  ;;  %v3814_v10 = vld [vmem:[%s6442_s1 + $0x28] sm:$0xff]  ;;  %v3816_v11 = vld [vmem:[%s6442_s1 + $0x38] sm:$0xff] }
 0x96e   : > { %3722 = vmatpush.msra.mxu3 %v4984_v13  ;;  %3758 = vmatpush.msrb.mxu0 %v4992_v16  ;;  %v5020_v13 = vld [vmem:[%s6444_s2 + $0x88] sm:$0x1]  ;;  %v5048_v16 = vld [vmem:[%s6444_s2 + $0x118] sm:$0x1] }
 0x970   : > { %3723 = vmatpush.msra.mxu3 %v4983_v20  ;;  %3759 = vmatpush.msrb.mxu0 %v4991_v21  ;;  %v3909_v20 = vld [vmem:[%s6444_s2 + $0x30] sm:$0xff]  ;;  %v5018_v21 = vld [vmem:[%s6444_s2 + $0x78] sm:$0xff] }
 0x973   : > { %4936 = vmatmul.msk.f32.gmra.mxu3 %vm3257_vm15, %v3254_v43  ;;  %4941 = vmatmul.msk.f32.gmra.mxu0 %vm3257_vm15, %v3254_v43 }
 0x9d8   : > { %v3314_v44 = vpop.f32.mrf.mxu0 }
 0x9d9   : > { %v3343_v52 = vpop.f32.mrf.mxu1 }
 0x9de   : > { %v3285_v45 = vpop.f32.mrf.mxu3 }
 0x9df   : > { %v3372_v50 = vpop.f32.mrf.mxu2 }
 0x9e0   : > { %v3317_v46 = vpop.f32.mrf.mxu0 }
 0x9e1   : > { %v3346_v55 = vpop.f32.mrf.mxu1 }
 0x9e6   : > { %v3288_v47 = vpop.f32.mrf.mxu3 }
 0x9e7   : > { %v3375_v54 = vpop.f32.mrf.mxu2 }
 0x9e8   : > { %v3430_v48 = vpop.f32.mrf.mxu0 }
 0x9ee   : > { %v3401_v49 = vpop.f32.mrf.mxu3 }
 0x9f0   : > { %v3433_v51 = vpop.f32.mrf.mxu0 }
 0x9f1   : > { %3481 = vmatpush.msra.mxu1 %v3433_v51 }
 0x9f3   : > { %3482 = vmatpush.msra.mxu1 %v3430_v48 }
 0x9f6   : > { %v3404_v53 = vpop.f32.mrf.mxu3 }
 0x9f7   : > { %3483 = vmatpush.msra.mxu1 %v3404_v53 }
 0x9f9   : > { %3484 = vmatpush.msra.mxu1 %v3401_v49 }
 0x9fb   : > { %3485 = vmatpush.msra.mxu1 %v3375_v54 }
 0x9fd   : > { %3486 = vmatpush.msra.mxu1 %v3372_v50 }
 0x9ff   : > { %3487 = vmatpush.msra.mxu1 %v3346_v55 }
 0xa01   : > { %3488 = vmatpush.msra.mxu1 %v3343_v52 }
 0xa03   : > { %3489 = vmatpush.msra.mxu1 %v3317_v46 }
 0xa05   : > { %3490 = vmatpush.msra.mxu1 %v3314_v44 }
 0xa07   : > { %3491 = vmatpush.msra.mxu1 %v3288_v47 }
 0xa09   : > { %3492 = vmatpush.msra.mxu1 %v3285_v45 }
 0xa0a   : > { %4942 = vmatmul.msk.f32.vlgmr.msra.gmra.mxu1 %vm3464_vm1, %v3436_v56 }
 0xa0b   : > { %4970 = vmatpush.msk.msrb.mxu1 %vm2434_vm6, %v4969_v57 }
 0xa0d   : > { %3650 = vmatpush.msrb.mxu1 %v4968_v3  ;;  %v3813_v3 = vld [vmem:[%s6442_s1 + $0x20] sm:$0xff] }
 0xa0f   : > { %3651 = vmatpush.msrb.mxu1 %v4967_v7 }
 0xa11   : > { %5002 = vmatpush.msk.msra.mxu1 %vm2434_vm6, %v5001_v8  ;;  %v3810_v8 = vld [vmem:[%s6442_s1 + $0x8] sm:$0xff] }
 0xa12   : > { %4943 = vmatmul.msk.f32.gmra.mxu1 %vm3464_vm1, %v3437_v58 }
 0xa13   : > { %3794 = vmatpush.msra.mxu1 %v5000_v17  ;;  %v5019_v17 = vld [vmem:[%s6444_s2 + $0x80] sm:$0xff] }
 0xa15   : > { %3795 = vmatpush.msra.mxu1 %v4999_v22  ;;  %v5032_v22 = vld [vmem:[%s6444_s2 + $0xc0] sm:$0xff] }
 0xa1a   : > { %4944 = vmatmul.msk.f32.gmra.mxu1 %vm3464_vm1, %v3438_v59 }
 0xa22   : > { %4945 = vmatmul.msk.f32.gmra.mxu1 %vm3464_vm1, %v3439_v60  ;;  %v3809_v60 = vld [vmem:[%s6441_s26] sm:$0xff]  ;;  %s6445_s26 = sld [smem:[#allocation30_spill]] }
 0xa28   : > { %s6446_s1 = smov %s6445_s26 }
 0xa87   : > { %v3494_v15 = vpop.f32.mrf.mxu1 }
 0xa88   : > { %v3495_v19 = vadd.f32 %v3494_v15, %v3447_v14  ;;  %v3910_v14 = vld [vmem:[%s6444_s2 + $0x38] sm:$0xff]  ;;  %v5034_v15 = vld [vmem:[%s6444_s2 + $0xd0] sm:$0x1] }
 0xa8a   : > { %v3506_v23 = vmax.f32 %v3495_v19, 0.0  ;;  %v5047_v19 = vld [vmem:[%s6444_s2 + $0x110] sm:$0xff] }
 0xa8c   : > { %4947 = vmatmul.msk.f32.vlgmr.msra.gmra.mxu2 %vm2421_vm7, %v3506_v23  ;;  %4955 = vmatmul.msk.f32.vlgmr.msrb.gmra.mxu3 %vm2421_vm7, %v3506_v23 }
 0xa8d   : > { %4963 = vmatmul.msk.f32.vlgmr.msra.gmra.mxu0 %vm2421_vm7, %v3506_v23  ;;  %4971 = vmatmul.msk.f32.vlgmr.msrb.gmra.mxu1 %vm2421_vm7, %v3506_v23 }
 0xa8e   : > { %5007 = vmatpush.msk.msra.mxu0 %vm3925_vm2, %v3911_v12  ;;  %5021 = vmatpush.msk.msrb.mxu1 %vm3925_vm2, %v5020_v13  ;;  %v5070_v12 = vld [vmem:[%s6444_s2 + $0x178] sm:$0xff] }
 0xa8f   : > { %v3497_v25 = vpop.f32.mrf.mxu1 }
 0xa90   : > { %v3498_v26 = vadd.f32 %v3497_v25, %v3452_v24  ;;  %3937 = vmatpush.msra.mxu0 %v3910_v14  ;;  %3979 = vmatpush.msrb.mxu1 %v5019_v17  ;;  %v3908_v24 = vld [vmem:[%s6444_s2 + $0x28] sm:$0xff]  ;;  %v5017_v25 = vld [vmem:[%s6444_s2 + $0x70] sm:$0xff] }
 0xa91   : > { %v5055_v17 = vld [vmem:[%s6444_s2 + $0x128] sm:$0xff] }
 0xa92   : > { %v3507_v27 = vmax.f32 %v3498_v26, 0.0  ;;  %3938 = vmatpush.msra.mxu0 %v3909_v20  ;;  %3980 = vmatpush.msrb.mxu1 %v5018_v21  ;;  %v5031_v26 = vld [vmem:[%s6444_s2 + $0xb8] sm:$0xff]  ;;  %v5097_v21 = vld [vmem:[%s6444_s2 + $0x200] sm:$0xff] }
 0xa93   : > { %v5083_v20 = vld [vmem:[%s6444_s2 + $0x1b8] sm:$0xff] }
 0xa94   : > { %4948 = vmatmul.msk.f32.gmra.mxu2 %vm2421_vm7, %v3507_v27  ;;  %4956 = vmatmul.msk.f32.gmra.mxu3 %vm2421_vm7, %v3507_v27 }
 0xa95   : > { %4964 = vmatmul.msk.f32.gmra.mxu0 %vm2421_vm7, %v3507_v27  ;;  %4972 = vmatmul.msk.f32.gmra.mxu1 %vm2421_vm7, %v3507_v27 }
 0xa96   : > { %3939 = vmatpush.msra.mxu0 %v3908_v24  ;;  %3981 = vmatpush.msrb.mxu1 %v5017_v25  ;;  %v5068_v24 = vld [vmem:[%s6444_s2 + $0x168] sm:$0xff]  ;;  %v5082_v25 = vld [vmem:[%s6444_s2 + $0x1b0] sm:$0xff] }
 0xa97   : > { %v3500_v29 = vpop.f32.mrf.mxu1 }
 0xa98   : > { %v3501_v30 = vadd.f32 %v3500_v29, %v3457_v28  ;;  %v3907_v28 = vld [vmem:[%s6444_s2 + $0x20] sm:$0xff]  ;;  %v5016_v29 = vld [vmem:[%s6444_s2 + $0x68] sm:$0xff] }
 0xa99   : > { %3940 = vmatpush.msra.mxu0 %v3907_v28  ;;  %3982 = vmatpush.msrb.mxu1 %v5016_v29 }
 0xa9a   : > { %v3508_v31 = vmax.f32 %v3501_v30, 0.0  ;;  %v5030_v30 = vld [vmem:[%s6444_s2 + $0xb0] sm:$0xff] }
 0xa9c   : > { %4949 = vmatmul.msk.f32.gmra.mxu2 %vm2421_vm7, %v3508_v31  ;;  %4957 = vmatmul.msk.f32.gmra.mxu3 %vm2421_vm7, %v3508_v31 }
 0xa9d   : > { %4965 = vmatmul.msk.f32.gmra.mxu0 %vm2421_vm7, %v3508_v31  ;;  %4973 = vmatmul.msk.f32.gmra.mxu1 %vm2421_vm7, %v3508_v31 }
 0xa9f   : > { %v3503_v33 = vpop.f32.mrf.mxu1 }
 0xaa0   : > { %v3504_v34 = vadd.f32 %v3503_v33, %v3462_v32  ;;  %v3906_v32 = vld [vmem:[%s6444_s2 + $0x18] sm:$0xff]  ;;  %v5015_v33 = vld [vmem:[%s6444_s2 + $0x60] sm:$0xff] }
 0xaa1   : > { %3941 = vmatpush.msra.mxu0 %v3906_v32  ;;  %3983 = vmatpush.msrb.mxu1 %v5015_v33  ;;  %v3834_v33 = vpop.permute.xlu2 %3833 }
 0xaa2   : > { %v3509_v35 = vmax.f32 %v3504_v34, 0.0  ;;  %v5029_v34 = vld [vmem:[%s6444_s2 + $0xa8] sm:$0xff] }
 0xaa4   : > { %4950 = vmatmul.msk.f32.gmra.mxu2 %vm2421_vm7, %v3509_v35  ;;  %4958 = vmatmul.msk.f32.gmra.mxu3 %vm2421_vm7, %v3509_v35 }
 0xaa5   : > { %4966 = vmatmul.msk.f32.gmra.mxu0 %vm2421_vm7, %v3509_v35  ;;  %4974 = vmatmul.msk.f32.gmra.mxu1 %vm2421_vm7, %v3509_v35 }
 0xaac   : > { %4979 = vmatmul.msk.f32.vlgmr.msrb.gmra.mxu2 %vm2421_vm7, %v3506_v23  ;;  %4987 = vmatmul.msk.f32.vlgmr.msra.gmra.mxu3 %vm2421_vm7, %v3506_v23 }
 0xaad   : > { %4995 = vmatmul.msk.f32.vlgmr.msrb.gmra.mxu0 %vm2421_vm7, %v3506_v23  ;;  %5003 = vmatmul.msk.f32.vlgmr.msra.gmra.mxu1 %vm2421_vm7, %v3506_v23  ;;  %v5046_v23 = vld [vmem:[%s6444_s2 + $0x108] sm:$0xff] }
 0xab4   : > { %4980 = vmatmul.msk.f32.gmra.mxu2 %vm2421_vm7, %v3507_v27  ;;  %4988 = vmatmul.msk.f32.gmra.mxu3 %vm2421_vm7, %v3507_v27 }
 0xab5   : > { %4996 = vmatmul.msk.f32.gmra.mxu0 %vm2421_vm7, %v3507_v27  ;;  %5004 = vmatmul.msk.f32.gmra.mxu1 %vm2421_vm7, %v3507_v27  ;;  %v5045_v27 = vld [vmem:[%s6444_s2 + $0x100] sm:$0xff] }
 0xabc   : > { %4981 = vmatmul.msk.f32.gmra.mxu2 %vm2421_vm7, %v3508_v31  ;;  %4989 = vmatmul.msk.f32.gmra.mxu3 %vm2421_vm7, %v3508_v31 }
 0xabd   : > { %4997 = vmatmul.msk.f32.gmra.mxu0 %vm2421_vm7, %v3508_v31  ;;  %5005 = vmatmul.msk.f32.gmra.mxu1 %vm2421_vm7, %v3508_v31  ;;  %v5044_v31 = vld [vmem:[%s6444_s2 + $0xf8] sm:$0xff] }
 0xac4   : > { %4982 = vmatmul.msk.f32.gmra.mxu2 %vm2421_vm7, %v3509_v35  ;;  %4990 = vmatmul.msk.f32.gmra.mxu3 %vm2421_vm7, %v3509_v35 }
 0xac5   : > { %4998 = vmatmul.msk.f32.gmra.mxu0 %vm2421_vm7, %v3509_v35  ;;  %5006 = vmatmul.msk.f32.gmra.mxu1 %vm2421_vm7, %v3509_v35  ;;  %v5043_v35 = vld [vmem:[%s6444_s2 + $0xf0] sm:$0xff] }
 0xb0a   : > { %v3617_v36 = vpop.f32.mrf.mxu0  ;;  %v3653_v37 = vpop.f32.mrf.mxu1 }
 0xb0f   : > { %v3581_v38 = vpop.f32.mrf.mxu3  ;;  %v3545_v41 = vpop.f32.mrf.mxu2 }
 0xb12   : > { %v3620_v39 = vpop.f32.mrf.mxu0  ;;  %v3656_v40 = vpop.f32.mrf.mxu1 }
 0xb17   : > { %v3584_v42 = vpop.f32.mrf.mxu3  ;;  %v3548_v45 = vpop.f32.mrf.mxu2 }
 0xb1a   : > { %v3623_v43 = vpop.f32.mrf.mxu0  ;;  %v3659_v44 = vpop.f32.mrf.mxu1 }
 0xb1f   : > { %v3587_v46 = vpop.f32.mrf.mxu3  ;;  %v3551_v49 = vpop.f32.mrf.mxu2 }
 0xb22   : > { %v3626_v47 = vpop.f32.mrf.mxu0  ;;  %v3662_v48 = vpop.f32.mrf.mxu1 }
 0xb23   : > { %3841 = vmatpush.msra.mxu2 %v3662_v48  ;;  %v5062_v48 = vld [vmem:[%s6444_s2 + $0x160] sm:$0x1] }
 0xb25   : > { %3842 = vmatpush.msra.mxu2 %v3659_v44  ;;  %v3903_v44 = vld [vmem:[%s6444_s2] sm:$0xff] }
 0xb27   : > { %3843 = vmatpush.msra.mxu2 %v3656_v40  ;;  %v3590_v50 = vpop.f32.mrf.mxu3  ;;  %v3554_v53 = vpop.f32.mrf.mxu2  ;;  %v3904_v40 = vld [vmem:[%s6444_s2 + $0x8] sm:$0xff] }
 0xb29   : > { %3844 = vmatpush.msra.mxu2 %v3653_v37  ;;  %v5014_v37 = vld [vmem:[%s6444_s2 + $0x58] sm:$0xff] }
 0xb2a   : > { %v3797_v51 = vpop.f32.mrf.mxu1  ;;  %v3761_v52 = vpop.f32.mrf.mxu0  ;;  %3984 = vmatpush.msrb.mxu1 %v5014_v37 }
 0xb2b   : > { %3845 = vmatpush.msra.mxu2 %v3626_v47  ;;  %v5040_v47 = vld [vmem:[%s6444_s2 + $0xd8] sm:$0xff] }
 0xb2d   : > { %3846 = vmatpush.msra.mxu2 %v3623_v43  ;;  %v5041_v43 = vld [vmem:[%s6444_s2 + $0xe0] sm:$0xff] }
 0xb2f   : > { %3847 = vmatpush.msra.mxu2 %v3620_v39  ;;  %v3725_v55 = vpop.f32.mrf.mxu3  ;;  %v3689_v58 = vpop.f32.mrf.mxu2  ;;  %v5042_v39 = vld [vmem:[%s6444_s2 + $0xe8] sm:$0xff] }
 0xb31   : > { %3848 = vmatpush.msra.mxu2 %v3617_v36  ;;  %v3905_v36 = vld [vmem:[%s6444_s2 + $0x10] sm:$0xff] }
 0xb32   : > { %v3800_v54 = vpop.f32.mrf.mxu1  ;;  %v3764_v56 = vpop.f32.mrf.mxu0  ;;  %3942 = vmatpush.msra.mxu0 %v3905_v36 }
 0xb33   : > { %3849 = vmatpush.msra.mxu2 %v3590_v50  ;;  %v5090_v50 = vld [vmem:[%s6444_s2 + $0x1f0] sm:$0x1] }
 0xb34   : > { %3943 = vmatpush.msra.mxu0 %v3904_v40 }
 0xb35   : > { %3850 = vmatpush.msra.mxu2 %v3587_v46  ;;  %v5026_v46 = vld [vmem:[%s6444_s2 + $0x90] sm:$0xff] }
 0xb36   : > { %3944 = vmatpush.msra.mxu0 %v3903_v44 }
 0xb37   : > { %3851 = vmatpush.msra.mxu2 %v3584_v42  ;;  %v3728_v59 = vpop.f32.mrf.mxu3  ;;  %v3692_v63 = vpop.f32.mrf.mxu2  ;;  %v5027_v42 = vld [vmem:[%s6444_s2 + $0x98] sm:$0xff] }
 0xb38   : > { %5063 = vmatpush.msk.msrb.mxu0 %vm3925_vm2, %v5062_v48 }
 0xb39   : > { %3852 = vmatpush.msra.mxu2 %v3581_v38  ;;  %v5028_v38 = vld [vmem:[%s6444_s2 + $0xa0] sm:$0xff] }
 0xb3a   : > { %v3803_v57 = vpop.f32.mrf.mxu1  ;;  %v3767_v61 = vpop.f32.mrf.mxu0 }
 0xb3b   : > { %3853 = vmatpush.msra.mxu2 %v3554_v53  ;;  %v5061_v53 = vld [vmem:[%s6444_s2 + $0x158] sm:$0xff] }
 0xb3c   : > { %4105 = vmatpush.msrb.mxu0 %v5061_v53 }
 0xb3d   : > { %3854 = vmatpush.msra.mxu2 %v3551_v49  ;;  %v5076_v49 = vld [vmem:[%s6444_s2 + $0x1a8] sm:$0x1] }
 0xb3f   : > { %3855 = vmatpush.msra.mxu2 %v3548_v45  ;;  %v3731_v1 = vpop.f32.mrf.mxu3  ;;  %v3695_v4 = vpop.f32.mrf.mxu2  ;;  %v5012_v45 = vld [vmem:[%s6444_s2 + $0x48] sm:$0xff] }
 0xb41   : > { %3856 = vmatpush.msra.mxu2 %v3545_v41  ;;  %v5013_v41 = vld [vmem:[%s6444_s2 + $0x50] sm:$0xff] }
 0xb42   : > { %v3806_v62 = vpop.f32.mrf.mxu1  ;;  %3857 = vmatmul.f32.vlgmr.msra.gmra.mxu2 %v3809_v60  ;;  %v3770_v2 = vpop.f32.mrf.mxu0  ;;  %3985 = vmatpush.msrb.mxu1 %v5013_v41  ;;  %v5102_v60 = vld [vmem:[%s6444_s2 + $0x228] sm:$0xff] }
 0xb43   : > { %3870 = vmatpush.msrb.mxu3 %v3806_v62  ;;  %5035 = vmatpush.msk.msrb.mxu2 %vm3925_vm2, %v5034_v15  ;;  %v5073_v62 = vld [vmem:[%s6444_s2 + $0x190] sm:$0xff]  ;;  %v5084_v15 = vld [vmem:[%s6444_s2 + $0x1c0] sm:$0xff] }
 0xb44   : > { %3986 = vmatpush.msrb.mxu1 %v5012_v45 }
 0xb45   : > { %3871 = vmatpush.msrb.mxu3 %v3803_v57  ;;  %4021 = vmatpush.msrb.mxu2 %v5033_v18  ;;  %v5060_v57 = vld [vmem:[%s6444_s2 + $0x150] sm:$0xff] }
 0xb46   : > { %5077 = vmatpush.msk.msra.mxu1 %vm3925_vm2, %v5076_v49  ;;  %4106 = vmatpush.msrb.mxu0 %v5060_v57 }
 0xb47   : > { %3872 = vmatpush.msrb.mxu3 %v3800_v54  ;;  %v3734_v5 = vpop.f32.mrf.mxu3  ;;  %v3698_v7 = vpop.f32.mrf.mxu2  ;;  %4022 = vmatpush.msrb.mxu2 %v5032_v22  ;;  %v5075_v54 = vld [vmem:[%s6444_s2 + $0x1a0] sm:$0xff] }
 0xb48   : > { %4147 = vmatpush.msra.mxu1 %v5075_v54 }
 0xb49   : > { %3873 = vmatpush.msrb.mxu3 %v3797_v51  ;;  %4023 = vmatpush.msrb.mxu2 %v5031_v26  ;;  %v5104_v51 = vld [vmem:[%s6444_s2 + $0x238] sm:$0x1] }
 0xb4a   : > { %3860 = vmatmul.f32.gmra.mxu2 %v3811_v0  ;;  %v5101_v0 = vld [vmem:[%s6444_s2 + $0x220] sm:$0xff]  ;;  %v5096_v26 = vld [vmem:[%s6444_s2 + $0x1f8] sm:$0xff] }
 0xb4b   : > { %3874 = vmatpush.msrb.mxu3 %v3770_v2  ;;  %4024 = vmatpush.msrb.mxu2 %v5030_v30  ;;  %v5072_v2 = vld [vmem:[%s6444_s2 + $0x188] sm:$0xff] }
 0xb4d   : > { %3875 = vmatpush.msrb.mxu3 %v3767_v61  ;;  %4025 = vmatpush.msrb.mxu2 %v5029_v34  ;;  %v5059_v61 = vld [vmem:[%s6444_s2 + $0x148] sm:$0xff] }
 0xb4e   : > { %4107 = vmatpush.msrb.mxu0 %v5059_v61 }
 0xb4f   : > { %3876 = vmatpush.msrb.mxu3 %v3764_v56  ;;  %4026 = vmatpush.msrb.mxu2 %v5028_v38  ;;  %v5103_v56 = vld [vmem:[%s6444_s2 + $0x230] sm:$0xff] }
 0xb51   : > { %3877 = vmatpush.msrb.mxu3 %v3761_v52  ;;  %4027 = vmatpush.msrb.mxu2 %v5027_v42 }
 0xb52   : > { %3863 = vmatmul.f32.gmra.mxu2 %v3813_v3  ;;  %v5086_v3 = vld [vmem:[%s6444_s2 + $0x1d0] sm:$0xff] }
 0xb53   : > { %3878 = vmatpush.msrb.mxu3 %v3734_v5  ;;  %4028 = vmatpush.msrb.mxu2 %v5026_v46  ;;  %v3824_v5 = vpop.permute.xlu0 %3823 }
 0xb55   : > { %3879 = vmatpush.msrb.mxu3 %v3731_v1  ;;  %5091 = vmatpush.msk.msra.mxu2 %vm3925_vm2, %v5090_v50  ;;  %v5058_v1 = vld [vmem:[%s6444_s2 + $0x140] sm:$0xff] }
 0xb56   : > { %4108 = vmatpush.msrb.mxu0 %v5058_v1 }
 0xb57   : > { %3880 = vmatpush.msrb.mxu3 %v3728_v59  ;;  %v5088_v59 = vld [vmem:[%s6444_s2 + $0x1e0] sm:$0xff] }
 0xb59   : > { %3881 = vmatpush.msrb.mxu3 %v3725_v55  ;;  %v5089_v55 = vld [vmem:[%s6444_s2 + $0x1e8] sm:$0xff] }
 0xb5a   : > { %3866 = vmatmul.f32.gmra.mxu2 %v3815_v6  ;;  %v5057_v6 = vld [vmem:[%s6444_s2 + $0x138] sm:$0xff] }
 0xb5b   : > { %3882 = vmatpush.msrb.mxu3 %v3698_v7  ;;  %4189 = vmatpush.msra.mxu2 %v5089_v55  ;;  %v5071_v7 = vld [vmem:[%s6444_s2 + $0x180] sm:$0xff] }
 0xb5c   : > { %4109 = vmatpush.msrb.mxu0 %v5057_v6 }
 0xb5d   : > { %3883 = vmatpush.msrb.mxu3 %v3695_v4  ;;  %4190 = vmatpush.msra.mxu2 %v5088_v59  ;;  %v5100_v4 = vld [vmem:[%s6444_s2 + $0x218] sm:$0xff] }
 0xb5f   : > { %3884 = vmatpush.msrb.mxu3 %v3692_v63  ;;  %v5087_v63 = vld [vmem:[%s6444_s2 + $0x1d8] sm:$0xff] }
 0xb60   : > { %4191 = vmatpush.msra.mxu2 %v5087_v63 }
 0xb61   : > { %3885 = vmatpush.msrb.mxu3 %v3689_v58  ;;  %v5074_v58 = vld [vmem:[%s6444_s2 + $0x198] sm:$0xff] }
 0xb62   : > { %3886 = vmatmul.f32.vlgmr.msrb.gmra.mxu3 %v3810_v8  ;;  %4148 = vmatpush.msra.mxu1 %v5074_v58  ;;  %v5085_v8 = vld [vmem:[%s6444_s2 + $0x1c8] sm:$0xff] }
 0xb63   : > { %5049 = vmatpush.msk.msra.mxu3 %vm3925_vm2, %v5048_v16  ;;  %4192 = vmatpush.msra.mxu2 %v5086_v3  ;;  %v5098_v16 = vld [vmem:[%s6444_s2 + $0x208] sm:$0xff] }
 0xb64   : > { %4149 = vmatpush.msra.mxu1 %v5073_v62 }
 0xb65   : > { %4063 = vmatpush.msra.mxu3 %v5047_v19  ;;  %4193 = vmatpush.msra.mxu2 %v5085_v8  ;;  %v5069_v19 = vld [vmem:[%s6444_s2 + $0x170] sm:$0xff] }
 0xb66   : > { %4150 = vmatpush.msra.mxu1 %v5072_v2  ;;  %v4254_v8 = vld [vmem:[%s6446_s1 + $0x10] sm:$0xff] }
 0xb67   : > { %4064 = vmatpush.msra.mxu3 %v5046_v23  ;;  %4194 = vmatpush.msra.mxu2 %v5084_v15  ;;  %v5054_v23 = vld [vmem:[%s6444_s2 + $0x120] sm:$0xff] }
 0xb68   : > { %4151 = vmatpush.msra.mxu1 %v5071_v7 }
 0xb69   : > { %4065 = vmatpush.msra.mxu3 %v5045_v27  ;;  %4195 = vmatpush.msra.mxu2 %v5083_v20  ;;  %v3829_v27 = vpop.permute.xlu1 %3828 }
 0xb6a   : > { %3889 = vmatmul.f32.gmra.mxu3 %v3812_v9  ;;  %4152 = vmatpush.msra.mxu1 %v5070_v12 }
 0xb6b   : > { %4066 = vmatpush.msra.mxu3 %v5044_v31  ;;  %4196 = vmatpush.msra.mxu2 %v5082_v25 }
 0xb6c   : > { %4153 = vmatpush.msra.mxu1 %v5069_v19  ;;  %v4259_v19 = vld [vmem:[%s6446_s1 + $0x38] sm:$0xff] }
 0xb6d   : > { %4067 = vmatpush.msra.mxu3 %v5043_v35 }
 0xb6e   : > { %4154 = vmatpush.msra.mxu1 %v5068_v24 }
 0xb6f   : > { %4068 = vmatpush.msra.mxu3 %v5042_v39  ;;  %v3839_v39 = vpop.permute.xlu0 %3838 }
 0xb71   : > { %4069 = vmatpush.msra.mxu3 %v5041_v43  ;;  %v4282_v25 = vpop.permute.xlu1 %4281 }
 0xb72   : > { %3892 = vmatmul.f32.gmra.mxu3 %v3814_v10  ;;  %v5099_v10 = vld [vmem:[%s6444_s2 + $0x210] sm:$0xff] }
 0xb73   : > { %4070 = vmatpush.msra.mxu3 %v5040_v47 }
 0xb75   : > { %5105 = vmatpush.msk.msrb.mxu3 %vm3925_vm2, %v5104_v51 }
 0xb77   : > { %4231 = vmatpush.msrb.mxu3 %v5103_v56 }
 0xb79   : > { %4232 = vmatpush.msrb.mxu3 %v5102_v60 }
 0xb7a   : > { %3895 = vmatmul.f32.gmra.mxu3 %v3816_v11  ;;  %v5056_v11 = vld [vmem:[%s6444_s2 + $0x130] sm:$0xff]  ;;  %s6448_s2 = smov %s6447_s22 }
 0xb7b   : > { %4233 = vmatpush.msrb.mxu3 %v5101_v0  ;;  %4110 = vmatpush.msrb.mxu0 %v5056_v11  ;;  %v4256_v11 = vld [vmem:[%s6446_s1 + $0x20] sm:$0xff] }
 0xb7d   : > { %4234 = vmatpush.msrb.mxu3 %v5100_v4  ;;  %4111 = vmatpush.msrb.mxu0 %v5055_v17  ;;  %v4252_v4 = vld [vmem:[%s6445_s26] sm:$0xff]  ;;  %v4255_v17 = vld [vmem:[%s6446_s1 + $0x18] sm:$0xff]  ;;  %s4441_s26 = sshll.u32 %s5743_s18, 4  ;;  %s4442_s26 = int_to_ptr.vmem [resolvable:$true] %s4441_s26 }
 0xb7f   : > { %4235 = vmatpush.msrb.mxu3 %v5099_v10  ;;  %4112 = vmatpush.msrb.mxu0 %v5054_v23 }
 0xb81   : > { %4236 = vmatpush.msrb.mxu3 %v5098_v16  ;;  %v4253_v16 = vld [vmem:[%s6446_s1 + $0x8] sm:$0xff] }
 0xb83   : > { %4237 = vmatpush.msrb.mxu3 %v5097_v21 }
 0xb85   : > { %4238 = vmatpush.msrb.mxu3 %v5096_v26 }
 0xbc5   : > { %v3858_v52 = vpop.f32.mrf.mxu2 }
 0xbc6   : > { %v3859_v9 = vadd.f32 %v3858_v52, %v3824_v5 }
 0xbcd   : > { %v3861_v13 = vpop.f32.mrf.mxu2 }
 0xbce   : > { %v3862_v28 = vadd.f32 %v3861_v13, %v3829_v27 }
 0xbd5   : > { %v3864_v31 = vpop.f32.mrf.mxu2 }
 0xbd6   : > { %v3865_v34 = vadd.f32 %v3864_v31, %v3834_v33  ;;  %v4272_v31 = vpop.permute.xlu0 %4271 }
 0xbdd   : > { %v3867_v38 = vpop.f32.mrf.mxu2 }
 0xbde   : > { %v3868_v40 = vadd.f32 %v3867_v38, %v3839_v39 }
 0xbe5   : > { %v3887_v14 = vpop.f32.mrf.mxu3 }
 0xbe6   : > { %v3888_v18 = vadd.f32 %v3887_v14, %v3859_v9  ;;  %v4258_v14 = vld [vmem:[%s6446_s1 + $0x30] sm:$0xff] }
 0xbe8   : > { %v3899_v22 = vmax.f32 %v3888_v18, 0.0  ;;  %v4257_v18 = vld [vmem:[%s6446_s1 + $0x28] sm:$0xff]  ;;  %s6386_s1 = sshll.u32 %s5648_s0, 5 }
 0xbea   : > { %5008 = vmatmul.msk.f32.vlgmr.msra.gmra.mxu0 %vm3912_vm3, %v3899_v22  ;;  %5022 = vmatmul.msk.f32.vlgmr.msrb.gmra.mxu1 %vm3912_vm3, %v3899_v22 }
 0xbeb   : > { %5036 = vmatmul.msk.f32.vlgmr.msrb.gmra.mxu2 %vm3912_vm3, %v3899_v22  ;;  %5050 = vmatmul.msk.f32.vlgmr.msra.gmra.mxu3 %vm3912_vm3, %v3899_v22 }
 0xbed   : > { %v3890_v29 = vpop.f32.mrf.mxu3 }
 0xbee   : > { %v3891_v30 = vadd.f32 %v3890_v29, %v3862_v28  ;;  %v4277_v28 = vpop.permute.xlu2 %4276 }
 0xbf0   : > { %v3900_v32 = vmax.f32 %v3891_v30, 0.0 }
 0xbf2   : > { %5009 = vmatmul.msk.f32.gmra.mxu0 %vm3912_vm3, %v3900_v32  ;;  %5023 = vmatmul.msk.f32.gmra.mxu1 %vm3912_vm3, %v3900_v32 }
 0xbf3   : > { %5037 = vmatmul.msk.f32.gmra.mxu2 %vm3912_vm3, %v3900_v32  ;;  %5051 = vmatmul.msk.f32.gmra.mxu3 %vm3912_vm3, %v3900_v32 }
 0xbf5   : > { %v3893_v35 = vpop.f32.mrf.mxu3 }
 0xbf6   : > { %v3894_v36 = vadd.f32 %v3893_v35, %v3865_v34 }
 0xbf8   : > { %v3901_v37 = vmax.f32 %v3894_v36, 0.0  ;;  %v4267_v36 = vpop.permute.xlu1 %4266 }
 0xbfa   : > { %5010 = vmatmul.msk.f32.gmra.mxu0 %vm3912_vm3, %v3901_v37  ;;  %5024 = vmatmul.msk.f32.gmra.mxu1 %vm3912_vm3, %v3901_v37 }
 0xbfb   : > { %5038 = vmatmul.msk.f32.gmra.mxu2 %vm3912_vm3, %v3901_v37  ;;  %5052 = vmatmul.msk.f32.gmra.mxu3 %vm3912_vm3, %v3901_v37 }
 0xbfd   : > { %v3896_v41 = vpop.f32.mrf.mxu3 }
 0xbfe   : > { %v3897_v42 = vadd.f32 %v3896_v41, %v3868_v40 }
 0xc00   : > { %v3902_v43 = vmax.f32 %v3897_v42, 0.0 }
 0xc02   : > { %5011 = vmatmul.msk.f32.gmra.mxu0 %vm3912_vm3, %v3902_v43  ;;  %5025 = vmatmul.msk.f32.gmra.mxu1 %vm3912_vm3, %v3902_v43 }
 0xc03   : > { %5039 = vmatmul.msk.f32.gmra.mxu2 %vm3912_vm3, %v3902_v43  ;;  %5053 = vmatmul.msk.f32.gmra.mxu3 %vm3912_vm3, %v3902_v43 }
 0xc0a   : > { %5064 = vmatmul.msk.f32.vlgmr.msrb.gmra.mxu0 %vm3912_vm3, %v3899_v22  ;;  %5078 = vmatmul.msk.f32.vlgmr.msra.gmra.mxu1 %vm3912_vm3, %v3899_v22 }
 0xc0b   : > { %5092 = vmatmul.msk.f32.vlgmr.msra.gmra.mxu2 %vm3912_vm3, %v3899_v22  ;;  %5106 = vmatmul.msk.f32.vlgmr.msrb.gmra.mxu3 %vm3912_vm3, %v3899_v22 }
 0xc12   : > { %5065 = vmatmul.msk.f32.gmra.mxu0 %vm3912_vm3, %v3900_v32  ;;  %5079 = vmatmul.msk.f32.gmra.mxu1 %vm3912_vm3, %v3900_v32 }
 0xc13   : > { %5093 = vmatmul.msk.f32.gmra.mxu2 %vm3912_vm3, %v3900_v32  ;;  %5107 = vmatmul.msk.f32.gmra.mxu3 %vm3912_vm3, %v3900_v32 }
 0xc1a   : > { %5066 = vmatmul.msk.f32.gmra.mxu0 %vm3912_vm3, %v3901_v37  ;;  %5080 = vmatmul.msk.f32.gmra.mxu1 %vm3912_vm3, %v3901_v37 }
 0xc1b   : > { %5094 = vmatmul.msk.f32.gmra.mxu2 %vm3912_vm3, %v3901_v37  ;;  %5108 = vmatmul.msk.f32.gmra.mxu3 %vm3912_vm3, %v3901_v37 }
 0xc22   : > { %5067 = vmatmul.msk.f32.gmra.mxu0 %vm3912_vm3, %v3902_v43  ;;  %5081 = vmatmul.msk.f32.gmra.mxu1 %vm3912_vm3, %v3902_v43 }
 0xc23   : > { %5095 = vmatmul.msk.f32.gmra.mxu2 %vm3912_vm3, %v3902_v43  ;;  %5109 = vmatmul.msk.f32.gmra.mxu3 %vm3912_vm3, %v3902_v43  ;;  %v4346_v43 = vld [vmem:[%s6447_s22] sm:$0xff]  ;;  %s4440_s22 = scalar_lea.hbm %s5615_s24, %s6386_s1 }
 0xc24   : > { %s4443_s3 = sshll.u32 %s4440_s22, 4  ;;  %s4444_s3 = int_to_ptr.hbm [resolvable:$true] %s4443_s3 }
 0xc25   : > { %s5315_s5 = sshra.s32 %s4444_s3, 4  ;;  %s5316_s5 = int_to_ptr.hbm [resolvable:$true] %s5315_s5 }
 0xc26   : > { %s5317_s6 = scalar_lea.hbm %s5316_s5, 32  ;;  %p5322_p13 = scmp.lt.s32.totalorder %s5316_s5, %s5615_s24 }
 0xc27   : > { %p5318_p9 = scmp.ne.s32.totalorder %s5316_s5, %s5317_s6  ;;  %p5323_p0 = scmp.lt.s32.totalorder %s5321_s7, %s5317_s6 }
 0xc29   : > { %p5319_p10 = pnand %p5318_p9, %p5665_p5  ;;  %p5324_p1 = por %p5323_p0, %p5322_p13 }
 0xc2b   : > { %p5320_p12 = pneg %p5319_p10 }
 0xc2d   : > { %p5325_p2 = pnand %p5324_p1, %p5320_p12 }
 0xc67   : > { %v3988_v46 = vpop.f32.mrf.mxu1  ;;  %v3946_v49 = vpop.f32.mrf.mxu0 }
 0xc6e   : > { %v4030_v44 = vpop.f32.mrf.mxu2  ;;  %v4072_v45 = vpop.f32.mrf.mxu3 }
 0xc6f   : > { %v3991_v50 = vpop.f32.mrf.mxu1  ;;  %v3949_v53 = vpop.f32.mrf.mxu0 }
 0xc76   : > { %v4033_v47 = vpop.f32.mrf.mxu2  ;;  %v4075_v48 = vpop.f32.mrf.mxu3 }
 0xc77   : > { %v3994_v54 = vpop.f32.mrf.mxu1  ;;  %v3952_v57 = vpop.f32.mrf.mxu0 }
 0xc7e   : > { %v4036_v51 = vpop.f32.mrf.mxu2  ;;  %v4078_v52 = vpop.f32.mrf.mxu3 }
 0xc7f   : > { %v3997_v58 = vpop.f32.mrf.mxu1  ;;  %v3955_v61 = vpop.f32.mrf.mxu0 }
 0xc86   : > { %v4039_v55 = vpop.f32.mrf.mxu2  ;;  %v4081_v56 = vpop.f32.mrf.mxu3 }
 0xc87   : > { %4284 = vmatpush.msra.mxu0 %v4081_v56  ;;  %v4156_v63 = vpop.f32.mrf.mxu1  ;;  %v4114_v2 = vpop.f32.mrf.mxu0 }
 0xc89   : > { %4285 = vmatpush.msra.mxu0 %v4078_v52 }
 0xc8b   : > { %4286 = vmatpush.msra.mxu0 %v4075_v48 }
 0xc8d   : > { %4287 = vmatpush.msra.mxu0 %v4072_v45  ;;  %v4347_v45 = vld [vmem:[%s6448_s2 + $0x8] sm:$0xff] }
 0xc8e   : > { %v4240_v59 = vpop.f32.mrf.mxu3  ;;  %v4198_v60 = vpop.f32.mrf.mxu2 }
 0xc8f   : > { %4288 = vmatpush.msra.mxu0 %v4039_v55  ;;  %v4159_v3 = vpop.f32.mrf.mxu1  ;;  %v4117_v7 = vpop.f32.mrf.mxu0 }
 0xc91   : > { %4289 = vmatpush.msra.mxu0 %v4036_v51 }
 0xc93   : > { %4290 = vmatpush.msra.mxu0 %v4033_v47  ;;  %v4349_v47 = vld [vmem:[%s6448_s2 + $0x18] sm:$0xff] }
 0xc95   : > { %4291 = vmatpush.msra.mxu0 %v4030_v44 }
 0xc96   : > { %v4243_v62 = vpop.f32.mrf.mxu3  ;;  %v4201_v0 = vpop.f32.mrf.mxu2 }
 0xc97   : > { %4292 = vmatpush.msra.mxu0 %v3997_v58  ;;  %v4162_v9 = vpop.f32.mrf.mxu1  ;;  %v4120_v12 = vpop.f32.mrf.mxu0 }
 0xc99   : > { %4293 = vmatpush.msra.mxu0 %v3994_v54 }
 0xc9b   : > { %4294 = vmatpush.msra.mxu0 %v3991_v50 }
 0xc9d   : > { %4295 = vmatpush.msra.mxu0 %v3988_v46  ;;  %v4348_v46 = vld [vmem:[%s6448_s2 + $0x10] sm:$0xff] }
 0xc9e   : > { %v4246_v1 = vpop.f32.mrf.mxu3  ;;  %v4204_v5 = vpop.f32.mrf.mxu2 }
 0xc9f   : > { %4296 = vmatpush.msra.mxu0 %v3955_v61  ;;  %v4165_v13 = vpop.f32.mrf.mxu1  ;;  %v4123_v15 = vpop.f32.mrf.mxu0 }
 0xca1   : > { %4297 = vmatpush.msra.mxu0 %v3952_v57 }
 0xca3   : > { %4298 = vmatpush.msra.mxu0 %v3949_v53 }
 0xca5   : > { %4299 = vmatpush.msra.mxu0 %v3946_v49 }
 0xca6   : > { %v4249_v6 = vpop.f32.mrf.mxu3  ;;  %4300 = vmatmul.f32.vlgmr.msra.gmra.mxu0 %v4252_v4  ;;  %v4207_v10 = vpop.f32.mrf.mxu2 }
 0xca7   : > { %4313 = vmatpush.msrb.mxu1 %v4249_v6 }
 0xca9   : > { %4314 = vmatpush.msrb.mxu1 %v4246_v1 }
 0xcab   : > { %4315 = vmatpush.msrb.mxu1 %v4243_v62 }
 0xcad   : > { %4316 = vmatpush.msrb.mxu1 %v4240_v59 }
 0xcae   : > { %4303 = vmatmul.f32.gmra.mxu0 %v4254_v8 }
 0xcaf   : > { %4317 = vmatpush.msrb.mxu1 %v4207_v10 }
 0xcb1   : > { %4318 = vmatpush.msrb.mxu1 %v4204_v5 }
 0xcb3   : > { %4319 = vmatpush.msrb.mxu1 %v4201_v0 }
 0xcb5   : > { %4320 = vmatpush.msrb.mxu1 %v4198_v60 }
 0xcb6   : > { %4306 = vmatmul.f32.gmra.mxu0 %v4256_v11 }
 0xcb7   : > { %4321 = vmatpush.msrb.mxu1 %v4165_v13 }
 0xcb9   : > { %4322 = vmatpush.msrb.mxu1 %v4162_v9 }
 0xcbb   : > { %4323 = vmatpush.msrb.mxu1 %v4159_v3 }
 0xcbd   : > { %4324 = vmatpush.msrb.mxu1 %v4156_v63 }
 0xcbe   : > { %4309 = vmatmul.f32.gmra.mxu0 %v4258_v14 }
 0xcbf   : > { %4325 = vmatpush.msrb.mxu1 %v4123_v15 }
 0xcc1   : > { %4326 = vmatpush.msrb.mxu1 %v4120_v12 }
 0xcc3   : > { %4327 = vmatpush.msrb.mxu1 %v4117_v7 }
 0xcc5   : > { %4328 = vmatpush.msrb.mxu1 %v4114_v2 }
 0xcc6   : > { %4329 = vmatmul.f32.vlgmr.msrb.gmra.mxu1 %v4253_v16 }
 0xcce   : > { %4332 = vmatmul.f32.gmra.mxu1 %v4255_v17 }
 0xcd6   : > { %4335 = vmatmul.f32.gmra.mxu1 %v4257_v18 }
 0xcde   : > { %4338 = vmatmul.f32.gmra.mxu1 %v4259_v19 }
 0xd23   : > { %v4301_v20 = vpop.f32.mrf.mxu0 }
 0xd24   : > { %v4302_v37 = vadd.f32 %v4301_v20, %v4267_v36 }
 0xd2b   : > { %v4304_v21 = vpop.f32.mrf.mxu0 }
 0xd2c   : > { %v4305_v33 = vadd.f32 %v4304_v21, %v4272_v31 }
 0xd33   : > { %v4307_v24 = vpop.f32.mrf.mxu0 }
 0xd34   : > { %v4308_v29 = vadd.f32 %v4307_v24, %v4277_v28 }
 0xd3b   : > { %v4310_v27 = vpop.f32.mrf.mxu0 }
 0xd3c   : > { %v4311_v30 = vadd.f32 %v4310_v27, %v4282_v25 }
 0xd43   : > { %v4330_v22 = vpop.f32.mrf.mxu1 }
 0xd44   : > { %v4331_v39 = vadd.f32 %v4330_v22, %v4302_v37 }
 0xd4b   : > { %v4333_v23 = vpop.f32.mrf.mxu1 }
 0xd4c   : > { %v4334_v38 = vadd.f32 %v4333_v23, %v4305_v33 }
 0xd53   : > { %v4336_v26 = vpop.f32.mrf.mxu1 }
 0xd54   : > { %v4337_v34 = vadd.f32 %v4336_v26, %v4308_v29 }
 0xd5b   : > { %v4339_v32 = vpop.f32.mrf.mxu1 }
 0xd5c   : > { %v4340_v35 = vadd.f32 %v4339_v32, %v4311_v30 }
 0xd5e   : > { %5263 = vtanh.f32 %v4340_v35 }
 0xd5f   : > { %5265 = vtanh.f32 %v4337_v34 }
 0xd60   : > { %5267 = vtanh.f32 %v4334_v38 }
 0xd61   : > { %5269 = vtanh.f32 %v4331_v39 }
 0xd64   : > { %v5264_v40 = vpop.eup %5263 }
 0xd65   : > { %4398 = vmatpush.msrb.mxu2 %v5264_v40  ;;  %v5266_v41 = vpop.eup %5265 }
 0xd66   : > { %v5268_v42 = vpop.eup %5267 }
 0xd67   : > { %4399 = vmatpush.msrb.mxu2 %v5266_v41  ;;  %v5270_v44 = vpop.eup %5269 }
 0xd69   : > { %4400 = vmatpush.msrb.mxu2 %v5268_v42 }
 0xd6b   : > { %4401 = vmatpush.msrb.mxu2 %v5270_v44 }
 0xd6c   : > { %5110 = vmatmul.msk.f32.vlgmr.msrb.gmra.mxu2 %vm1139_vm0, %v4346_v43 }
 0xd74   : > { %5111 = vmatmul.msk.f32.gmra.mxu2 %vm1139_vm0, %v4347_v45 }
 0xd7c   : > { %5112 = vmatmul.msk.f32.gmra.mxu2 %vm1139_vm0, %v4348_v46 }
 0xd84   : > { %5113 = vmatmul.msk.f32.gmra.mxu2 %vm1139_vm0, %v4349_v47 }
 0xd85   : > { %5328 = shalt.err (!%p5325_p2)
}
 0xd86   : > { %s6387_s18 = smov 128   ;;  %s5441_s22 = smov 8   ;;  %v4357_v48 = vpop.permute.xlu2 %4356  ;;  %v4362_v51 = vpop.permute.xlu0 %4361 }
 0xd87   : > { %5161 = dma.vmem_to_hbm [thread:$0]  (%p5665_p5), %s4442_s26, 512, %s4444_s3, %s4420_s4, %s6387_s18, %s6387_s18, %s5441_s22   ;;  %v4367_v54 = vpop.permute.xlu1 %4366 }
 0xd88   : > { %s6449_s1 = sshll.u32 %s5738_s11, 5  ;;  %s6450_s6 = sshll.u32 %s5648_s0, 5 }
 0xd89   : > { %s1097_s5 = scalar_lea.vmem [#allocation6], %s6449_s1  ;;  %s4460_s7 = scalar_lea.hbm %s5625_s8, %s6450_s6 }
 0xd8a   : > { %s4461_s3 = sshll.u32 %s1097_s5, 4  ;;  %s4463_s4 = sshll.u32 %s4460_s7, 4  ;;  %s4462_s3 = int_to_ptr.vmem [resolvable:$true] %s4461_s3  ;;  %s4464_s4 = int_to_ptr.hbm [resolvable:$true] %s4463_s4 }
 0xd8b   : > { %s4429_s1 = scalar_lea.sflag [#allocation7], %s5738_s11  ;;  %s5343_s26 = sshra.s32 %s4464_s4, 4  ;;  %s5344_s26 = int_to_ptr.hbm [resolvable:$true] %s5343_s26 }
 0xd8c   : > { %s5345_s18 = scalar_lea.hbm %s5344_s26, 32  ;;  %s5349_s0 = scalar_lea.hbm %s5625_s8, 64 }
 0xd8d   : > { %p5346_p3 = scmp.ne.s32.totalorder %s5344_s26, %s5345_s18  ;;  %p5350_p8 = scmp.lt.s32.totalorder %s5344_s26, %s5625_s8 }
 0xd8e   : > { %v4372_v57 = vpop.permute.xlu2 %4371  ;;  %p5351_p11 = scmp.lt.s32.totalorder %s5349_s0, %s5345_s18 }
 0xd8f   : > { %p5347_p4 = pnand %p5346_p3, %p5665_p5 }
 0xd90   : > { %p5352_p9 = por %p5351_p11, %p5350_p8 }
 0xd91   : > { %p5348_p7 = pneg %p5347_p4 }
 0xd93   : > { %p5353_p10 = pnand %p5352_p9, %p5348_p7 }
 0xdef   : > { %v4403_v49 = vpop.f32.mrf.mxu2 }
 0xdf0   : > { %v4404_v50 = vadd.f32 %v4403_v49, %v4357_v48 }
 0xdf2   : > { %4415 = vst [vmem:[%s1097_s5] sm:$0xff] %v4404_v50 }
 0xdf7   : > { %v4406_v52 = vpop.f32.mrf.mxu2 }
 0xdf8   : > { %v4407_v53 = vadd.f32 %v4406_v52, %v4362_v51 }
 0xdfa   : > { %4416 = vst [vmem:[%s1097_s5 + $0x8] sm:$0xff] %v4407_v53 }
 0xdff   : > { %v4409_v55 = vpop.f32.mrf.mxu2 }
 0xe00   : > { %v4410_v56 = vadd.f32 %v4409_v55, %v4367_v54 }
 0xe02   : > { %4417 = vst [vmem:[%s1097_s5 + $0x10] sm:$0xff] %v4410_v56 }
 0xe07   : > { %v4412_v58 = vpop.f32.mrf.mxu2 }
 0xe08   : > { %v4413_v59 = vadd.f32 %v4412_v58, %v4372_v57 }
 0xe0a   : > { %4418 = vst [vmem:[%s1097_s5 + $0x18] sm:$0xff] %v4413_v59 }
 0xe0b   : > { %5356 = shalt.err (!%p5353_p10)
}
 0xe0c   : > { %s6451_s6 = smov 128  }
 0xe0d   : > { %5162 = dma.vmem_to_hbm [thread:$0]  (%p5665_p5), %s4462_s3, 512, %s4464_s4, %s4429_s1, %s6451_s6, %s6451_s6, %s5441_s22  }
 0xe0e PF: > { %s6452_s11 = sld [smem:[#allocation33_spill]]  ;;  %p5178_p12 = scmp.ge.s32.totalorder %s5399_s28, 2 }
 0xe10   : > { %p5170_p13 = pnand %p5178_p12, %p5669_p6 }
 0xe12   : > { %p5171_p0 = pneg %p5170_p13 }
 0xe14   : > { %s4478_s7 = sand.u32 1, %s6452_s11  }
 0xe15   : > { %s4479_s26 = scalar_lea.sflag [#allocation4], %s4478_s7 }
 0xe16   : > { %5378 = dma.done.wait (%p5171_p0), %s4479_s26, 512  }
 0xe17   : > { %5380 = vsyncadd (%p5171_p0), %s4479_s26, 4294966784  ;;  %s4496_s18 = scalar_lea.sflag [#allocation7], %s4478_s7 }
 0xe18   : > { %5382 = dma.done.wait (%p5171_p0), %s4496_s18, 512  }
 0xe19   : > { %5384 = vsyncadd (%p5171_p0), %s4496_s18, 4294966784  ;;  %s6454_s28 = sld [smem:[#allocation35_spill]]  ;;  %s6457_s22 = smov %s5391_s23 }
 0xe1a   : > { %s6455_s15 = sld [smem:[#allocation34_spill]] }
 0xe1b   : > { %s6456_s26 = sld [smem:[#allocation36_spill]] }
 0xe1f   : > { %p86_p5 = scmp.ge.s32.totalorder %s6454_s28, 4  }
 0xe20   : > { %s6458_s23 = smov %s6455_s15 }
 0xe21   :  { %88 = sbr.rel (!%p86_p5) target bundleno = 70 (0x46), region = 312 }
 0xe26   :  { %4502 = vsyncpa [#allocation3], 1 }
 0xe27   :  { %4504 = vsyncpa [#allocation3 + $0x1], 1 }
 0xe28   :  { %4505 = vsyncpa [#allocation4], 1 }
 0xe29   :  { %4507 = vsyncpa [#allocation4 + $0x1], 1 }
 0xe2a   :  { %4508 = vsyncpa [#allocation7], 1 }
 0xe2b   :  { %4510 = vsyncpa [#allocation7 + $0x1], 1 }

</bundles_post_ra>
